<compile_context>
chip_gen: v7x
topology: tpu7x:2x2x1
jax: 0.10.0
libtpu: 0.0.40
codegen_flags: <defaults>
</compile_context>

<pallas_src>
import functools

import jax
import jax.numpy as jnp
from jax.experimental import pallas as pl
from jax.experimental.pallas import tpu as pltpu

N_EMBED = 384                 # matches the PyTorch module spec
HIDDEN = 4 * N_EMBED          # 1536
DROPOUT_P = 0.2
TILE_M_MAX = 512              # token-tile rows; sized against the 64 MiB v7x VMEM budget


def _round_up(x, m):
    return ((x + m - 1) // m) * m


def _ffn_eval_kernel(x_ref, w1_ref, b1_ref, w2_ref, b2_ref, o_ref):
    x = x_ref[...]
    h = jnp.dot(x, w1_ref[...], preferred_element_type=jnp.float32) + b1_ref[...]
    h = jnp.maximum(h, 0.0)                                          # ReLU
    y = jnp.dot(h, w2_ref[...], preferred_element_type=jnp.float32) + b2_ref[...]
    o_ref[...] = y.astype(o_ref.dtype)                               # Dropout is identity in eval mode


def _ffn_train_kernel(x_ref, u_ref, w1_ref, b1_ref, w2_ref, b2_ref, o_ref, *, p):
    x = x_ref[...]
    h = jnp.dot(x, w1_ref[...], preferred_element_type=jnp.float32) + b1_ref[...]
    h = jnp.maximum(h, 0.0)
    y = jnp.dot(h, w2_ref[...], preferred_element_type=jnp.float32) + b2_ref[...]
    # Inverted dropout: keep iff u >= p, scale kept elements by 1/(1-p).
    # Compare + single multiply (scale folded into the mask) -> pure VPU epilogue.
    keep_scale = (u_ref[...] >= p).astype(jnp.float32) * (1.0 / (1.0 - p))
    o_ref[...] = (y * keep_scale).astype(o_ref.dtype)


def feed_forward(x, w1, b1, w2, b2, *, training=False, dropout_u=None, p=DROPOUT_P):
    """x: (B, T, C). w1: (C, H), b1: (H,), w2: (H, C), b2: (C,).
    dropout_u: optional (B*T, C) uniforms in [0,1) used as the dropout source when training.
    Returns (B, T, C)."""
    B, T, C = x.shape
    M = B * T
    H = w1.shape[1]

    tile_m = min(TILE_M_MAX, _round_up(M, 8))
    M_pad = _round_up(M, tile_m)
    grid = (M_pad // tile_m,)

    xf = x.reshape(M, C)
    if M_pad != M:
        xf = jnp.pad(xf, ((0, M_pad - M), (0, 0)))
    b1r = b1.reshape(1, H)
    b2r = b2.reshape(1, C)

    act_spec = pl.BlockSpec((tile_m, C), lambda i: (i, 0))      # pipelined over M
    out_spec = pl.BlockSpec((tile_m, C), lambda i: (i, 0))
    w1_spec = pl.BlockSpec((C, H), lambda i: (0, 0))            # VMEM-resident weights
    b1_spec = pl.BlockSpec((1, H), lambda i: (0, 0))
    w2_spec = pl.BlockSpec((H, C), lambda i: (0, 0))
    b2_spec = pl.BlockSpec((1, C), lambda i: (0, 0))

    out_shape = jax.ShapeDtypeStruct((M_pad, C), x.dtype)

    flops = 4 * M_pad * C * H                                   # two matmuls, 2*M*C*H each
    weight_bytes = (w1.size + w2.size + b1.size + b2.size) * w1.dtype.itemsize
    act_bytes = (xf.size + M_pad * C) * xf.dtype.itemsize

    compiler_params = pltpu.CompilerParams(
        dimension_semantics=("parallel",),                      # megacore sharding on v7x
        vmem_limit_bytes=64 * 1024 * 1024,                      # headroom; resident weights ~5 MiB f32
    )

    if not training:
        cost = pl.CostEstimate(flops=flops, transcendentals=0,
                               bytes_accessed=weight_bytes + act_bytes)
        out = pl.pallas_call(
            _ffn_eval_kernel,
            out_shape=out_shape,
            grid_spec=pltpu.PrefetchScalarGridSpec(
                num_scalar_prefetch=0,
                grid=grid,
                in_specs=[act_spec, w1_spec, b1_spec, w2_spec, b2_spec],
                out_specs=out_spec,
            ),
            compiler_params=compiler_params,
            cost_estimate=cost,
        )(xf, w1, b1r, w2, b2r)
    else:
        if dropout_u is None:
            dropout_u = jax.random.uniform(jax.random.PRNGKey(0), (M, C), dtype=jnp.float32)
        u = dropout_u.reshape(M, C).astype(jnp.float32)
        if M_pad != M:
            u = jnp.pad(u, ((0, M_pad - M), (0, 0)), constant_values=1.0)  # padded rows: keep
        cost = pl.CostEstimate(flops=flops, transcendentals=0,
                               bytes_accessed=weight_bytes + act_bytes + u.size * 4)
        out = pl.pallas_call(
            functools.partial(_ffn_train_kernel, p=p),
            out_shape=out_shape,
            grid_spec=pltpu.PrefetchScalarGridSpec(
                num_scalar_prefetch=0,
                grid=grid,
                in_specs=[act_spec, act_spec, w1_spec, b1_spec, w2_spec, b2_spec],
                out_specs=out_spec,
            ),
            compiler_params=compiler_params,
            cost_estimate=cost,
        )(xf, u, w1, b1r, w2, b2r)

    return out[:M].reshape(B, T, C)


def init_params(key, n_embed):
    # Deterministic init mimicking nn.Linear's uniform(-1/sqrt(fan_in), 1/sqrt(fan_in)).
    h = 4 * n_embed
    k1, k2, k3, k4 = jax.random.split(key, 4)
    lim1 = 1.0 / jnp.sqrt(n_embed)
    lim2 = 1.0 / jnp.sqrt(h)
    w1 = jax.random.uniform(k1, (n_embed, h), jnp.float32, -lim1, lim1)
    b1 = jax.random.uniform(k2, (h,), jnp.float32, -lim1, lim1)
    w2 = jax.random.uniform(k3, (h, n_embed), jnp.float32, -lim2, lim2)
    b2 = jax.random.uniform(k4, (n_embed,), jnp.float32, -lim2, lim2)
    return w1, b1, w2, b2


if __name__ == "__main__":
    key = jax.random.PRNGKey(0)
    kx, kp, kd = jax.random.split(key, 3)

    B, T = 2, 8
    x = jax.random.normal(kx, (B, T, N_EMBED), dtype=jnp.float32)
    w1, b1, w2, b2 = init_params(kp, N_EMBED)

    # Eval mode (dropout = identity): check against a pure-JAX reference.
    y = feed_forward(x, w1, b1, w2, b2, training=False)
    y = jax.block_until_ready(y)

    xf = x.reshape(-1, N_EMBED)
    ref_eval = (jnp.maximum(xf @ w1 + b1, 0.0) @ w2 + b2).reshape(B, T, N_EMBED)
    assert jnp.allclose(y, ref_eval, atol=2e-3, rtol=1e-3), "eval mismatch vs reference"

    # Training mode: dropout driven by precomputed uniforms (same randoms used for the reference).
    u = jax.random.uniform(kd, (B * T, N_EMBED), dtype=jnp.float32)
    y_train = feed_forward(x, w1, b1, w2, b2, training=True, dropout_u=u)
    y_train = jax.block_until_ready(y_train)

    keep = (u >= DROPOUT_P).astype(jnp.float32) / (1.0 - DROPOUT_P)
    ref_train = (ref_eval.reshape(-1, N_EMBED) * keep).reshape(B, T, N_EMBED)
    assert jnp.allclose(y_train, ref_train, atol=2e-3, rtol=1e-3), "train mismatch vs reference"

    print("KERNEL_OK")
</pallas_src>

<mosaic_0001>
module attributes {stable_mosaic.version = 11 : i64} {
  func.func @_ffn_eval_kernel(%arg0: i32, %arg1: memref<16x384xf32, #tpu.memory_space<vmem>>, %arg2: memref<384x1536xf32, #tpu.memory_space<vmem>>, %arg3: memref<1x1536xf32, #tpu.memory_space<vmem>>, %arg4: memref<1536x384xf32, #tpu.memory_space<vmem>>, %arg5: memref<1x384xf32, #tpu.memory_space<vmem>>, %arg6: memref<16x384xf32, #tpu.memory_space<vmem>>) attributes {dimension_semantics = [#tpu.dimension_semantics<parallel>], iteration_bounds = array<i64: 1>, scalar_prefetch = 0 : i64, scratch_operands = 0 : i64, tpu.core_type = #tpu.core_type<tc>, window_params = [{transform_indices = @transform_0, window_bounds = array<i64: 16, 384>}, {pipeline_mode = #tpu.pipeline_mode<synchronous>, transform_indices = @transform_1, window_bounds = array<i64: 384, 1536>}, {pipeline_mode = #tpu.pipeline_mode<synchronous>, transform_indices = @transform_2, window_bounds = array<i64: 1, 1536>}, {pipeline_mode = #tpu.pipeline_mode<synchronous>, transform_indices = @transform_3, window_bounds = array<i64: 1536, 384>}, {pipeline_mode = #tpu.pipeline_mode<synchronous>, transform_indices = @transform_4, window_bounds = array<i64: 1, 384>}, {transform_indices = @transform_5, window_bounds = array<i64: 16, 384>}]} {
    %c0 = arith.constant 0 : index
    %c0_0 = arith.constant 0 : index
    %0 = vector.load %arg1[%c0, %c0_0] : memref<16x384xf32, #tpu.memory_space<vmem>>, vector<16x384xf32>
    %c0_1 = arith.constant 0 : index
    %c0_2 = arith.constant 0 : index
    %1 = vector.load %arg2[%c0_1, %c0_2] : memref<384x1536xf32, #tpu.memory_space<vmem>>, vector<384x1536xf32>
    %cst = arith.constant dense<0.000000e+00> : vector<16x1536xf32>
    %2 = tpu.matmul %0, %1, %cst {dimension_numbers = #tpu.dot_dimension_numbers<[1], [0], [0], [1], [0, 0, 1, 1], [], []>} : vector<16x384xf32>, vector<384x1536xf32>, vector<16x1536xf32> -> vector<16x1536xf32>
    %c0_3 = arith.constant 0 : index
    %c0_4 = arith.constant 0 : index
    %3 = vector.load %arg3[%c0_3, %c0_4] : memref<1x1536xf32, #tpu.memory_space<vmem>>, vector<1x1536xf32>
    %4 = vector.broadcast %3 : vector<1x1536xf32> to vector<16x1536xf32>
    %5 = arith.addf %2, %4 : vector<16x1536xf32>
    %cst_5 = arith.constant 0.000000e+00 : f32
    %6 = vector.broadcast %cst_5 : f32 to vector<16x1536xf32>
    %7 = arith.maximumf %5, %6 : vector<16x1536xf32>
    %c0_6 = arith.constant 0 : index
    %c0_7 = arith.constant 0 : index
    %8 = vector.load %arg4[%c0_6, %c0_7] : memref<1536x384xf32, #tpu.memory_space<vmem>>, vector<1536x384xf32>
    %cst_8 = arith.constant dense<0.000000e+00> : vector<16x384xf32>
    %9 = tpu.matmul %7, %8, %cst_8 {dimension_numbers = #tpu.dot_dimension_numbers<[1], [0], [0], [1], [0, 0, 1, 1], [], []>} : vector<16x1536xf32>, vector<1536x384xf32>, vector<16x384xf32> -> vector<16x384xf32>
    %c0_9 = arith.constant 0 : index
    %c0_10 = arith.constant 0 : index
    %10 = vector.load %arg5[%c0_9, %c0_10] : memref<1x384xf32, #tpu.memory_space<vmem>>, vector<1x384xf32>
    %11 = vector.broadcast %10 : vector<1x384xf32> to vector<16x384xf32>
    %12 = arith.addf %9, %11 : vector<16x384xf32>
    %c0_11 = arith.constant 0 : index
    %c0_12 = arith.constant 0 : index
    %13 = vector.load %arg6[%c0_11, %c0_12] : memref<16x384xf32, #tpu.memory_space<vmem>>, vector<16x384xf32>
    tpu.vector_store %arg6[%c0_11, %c0_12], %12 {strides = array<i32>} : memref<16x384xf32, #tpu.memory_space<vmem>>, vector<16x384xf32>,
    return
  }
  func.func @transform_0(%arg0: i32) -> (i32, i32) {
    %c0_i32 = arith.constant 0 : i32
    %c0_i32_0 = arith.constant 0 : i32
    return %arg0, %c0_i32 : i32, i32
  }
  func.func @transform_1(%arg0: i32) -> (i32, i32) {
    %c0_i32 = arith.constant 0 : i32
    %c0_i32_0 = arith.constant 0 : i32
    %c0_i32_1 = arith.constant 0 : i32
    return %c0_i32, %c0_i32_0 : i32, i32
  }
  func.func @transform_2(%arg0: i32) -> (i32, i32) {
    %c0_i32 = arith.constant 0 : i32
    %c0_i32_0 = arith.constant 0 : i32
    %c0_i32_1 = arith.constant 0 : i32
    return %c0_i32, %c0_i32_0 : i32, i32
  }
  func.func @transform_3(%arg0: i32) -> (i32, i32) {
    %c0_i32 = arith.constant 0 : i32
    %c0_i32_0 = arith.constant 0 : i32
    %c0_i32_1 = arith.constant 0 : i32
    return %c0_i32, %c0_i32_0 : i32, i32
  }
  func.func @transform_4(%arg0: i32) -> (i32, i32) {
    %c0_i32 = arith.constant 0 : i32
    %c0_i32_0 = arith.constant 0 : i32
    %c0_i32_1 = arith.constant 0 : i32
    return %c0_i32, %c0_i32_0 : i32, i32
  }
  func.func @transform_5(%arg0: i32) -> (i32, i32) {
    %c0_i32 = arith.constant 0 : i32
    %c0_i32_0 = arith.constant 0 : i32
    return %arg0, %c0_i32 : i32, i32
  }
}

</mosaic_0001>

<bundles_post_ra>
// kernel: tpu_custom_call.1
= control target key start
LH: loop header
LB: loop body
LE: loop exit
PB: predicated region body
PF: predicated region fallthrough
CT: control target
= control target key end

     0   :  { %10 = vsyncpa [#allocation3], 0  ;;  %s5228_s0 = inlined_call_operand.hbm [shape: f32[16,384], index: 0, kind: input, shape index: {}]   ;;  %s5229_s1 = inlined_call_operand.hbm [shape: f32[384,1536], index: 1, kind: input, shape index: {}]   ;;  %s5230_s2 = inlined_call_operand.hbm [shape: f32[1,1536], index: 2, kind: input, shape index: {}]   ;;  %s5231_s3 = inlined_call_operand.hbm [shape: f32[1536,384], index: 3, kind: input, shape index: {}]   ;;  %s5232_s4 = inlined_call_operand.hbm [shape: f32[1,384], index: 4, kind: input, shape index: {}]   ;;  %s5233_s5 = inlined_call_operand.hbm [shape: f32[16,384], index: 5, kind: output, shape index: {}]  }
   0x1   :  { %11 = vsyncpa [#allocation6], 0 }
   0x2   :  { %12 = vsyncpa [#allocation9], 0 }
   0x3   :  { %13 = vsyncpa [#allocation4], 0  ;;  %s4820_s18 = smov [#allocation5]   ;;  %s4680_s22 = scalar_lea.hbm %s5229_s1, 73728 }
   0x4   :  { %s31_s19 = sshll.u32 %s4820_s18, 4  ;;  %p4681_p0 = scmp.ne.s32.totalorder %s5229_s1, %s4680_s22  ;;  %s32_s19 = int_to_ptr.vmem [resolvable:$true] %s31_s19 }
   0x5   :  { %p4684_p1 = scmp.lt.u32.totalorder %s4680_s22, %s5229_s1 }
   0x7   :  { %p4686_p2 = pnand %p4684_p1, %p4681_p0 }
   0x9   :  { %4689 = shalt.err (!%p4686_p2)
}
   0xa   :  { %s4690_s27 = scalar_lea.vmem %s32_s19, 73728  ;;  %p4695_p4 = scmp.lt.s32.totalorder %s32_s19, %s32_s19 }
   0xb   :  { %p4691_p3 = scmp.ne.s32.totalorder %s32_s19, %s4690_s27  ;;  %p4696_p5 = scmp.lt.s32.totalorder %s4690_s27, %s4690_s27 }
   0xd   :  { %p4697_p6 = por %p4696_p5, %p4695_p4 }
   0xf   :  { %p4698_p7 = pnand %p4697_p6, %p4691_p3 }
  0x11   :  { %4701 = shalt.err (!%p4698_p7)
}
  0x12   :  { %s4821_s28 = smov 1536   ;;  %s4822_s29 = smov 96  }
  0x13   :  { %37 = dma.hbm_to_vmem [thread:$0]  %s5229_s1, 73728, %s32_s19, [#allocation6], %s4821_s28, %s4821_s28, %s4822_s29  }
  0x14   :  { %s4823_s7 = smov [#allocation8]   ;;  %s4824_s9 = smov [#allocation2]  }
  0x15   :  { %s53_s8 = sshll.u32 %s4823_s7, 4  ;;  %s19_s10 = sshll.u32 %s4824_s9, 4  ;;  %s54_s8 = int_to_ptr.vmem [resolvable:$true] %s53_s8  ;;  %s20_s10 = int_to_ptr.vmem [resolvable:$true] %s19_s10 }
  0x16   :  { %s4702_s13 = scalar_lea.hbm %s5231_s3, 73728 }
  0x17   :  { %p4703_p8 = scmp.ne.s32.totalorder %s5231_s3, %s4702_s13  ;;  %p4706_p9 = scmp.lt.u32.totalorder %s4702_s13, %s5231_s3 }
  0x19   :  { %p4708_p10 = pnand %p4706_p9, %p4703_p8 }
  0x1b   :  { %4711 = shalt.err (!%p4708_p10)
}
  0x1c   :  { %s4712_s1 = scalar_lea.vmem %s54_s8, 73728  ;;  %p4717_p12 = scmp.lt.s32.totalorder %s54_s8, %s54_s8 }
  0x1d   :  { %p4713_p11 = scmp.ne.s32.totalorder %s54_s8, %s4712_s1  ;;  %p4718_p13 = scmp.lt.s32.totalorder %s4712_s1, %s4712_s1 }
  0x1f   :  { %p4719_p0 = por %p4718_p13, %p4717_p12 }
  0x21   :  { %p4720_p1 = pnand %p4719_p0, %p4713_p11 }
  0x23   :  { %4723 = shalt.err (!%p4720_p1)
}
  0x24   :  { %s4825_s18 = smov 384   ;;  %s4826_s19 = smov 24  }
  0x25   :  { %59 = dma.hbm_to_vmem [thread:$0]  %s5231_s3, 73728, %s54_s8, [#allocation9], %s4825_s18, %s4825_s18, %s4826_s19  }
  0x26   :  { %s4724_s24 = scalar_lea.hbm %s5228_s0, 768 }
  0x27   :  { %p4725_p2 = scmp.ne.s32.totalorder %s5228_s0, %s4724_s24  ;;  %p4728_p3 = scmp.lt.u32.totalorder %s4724_s24, %s5228_s0 }
  0x29   :  { %p4730_p4 = pnand %p4728_p3, %p4725_p2 }
  0x2b   :  { %4733 = shalt.err (!%p4730_p4)
}
  0x2c   :  { %s4734_s29 = scalar_lea.vmem %s20_s10, 768  ;;  %p4739_p6 = scmp.lt.s32.totalorder %s20_s10, %s20_s10 }
  0x2d   :  { %p4735_p5 = scmp.ne.s32.totalorder %s20_s10, %s4734_s29  ;;  %p4740_p7 = scmp.lt.s32.totalorder %s4734_s29, %s4734_s29 }
  0x2f   :  { %p4741_p8 = por %p4740_p7, %p4739_p6 }
  0x31   :  { %p4742_p9 = pnand %p4741_p8, %p4735_p5 }
  0x33   :  { %4745 = shalt.err (!%p4742_p9)
}
  0x34   :  { %25 = dma.hbm_to_vmem [thread:$0]  %s5228_s0, 768, %s20_s10, [#allocation3], %s4825_s18, %s4825_s18, %s4826_s19  }
  0x35   :  { %s4827_s6 = smov [#allocation7]   ;;  %s4828_s8 = smov [#allocation10]  }
  0x36   :  { %s44_s7 = sshll.u32 %s4827_s6, 4  ;;  %s66_s9 = sshll.u32 %s4828_s8, 4  ;;  %s45_s7 = int_to_ptr.vmem [resolvable:$true] %s44_s7  ;;  %s67_s9 = int_to_ptr.vmem [resolvable:$true] %s66_s9 }
  0x37   :  { %s4746_s13 = scalar_lea.hbm %s5230_s2, 192 }
  0x38   :  { %p4747_p10 = scmp.ne.s32.totalorder %s5230_s2, %s4746_s13  ;;  %p4750_p11 = scmp.lt.u32.totalorder %s4746_s13, %s5230_s2 }
  0x3a   :  { %p4752_p12 = pnand %p4750_p11, %p4747_p10 }
  0x3c   :  { %4755 = shalt.err (!%p4752_p12)
}
  0x3d   :  { %s4756_s0 = scalar_lea.vmem %s45_s7, 192  ;;  %p4761_p0 = scmp.lt.s32.totalorder %s45_s7, %s45_s7 }
  0x3e   :  { %p4757_p13 = scmp.ne.s32.totalorder %s45_s7, %s4756_s0  ;;  %p4762_p1 = scmp.lt.s32.totalorder %s4756_s0, %s4756_s0 }
  0x40   :  { %p4763_p2 = por %p4762_p1, %p4761_p0 }
  0x42   :  { %p4764_p3 = pnand %p4763_p2, %p4757_p13 }
  0x44   :  { %4767 = shalt.err (!%p4764_p3)
}
  0x45   :  { %47 = dma.hbm_to_vmem [thread:$0]  %s5230_s2, 192, %s45_s7, [#allocation6]  }
  0x46   :  { %s4768_s22 = scalar_lea.hbm %s5232_s4, 48 }
  0x47   :  { %p4769_p4 = scmp.ne.s32.totalorder %s5232_s4, %s4768_s22  ;;  %p4772_p5 = scmp.lt.u32.totalorder %s4768_s22, %s5232_s4 }
  0x49   :  { %p4774_p6 = pnand %p4772_p5, %p4769_p4 }
  0x4b   :  { %4777 = shalt.err (!%p4774_p6)
}
  0x4c   :  { %s4778_s27 = scalar_lea.vmem %s67_s9, 48  ;;  %s4782_s28 = scalar_lea.vmem %s67_s9, 64 }
  0x4d   :  { %p4779_p7 = scmp.ne.s32.totalorder %s67_s9, %s4778_s27  ;;  %p4783_p8 = scmp.lt.s32.totalorder %s67_s9, %s67_s9 }
  0x4e   :  { %p4784_p9 = scmp.lt.s32.totalorder %s4782_s28, %s4778_s27 }
  0x50   :  { %p4785_p10 = por %p4784_p9, %p4783_p8 }
  0x52   :  { %p4786_p11 = pnand %p4785_p10, %p4779_p7 }
  0x54   :  { %4789 = shalt.err (!%p4786_p11)
}
  0x55   :  { %69 = dma.hbm_to_vmem [thread:$0]  %s5232_s4, 48, %s67_s9, [#allocation9]  }
  0x56   :  { %4812 = dma.done.wait [#allocation3], 768  }
  0x57   :  { %4813 = vsyncadd [#allocation3], 4294966528 }
  0x58   :  { %4814 = dma.done.wait [#allocation6], 73920  }
  0x59   :  { %4815 = vsyncadd [#allocation6], 4294893376 }
  0x5a   :  { %4816 = dma.done.wait [#allocation9], 73776  }
  0x5b   :  { %4817 = vsyncadd [#allocation9], 4294893520  ;;  %v92_v0 = vld [vmem:[#allocation5 + $0x8] sm:$0xff]  ;;  %v91_v2 = vld [vmem:[#allocation5] sm:$0xff]  ;;  %s4830_s4 = smov [#allocation11]  }
  0x5c   :  { %v104_v1 = vld [vmem:[#allocation5 + $0x68] sm:$0xff]  ;;  %v103_v4 = vld [vmem:[#allocation5 + $0x60] sm:$0xff]  ;;  %v4927_v57 = vld [vmem:[#allocation2 + $0x8] sm:$0xff]  ;;  %s3195_s3 = sshll.u32 %s4830_s4, 4  ;;  %s3196_s3 = int_to_ptr.vmem [resolvable:$true] %s3195_s3 }
  0x5d   :  { %v3437_v3 = vpack.c.bf16 %v104_v1, %v92_v0  ;;  %v116_v5 = vld [vmem:[#allocation5 + $0xc8] sm:$0xff]  ;;  %v3439_v7 = vpack.c.bf16 %v103_v4, %v91_v2  ;;  %v115_v9 = vld [vmem:[#allocation5 + $0xc0] sm:$0xff]  ;;  %795 = vmatprep.mubr.f32.mxu1 %v4927_v57  ;;  %1103 = vmatprep.mubr.f32.mxu0 %v4927_v57  ;;  %s4790_s30 = scalar_lea.vmem %s3196_s3, 768  ;;  %p4795_p13 = scmp.lt.s32.totalorder %s3196_s3, %s3196_s3 }
  0x5e   :  { %v128_v6 = vld [vmem:[#allocation5 + $0x128] sm:$0xff]  ;;  %v127_v10 = vld [vmem:[#allocation5 + $0x120] sm:$0xff]  ;;  %p4791_p12 = scmp.ne.s32.totalorder %s3196_s3, %s4790_s30  ;;  %p4796_p0 = scmp.lt.s32.totalorder %s4790_s30, %s4790_s30 }
  0x5f   :  { %v3441_v8 = vpack.c.bf16 %v128_v6, %v116_v5  ;;  %v140_v11 = vld [vmem:[#allocation5 + $0x188] sm:$0xff]  ;;  %3438 = vmatprep.subr.bf16.mxu1 %v3437_v3  ;;  %v3443_v13 = vpack.c.bf16 %v127_v10, %v115_v9  ;;  %v139_v15 = vld [vmem:[#allocation5 + $0x180] sm:$0xff] }
  0x60   :  { %v152_v12 = vld [vmem:[#allocation5 + $0x1e8] sm:$0xff]  ;;  %3440 = vmatpush1.bf16.msra.mxu1 %v3439_v7  ;;  %v151_v16 = vld [vmem:[#allocation5 + $0x1e0] sm:$0xff]  ;;  %p4797_p1 = por %p4796_p0, %p4795_p13 }
  0x61   :  { %3442 = vmatprep.subr.bf16.mxu1 %v3441_v8  ;;  %v3445_v14 = vpack.c.bf16 %v152_v12, %v140_v11  ;;  %v164_v17 = vld [vmem:[#allocation5 + $0x248] sm:$0xff]  ;;  %v3447_v19 = vpack.c.bf16 %v151_v16, %v139_v15  ;;  %v163_v21 = vld [vmem:[#allocation5 + $0x240] sm:$0xff] }
  0x62   :  { %v176_v18 = vld [vmem:[#allocation5 + $0x2a8] sm:$0xff]  ;;  %v175_v22 = vld [vmem:[#allocation5 + $0x2a0] sm:$0xff]  ;;  %p4798_p2 = pnand %p4797_p1, %p4791_p12 }
  0x63   :  { %v3449_v20 = vpack.c.bf16 %v176_v18, %v164_v17  ;;  %v188_v23 = vld [vmem:[#allocation5 + $0x308] sm:$0xff]  ;;  %v3451_v25 = vpack.c.bf16 %v175_v22, %v163_v21  ;;  %v187_v27 = vld [vmem:[#allocation5 + $0x300] sm:$0xff] }
  0x64   :  { %3444 = vmatpush1.bf16.msra.mxu1 %v3443_v13  ;;  %v200_v24 = vld [vmem:[#allocation5 + $0x368] sm:$0xff]  ;;  %v199_v28 = vld [vmem:[#allocation5 + $0x360] sm:$0xff] }
  0x65   :  { %3446 = vmatprep.subr.bf16.mxu1 %v3445_v14  ;;  %v3453_v26 = vpack.c.bf16 %v200_v24, %v188_v23  ;;  %v212_v29 = vld [vmem:[#allocation5 + $0x3c8] sm:$0xff]  ;;  %v3455_v31 = vpack.c.bf16 %v199_v28, %v187_v27  ;;  %v211_v33 = vld [vmem:[#allocation5 + $0x3c0] sm:$0xff] }
  0x66   :  { %v224_v30 = vld [vmem:[#allocation5 + $0x428] sm:$0xff]  ;;  %v223_v34 = vld [vmem:[#allocation5 + $0x420] sm:$0xff] }
  0x67   :  { %v3457_v32 = vpack.c.bf16 %v224_v30, %v212_v29  ;;  %v236_v35 = vld [vmem:[#allocation5 + $0x488] sm:$0xff]  ;;  %v3459_v37 = vpack.c.bf16 %v223_v34, %v211_v33  ;;  %v95_v40 = vld [vmem:[#allocation5 + $0x20] sm:$0xff] }
  0x68   :  { %3448 = vmatpush1.bf16.msra.mxu1 %v3447_v19  ;;  %v248_v36 = vld [vmem:[#allocation5 + $0x4e8] sm:$0xff]  ;;  %v235_v42 = vld [vmem:[#allocation5 + $0x480] sm:$0xff] }
  0x69   :  { %3450 = vmatprep.subr.bf16.mxu1 %v3449_v20  ;;  %v96_v38 = vld [vmem:[#allocation5 + $0x28] sm:$0xff]  ;;  %v3461_v41 = vpack.c.bf16 %v248_v36, %v236_v35  ;;  %v247_v43 = vld [vmem:[#allocation5 + $0x4e0] sm:$0xff] }
  0x6a   :  { %v108_v39 = vld [vmem:[#allocation5 + $0x88] sm:$0xff]  ;;  %v107_v45 = vld [vmem:[#allocation5 + $0x80] sm:$0xff]  ;;  %v3463_v53 = vpack.c.bf16 %v247_v43, %v235_v42 }
  0x6b   :  { %v3629_v44 = vpack.c.bf16 %v108_v39, %v96_v38  ;;  %v260_v46 = vld [vmem:[#allocation5 + $0x548] sm:$0xff]  ;;  %v3631_v48 = vpack.c.bf16 %v107_v45, %v95_v40  ;;  %v119_v51 = vld [vmem:[#allocation5 + $0xe0] sm:$0xff] }
  0x6c   :  { %3452 = vmatpush1.bf16.msra.mxu1 %v3451_v25  ;;  %v272_v47 = vld [vmem:[#allocation5 + $0x5a8] sm:$0xff]  ;;  %v131_v52 = vld [vmem:[#allocation5 + $0x140] sm:$0xff] }
  0x6d   :  { %3454 = vmatprep.subr.bf16.mxu1 %v3453_v26  ;;  %v120_v49 = vld [vmem:[#allocation5 + $0xe8] sm:$0xff]  ;;  %3630 = vmatprep.subr.bf16.mxu0 %v3629_v44  ;;  %v259_v54 = vld [vmem:[#allocation5 + $0x540] sm:$0xff]  ;;  %v3635_v56 = vpack.c.bf16 %v131_v52, %v119_v51  ;;  %v3465_v58 = vpack.c.bf16 %v272_v47, %v260_v46 }
  0x6e   :  { %v132_v50 = vld [vmem:[#allocation5 + $0x148] sm:$0xff]  ;;  %3632 = vmatpush1.bf16.msra.mxu0 %v3631_v48  ;;  %v271_v59 = vld [vmem:[#allocation5 + $0x5a0] sm:$0xff] }
  0x6f   :  { %v3633_v55 = vpack.c.bf16 %v132_v50, %v120_v49  ;;  %v284_v60 = vld [vmem:[#allocation5 + $0x608] sm:$0xff]  ;;  %v143_v0 = vld [vmem:[#allocation5 + $0x1a0] sm:$0xff]  ;;  %v3467_v3 = vpack.c.bf16 %v271_v59, %v259_v54 }
  0x70   :  { %3456 = vmatpush1.bf16.msra.mxu1 %v3455_v31  ;;  %v296_v61 = vld [vmem:[#allocation5 + $0x668] sm:$0xff]  ;;  %v155_v2 = vld [vmem:[#allocation5 + $0x200] sm:$0xff] }
  0x71   :  { %3458 = vmatprep.subr.bf16.mxu1 %v3457_v32  ;;  %3634 = vmatprep.subr.bf16.mxu0 %v3633_v55  ;;  %v144_v62 = vld [vmem:[#allocation5 + $0x1a8] sm:$0xff]  ;;  %v283_v4 = vld [vmem:[#allocation5 + $0x600] sm:$0xff]  ;;  %v3639_v6 = vpack.c.bf16 %v155_v2, %v143_v0  ;;  %v3469_v8 = vpack.c.bf16 %v296_v61, %v284_v60 }
  0x72   :  { %v156_v63 = vld [vmem:[#allocation5 + $0x208] sm:$0xff]  ;;  %v295_v5 = vld [vmem:[#allocation5 + $0x660] sm:$0xff]  ;;  %3636 = vmatpush1.bf16.msra.mxu0 %v3635_v56 }
  0x73   :  { %v3637_v1 = vpack.c.bf16 %v156_v63, %v144_v62  ;;  %v168_v7 = vld [vmem:[#allocation5 + $0x268] sm:$0xff]  ;;  %v167_v10 = vld [vmem:[#allocation5 + $0x260] sm:$0xff]  ;;  %v3471_v17 = vpack.c.bf16 %v295_v5, %v283_v4 }
  0x74   :  { %3460 = vmatpush1.bf16.msra.mxu1 %v3459_v37  ;;  %v180_v9 = vld [vmem:[#allocation5 + $0x2c8] sm:$0xff]  ;;  %v179_v11 = vld [vmem:[#allocation5 + $0x2c0] sm:$0xff] }
  0x75   :  { %3462 = vmatprep.subr.bf16.mxu1 %v3461_v41  ;;  %3638 = vmatprep.subr.bf16.mxu0 %v3637_v1  ;;  %v308_v12 = vld [vmem:[#allocation5 + $0x6c8] sm:$0xff]  ;;  %v3641_v14 = vpack.c.bf16 %v180_v9, %v168_v7  ;;  %v307_v18 = vld [vmem:[#allocation5 + $0x6c0] sm:$0xff]  ;;  %v3643_v20 = vpack.c.bf16 %v179_v11, %v167_v10 }
  0x76   :  { %v320_v13 = vld [vmem:[#allocation5 + $0x728] sm:$0xff]  ;;  %v319_v19 = vld [vmem:[#allocation5 + $0x720] sm:$0xff]  ;;  %3640 = vmatpush1.bf16.msra.mxu0 %v3639_v6 }
  0x77   :  { %v192_v15 = vld [vmem:[#allocation5 + $0x328] sm:$0xff]  ;;  %v3473_v21 = vpack.c.bf16 %v320_v13, %v308_v12  ;;  %3642 = vmatprep.subr.bf16.mxu0 %v3641_v14  ;;  %v191_v24 = vld [vmem:[#allocation5 + $0x320] sm:$0xff]  ;;  %v3475_v29 = vpack.c.bf16 %v319_v19, %v307_v18 }
  0x78   :  { %3464 = vmatpush1.bf16.msra.mxu1 %v3463_v53  ;;  %v204_v16 = vld [vmem:[#allocation5 + $0x388] sm:$0xff]  ;;  %v203_v25 = vld [vmem:[#allocation5 + $0x380] sm:$0xff] }
  0x79   :  { %3466 = vmatprep.subr.bf16.mxu1 %v3465_v58  ;;  %v332_v22 = vld [vmem:[#allocation5 + $0x788] sm:$0xff]  ;;  %v3645_v23 = vpack.c.bf16 %v204_v16, %v192_v15  ;;  %v331_v30 = vld [vmem:[#allocation5 + $0x780] sm:$0xff]  ;;  %v3647_v32 = vpack.c.bf16 %v203_v25, %v191_v24 }
  0x7a   :  { %v344_v26 = vld [vmem:[#allocation5 + $0x7e8] sm:$0xff]  ;;  %v343_v31 = vld [vmem:[#allocation5 + $0x7e0] sm:$0xff]  ;;  %3644 = vmatpush1.bf16.msra.mxu0 %v3643_v20 }
  0x7b   :  { %v216_v27 = vld [vmem:[#allocation5 + $0x3e8] sm:$0xff]  ;;  %v3477_v33 = vpack.c.bf16 %v344_v26, %v332_v22  ;;  %3646 = vmatprep.subr.bf16.mxu0 %v3645_v23  ;;  %v215_v36 = vld [vmem:[#allocation5 + $0x3e0] sm:$0xff]  ;;  %v3479_v41 = vpack.c.bf16 %v343_v31, %v331_v30 }
  0x7c   :  { %3468 = vmatpush1.bf16.msra.mxu1 %v3467_v3  ;;  %v228_v28 = vld [vmem:[#allocation5 + $0x448] sm:$0xff]  ;;  %v227_v37 = vld [vmem:[#allocation5 + $0x440] sm:$0xff] }
  0x7d   :  { %3470 = vmatprep.subr.bf16.mxu1 %v3469_v8  ;;  %v356_v34 = vld [vmem:[#allocation5 + $0x848] sm:$0xff]  ;;  %v3649_v35 = vpack.c.bf16 %v228_v28, %v216_v27  ;;  %v355_v42 = vld [vmem:[#allocation5 + $0x840] sm:$0xff]  ;;  %v3651_v44 = vpack.c.bf16 %v227_v37, %v215_v36 }
  0x7e   :  { %v368_v38 = vld [vmem:[#allocation5 + $0x8a8] sm:$0xff]  ;;  %v367_v43 = vld [vmem:[#allocation5 + $0x8a0] sm:$0xff]  ;;  %3648 = vmatpush1.bf16.msra.mxu0 %v3647_v32 }
  0x7f   :  { %v240_v39 = vld [vmem:[#allocation5 + $0x4a8] sm:$0xff]  ;;  %v3481_v45 = vpack.c.bf16 %v368_v38, %v356_v34  ;;  %3650 = vmatprep.subr.bf16.mxu0 %v3649_v35  ;;  %v239_v48 = vld [vmem:[#allocation5 + $0x4a0] sm:$0xff]  ;;  %v3483_v53 = vpack.c.bf16 %v367_v43, %v355_v42 }
  0x80   :  { %3472 = vmatpush1.bf16.msra.mxu1 %v3471_v17  ;;  %v252_v40 = vld [vmem:[#allocation5 + $0x508] sm:$0xff]  ;;  %v251_v49 = vld [vmem:[#allocation5 + $0x500] sm:$0xff] }
  0x81   :  { %3474 = vmatprep.subr.bf16.mxu1 %v3473_v21  ;;  %v380_v46 = vld [vmem:[#allocation5 + $0x908] sm:$0xff]  ;;  %v3653_v47 = vpack.c.bf16 %v252_v40, %v240_v39  ;;  %v379_v54 = vld [vmem:[#allocation5 + $0x900] sm:$0xff]  ;;  %v3655_v56 = vpack.c.bf16 %v251_v49, %v239_v48 }
  0x82   :  { %v392_v50 = vld [vmem:[#allocation5 + $0x968] sm:$0xff]  ;;  %v391_v55 = vld [vmem:[#allocation5 + $0x960] sm:$0xff]  ;;  %3652 = vmatpush1.bf16.msra.mxu0 %v3651_v44 }
  0x83   :  { %v264_v51 = vld [vmem:[#allocation5 + $0x568] sm:$0xff]  ;;  %v3485_v58 = vpack.c.bf16 %v392_v50, %v380_v46  ;;  %3654 = vmatprep.subr.bf16.mxu0 %v3653_v47  ;;  %v263_v61 = vld [vmem:[#allocation5 + $0x560] sm:$0xff]  ;;  %v3487_v2 = vpack.c.bf16 %v391_v55, %v379_v54  ;;  %v4931_v50 = vld [vmem:[#allocation2] sm:$0xff] }
  0x84   :  { %3476 = vmatpush1.bf16.msra.mxu1 %v3475_v29  ;;  %v276_v52 = vld [vmem:[#allocation5 + $0x5c8] sm:$0xff]  ;;  %v275_v62 = vld [vmem:[#allocation5 + $0x5c0] sm:$0xff] }
  0x85   :  { %3478 = vmatprep.subr.bf16.mxu1 %v3477_v33  ;;  %v404_v59 = vld [vmem:[#allocation5 + $0x9c8] sm:$0xff]  ;;  %v3657_v60 = vpack.c.bf16 %v276_v52, %v264_v51  ;;  %v403_v3 = vld [vmem:[#allocation5 + $0x9c0] sm:$0xff]  ;;  %v3659_v5 = vpack.c.bf16 %v275_v62, %v263_v61 }
  0x86   :  { %v416_v63 = vld [vmem:[#allocation5 + $0xa28] sm:$0xff]  ;;  %v415_v4 = vld [vmem:[#allocation5 + $0xa20] sm:$0xff]  ;;  %3656 = vmatpush1.bf16.msra.mxu0 %v3655_v56  ;;  %v4933_v56 = vld [vmem:[#allocation2 + $0x20] sm:$0xff] }
  0x87   :  { %v288_v0 = vld [vmem:[#allocation5 + $0x628] sm:$0xff]  ;;  %v3489_v6 = vpack.c.bf16 %v416_v63, %v404_v59  ;;  %3658 = vmatprep.subr.bf16.mxu0 %v3657_v60  ;;  %v287_v9 = vld [vmem:[#allocation5 + $0x620] sm:$0xff]  ;;  %v3491_v14 = vpack.c.bf16 %v415_v4, %v403_v3 }
  0x88   :  { %3480 = vmatpush1.bf16.msra.mxu1 %v3479_v41  ;;  %v300_v1 = vld [vmem:[#allocation5 + $0x688] sm:$0xff]  ;;  %v299_v10 = vld [vmem:[#allocation5 + $0x680] sm:$0xff] }
  0x89   :  { %3482 = vmatprep.subr.bf16.mxu1 %v3481_v45  ;;  %v428_v7 = vld [vmem:[#allocation5 + $0xa88] sm:$0xff]  ;;  %v3661_v8 = vpack.c.bf16 %v300_v1, %v288_v0  ;;  %v427_v15 = vld [vmem:[#allocation5 + $0xa80] sm:$0xff]  ;;  %v3663_v17 = vpack.c.bf16 %v299_v10, %v287_v9 }
  0x8a   :  { %v440_v11 = vld [vmem:[#allocation5 + $0xae8] sm:$0xff]  ;;  %v439_v16 = vld [vmem:[#allocation5 + $0xae0] sm:$0xff]  ;;  %3660 = vmatpush1.bf16.msra.mxu0 %v3659_v5 }
  0x8b   :  { %v312_v12 = vld [vmem:[#allocation5 + $0x6e8] sm:$0xff]  ;;  %v3493_v18 = vpack.c.bf16 %v440_v11, %v428_v7  ;;  %3662 = vmatprep.subr.bf16.mxu0 %v3661_v8  ;;  %v311_v21 = vld [vmem:[#allocation5 + $0x6e0] sm:$0xff]  ;;  %v3495_v26 = vpack.c.bf16 %v439_v16, %v427_v15  ;;  %v4829_v15 = vmov 0.0  }
  0x8c   :  { %3484 = vmatpush1.bf16.msra.mxu1 %v3483_v53  ;;  %v324_v13 = vld [vmem:[#allocation5 + $0x748] sm:$0xff]  ;;  %v323_v22 = vld [vmem:[#allocation5 + $0x740] sm:$0xff] }
  0x8d   :  { %3486 = vmatprep.subr.bf16.mxu1 %v3485_v58  ;;  %v452_v19 = vld [vmem:[#allocation5 + $0xb48] sm:$0xff]  ;;  %v3665_v20 = vpack.c.bf16 %v324_v13, %v312_v12  ;;  %v451_v27 = vld [vmem:[#allocation5 + $0xb40] sm:$0xff]  ;;  %v3667_v29 = vpack.c.bf16 %v323_v22, %v311_v21 }
  0x8e   :  { %v464_v23 = vld [vmem:[#allocation5 + $0xba8] sm:$0xff]  ;;  %v463_v28 = vld [vmem:[#allocation5 + $0xba0] sm:$0xff]  ;;  %3664 = vmatpush1.bf16.msra.mxu0 %v3663_v17 }
  0x8f   :  { %v336_v24 = vld [vmem:[#allocation5 + $0x7a8] sm:$0xff]  ;;  %v3497_v30 = vpack.c.bf16 %v464_v23, %v452_v19  ;;  %3666 = vmatprep.subr.bf16.mxu0 %v3665_v20  ;;  %v335_v33 = vld [vmem:[#allocation5 + $0x7a0] sm:$0xff]  ;;  %v3499_v38 = vpack.c.bf16 %v463_v28, %v451_v27 }
  0x90   :  { %3488 = vmatpush1.bf16.msra.mxu1 %v3487_v2  ;;  %v348_v25 = vld [vmem:[#allocation5 + $0x808] sm:$0xff]  ;;  %v347_v34 = vld [vmem:[#allocation5 + $0x800] sm:$0xff] }
  0x91   :  { %3490 = vmatprep.subr.bf16.mxu1 %v3489_v6  ;;  %v476_v31 = vld [vmem:[#allocation5 + $0xc08] sm:$0xff]  ;;  %v3669_v32 = vpack.c.bf16 %v348_v25, %v336_v24  ;;  %v3671_v39 = vpack.c.bf16 %v347_v34, %v335_v33  ;;  %v475_v41 = vld [vmem:[#allocation5 + $0xc00] sm:$0xff] }
  0x92   :  { %v488_v35 = vld [vmem:[#allocation5 + $0xc68] sm:$0xff]  ;;  %3668 = vmatpush1.bf16.msra.mxu0 %v3667_v29  ;;  %v487_v42 = vld [vmem:[#allocation5 + $0xc60] sm:$0xff] }
  0x93   :  { %v360_v36 = vld [vmem:[#allocation5 + $0x868] sm:$0xff]  ;;  %v3501_v40 = vpack.c.bf16 %v488_v35, %v476_v31  ;;  %3670 = vmatprep.subr.bf16.mxu0 %v3669_v32  ;;  %v359_v46 = vld [vmem:[#allocation5 + $0x860] sm:$0xff]  ;;  %v3503_v51 = vpack.c.bf16 %v487_v42, %v475_v41 }
  0x94   :  { %3492 = vmatpush1.bf16.msra.mxu1 %v3491_v14  ;;  %v372_v37 = vld [vmem:[#allocation5 + $0x8c8] sm:$0xff]  ;;  %v371_v47 = vld [vmem:[#allocation5 + $0x8c0] sm:$0xff] }
  0x95   :  { %3494 = vmatprep.subr.bf16.mxu1 %v3493_v18  ;;  %v500_v43 = vld [vmem:[#allocation5 + $0xcc8] sm:$0xff]  ;;  %v3673_v44 = vpack.c.bf16 %v372_v37, %v360_v36  ;;  %v499_v52 = vld [vmem:[#allocation5 + $0xcc0] sm:$0xff]  ;;  %v3675_v58 = vpack.c.bf16 %v371_v47, %v359_v46 }
  0x96   :  { %v512_v45 = vld [vmem:[#allocation5 + $0xd28] sm:$0xff]  ;;  %3672 = vmatpush1.bf16.msra.mxu0 %v3671_v39  ;;  %v511_v54 = vld [vmem:[#allocation5 + $0xd20] sm:$0xff] }
  0x97   :  { %v384_v48 = vld [vmem:[#allocation5 + $0x928] sm:$0xff]  ;;  %v3505_v53 = vpack.c.bf16 %v512_v45, %v500_v43  ;;  %3674 = vmatprep.subr.bf16.mxu0 %v3673_v44  ;;  %v383_v61 = vld [vmem:[#allocation5 + $0x920] sm:$0xff]  ;;  %v3507_v1 = vpack.c.bf16 %v511_v54, %v499_v52 }
  0x98   :  { %3496 = vmatpush1.bf16.msra.mxu1 %v3495_v26  ;;  %v396_v49 = vld [vmem:[#allocation5 + $0x988] sm:$0xff]  ;;  %v395_v62 = vld [vmem:[#allocation5 + $0x980] sm:$0xff] }
  0x99   :  { %3498 = vmatprep.subr.bf16.mxu1 %v3497_v30  ;;  %v524_v55 = vld [vmem:[#allocation5 + $0xd88] sm:$0xff]  ;;  %v3677_v60 = vpack.c.bf16 %v396_v49, %v384_v48  ;;  %v523_v4 = vld [vmem:[#allocation5 + $0xd80] sm:$0xff]  ;;  %v3679_v7 = vpack.c.bf16 %v395_v62, %v383_v61 }
  0x9a   :  { %v536_v59 = vld [vmem:[#allocation5 + $0xde8] sm:$0xff]  ;;  %v535_v5 = vld [vmem:[#allocation5 + $0xde0] sm:$0xff]  ;;  %3676 = vmatpush1.bf16.msra.mxu0 %v3675_v58 }
  0x9b   :  { %v408_v63 = vld [vmem:[#allocation5 + $0x9e8] sm:$0xff]  ;;  %v3509_v3 = vpack.c.bf16 %v536_v59, %v524_v55  ;;  %3678 = vmatprep.subr.bf16.mxu0 %v3677_v60  ;;  %v407_v10 = vld [vmem:[#allocation5 + $0x9e0] sm:$0xff]  ;;  %v3511_v14 = vpack.c.bf16 %v535_v5, %v523_v4 }
  0x9c   :  { %3500 = vmatpush1.bf16.msra.mxu1 %v3499_v38  ;;  %v420_v0 = vld [vmem:[#allocation5 + $0xa48] sm:$0xff]  ;;  %v419_v11 = vld [vmem:[#allocation5 + $0xa40] sm:$0xff] }
  0x9d   :  { %3502 = vmatprep.subr.bf16.mxu1 %v3501_v40  ;;  %v4937_v2 = vld [vmem:[#allocation2 + $0x18] sm:$0xff]  ;;  %v3681_v9 = vpack.c.bf16 %v420_v0, %v408_v63  ;;  %v547_v17 = vld [vmem:[#allocation5 + $0xe40] sm:$0xff]  ;;  %v3683_v20 = vpack.c.bf16 %v419_v11, %v407_v10 }
  0x9e   :  { %v548_v6 = vld [vmem:[#allocation5 + $0xe48] sm:$0xff]  ;;  %v559_v18 = vld [vmem:[#allocation5 + $0xea0] sm:$0xff]  ;;  %3680 = vmatpush1.bf16.msra.mxu0 %v3679_v7  ;;  %v94_v7 = vld [vmem:[#allocation5 + $0x18] sm:$0xff] }
  0x9f   :  { %796 = vmatmul.mubr.f32.vlgmr.msra.gmra.mrb[0].mxu1 %v4931_v50  ;;  %v560_v8 = vld [vmem:[#allocation5 + $0xea8] sm:$0xff]  ;;  %3682 = vmatprep.subr.bf16.mxu0 %v3681_v9  ;;  %v431_v23 = vld [vmem:[#allocation5 + $0xaa0] sm:$0xff]  ;;  %v3515_v27 = vpack.c.bf16 %v559_v18, %v547_v17  ;;  %v106_v9 = vld [vmem:[#allocation5 + $0x78] sm:$0xff] }
  0xa0   :  { %3504 = vmatpush1.bf16.msra.mxu1 %v3503_v51  ;;  %801 = vmatprep.mubr.f32.mxu1 %v4933_v56  ;;  %v432_v12 = vld [vmem:[#allocation5 + $0xaa8] sm:$0xff]  ;;  %v3513_v16 = vpack.c.bf16 %v560_v8, %v548_v6  ;;  %v443_v24 = vld [vmem:[#allocation5 + $0xb00] sm:$0xff]  ;;  %v3533_v17 = vpack.c.bf16 %v106_v9, %v94_v7  ;;  %v93_v18 = vld [vmem:[#allocation5 + $0x10] sm:$0xff] }
  0xa1   :  { %3506 = vmatprep.subr.bf16.mxu1 %v3505_v53  ;;  %v444_v13 = vld [vmem:[#allocation5 + $0xb08] sm:$0xff]  ;;  %v571_v29 = vld [vmem:[#allocation5 + $0xf00] sm:$0xff]  ;;  %v3687_v32 = vpack.c.bf16 %v443_v24, %v431_v23  ;;  %v201_v9 = vld [vmem:[#allocation5 + $0x370] sm:$0xff] }
  0xa2   :  { %v572_v19 = vld [vmem:[#allocation5 + $0xf08] sm:$0xff]  ;;  %v3685_v22 = vpack.c.bf16 %v444_v13, %v432_v12  ;;  %v583_v30 = vld [vmem:[#allocation5 + $0xf60] sm:$0xff]  ;;  %3684 = vmatpush1.bf16.msra.mxu0 %v3683_v20  ;;  %v118_v20 = vld [vmem:[#allocation5 + $0xd8] sm:$0xff] }
  0xa3   :  { %802 = vmatmul.mubr.f32.gmra.mrb[2].mxu1 %v4937_v2  ;;  %v584_v21 = vld [vmem:[#allocation5 + $0xf68] sm:$0xff]  ;;  %v455_v35 = vld [vmem:[#allocation5 + $0xb60] sm:$0xff]  ;;  %v3519_v39 = vpack.c.bf16 %v583_v30, %v571_v29 }
  0xa4   :  { %3508 = vmatpush1.bf16.msra.mxu1 %v3507_v1  ;;  %872 = vmatprep.mubr.f32.mxu1 %v4829_v15  ;;  %v456_v25 = vld [vmem:[#allocation5 + $0xb68] sm:$0xff]  ;;  %v3517_v28 = vpack.c.bf16 %v584_v21, %v572_v19  ;;  %v467_v36 = vld [vmem:[#allocation5 + $0xbc0] sm:$0xff]  ;;  %v105_v19 = vld [vmem:[#allocation5 + $0x70] sm:$0xff] }
  0xa5   :  { %3510 = vmatprep.subr.bf16.mxu1 %v3509_v3  ;;  %v468_v26 = vld [vmem:[#allocation5 + $0xbc8] sm:$0xff]  ;;  %3686 = vmatprep.subr.bf16.mxu0 %v3685_v22  ;;  %v595_v41 = vld [vmem:[#allocation5 + $0xfc0] sm:$0xff]  ;;  %v3691_v44 = vpack.c.bf16 %v467_v36, %v455_v35  ;;  %v130_v22 = vld [vmem:[#allocation5 + $0x138] sm:$0xff]  ;;  %v3535_v29 = vpack.c.bf16 %v105_v19, %v93_v18 }
  0xa6   :  { %v596_v31 = vld [vmem:[#allocation5 + $0xfc8] sm:$0xff]  ;;  %v3689_v34 = vpack.c.bf16 %v468_v26, %v456_v25  ;;  %v607_v42 = vld [vmem:[#allocation5 + $0x1020] sm:$0xff]  ;;  %3688 = vmatpush1.bf16.msra.mxu0 %v3687_v32  ;;  %v3537_v30 = vpack.c.bf16 %v130_v22, %v118_v20  ;;  %v129_v32 = vld [vmem:[#allocation5 + $0x130] sm:$0xff] }
  0xa7   :  { %v608_v33 = vld [vmem:[#allocation5 + $0x1028] sm:$0xff]  ;;  %v479_v47 = vld [vmem:[#allocation5 + $0xc20] sm:$0xff]  ;;  %v3523_v52 = vpack.c.bf16 %v607_v42, %v595_v41  ;;  %v154_v35 = vld [vmem:[#allocation5 + $0x1f8] sm:$0xff] }
  0xa8   :  { %3512 = vmatpush1.bf16.msra.mxu1 %v3511_v14  ;;  %v480_v37 = vld [vmem:[#allocation5 + $0xc28] sm:$0xff]  ;;  %v3521_v40 = vpack.c.bf16 %v608_v33, %v596_v31  ;;  %3690 = vmatprep.subr.bf16.mxu0 %v3689_v34  ;;  %v491_v48 = vld [vmem:[#allocation5 + $0xc80] sm:$0xff]  ;;  %v117_v31 = vld [vmem:[#allocation5 + $0xd0] sm:$0xff] }
  0xa9   :  { %3514 = vmatprep.subr.bf16.mxu1 %v3513_v16  ;;  %v492_v38 = vld [vmem:[#allocation5 + $0xc88] sm:$0xff]  ;;  %v619_v54 = vld [vmem:[#allocation5 + $0x1080] sm:$0xff]  ;;  %v3695_v59 = vpack.c.bf16 %v491_v48, %v479_v47  ;;  %v142_v33 = vld [vmem:[#allocation5 + $0x198] sm:$0xff]  ;;  %v3539_v42 = vpack.c.bf16 %v129_v32, %v117_v31 }
  0xaa   :  { %v620_v43 = vld [vmem:[#allocation5 + $0x1088] sm:$0xff]  ;;  %v3693_v46 = vpack.c.bf16 %v492_v38, %v480_v37  ;;  %v631_v55 = vld [vmem:[#allocation5 + $0x10e0] sm:$0xff]  ;;  %3692 = vmatpush1.bf16.msra.mxu0 %v3691_v44  ;;  %v4949_v41 = vld [vmem:[#allocation2 + $0x28] sm:$0xff] }
  0xab   :  { %v632_v45 = vld [vmem:[#allocation5 + $0x10e8] sm:$0xff]  ;;  %v503_v62 = vld [vmem:[#allocation5 + $0xce0] sm:$0xff]  ;;  %v3527_v3 = vpack.c.bf16 %v631_v55, %v619_v54  ;;  %v141_v44 = vld [vmem:[#allocation5 + $0x190] sm:$0xff] }
  0xac   :  { %3516 = vmatpush1.bf16.msra.mxu1 %v3515_v27  ;;  %v504_v49 = vld [vmem:[#allocation5 + $0xce8] sm:$0xff]  ;;  %v3525_v53 = vpack.c.bf16 %v632_v45, %v620_v43  ;;  %3694 = vmatprep.subr.bf16.mxu0 %v3693_v46  ;;  %v515_v63 = vld [vmem:[#allocation5 + $0xd40] sm:$0xff]  ;;  %v3541_v43 = vpack.c.bf16 %v154_v35, %v142_v33  ;;  %v153_v45 = vld [vmem:[#allocation5 + $0x1f0] sm:$0xff] }
  0xad   :  { %3518 = vmatprep.subr.bf16.mxu1 %v3517_v28  ;;  %v516_v51 = vld [vmem:[#allocation5 + $0xd48] sm:$0xff]  ;;  %1104 = vmatmul.mubr.f32.vlgmr.msra.gmra.mrb[0].mxu0 %v4931_v50  ;;  %v643_v5 = vld [vmem:[#allocation5 + $0x1140] sm:$0xff]  ;;  %v3699_v8 = vpack.c.bf16 %v515_v63, %v503_v62  ;;  %v166_v46 = vld [vmem:[#allocation5 + $0x258] sm:$0xff]  ;;  %v3543_v55 = vpack.c.bf16 %v153_v45, %v141_v44 }
  0xae   :  { %v644_v58 = vld [vmem:[#allocation5 + $0x1148] sm:$0xff]  ;;  %v3697_v61 = vpack.c.bf16 %v516_v51, %v504_v49  ;;  %v655_v6 = vld [vmem:[#allocation5 + $0x11a0] sm:$0xff]  ;;  %3696 = vmatpush1.bf16.msra.mxu0 %v3695_v59  ;;  %1109 = vmatprep.mubr.f32.mxu0 %v4933_v56  ;;  %v178_v48 = vld [vmem:[#allocation5 + $0x2b8] sm:$0xff] }
  0xaf   :  { %v656_v60 = vld [vmem:[#allocation5 + $0x11a8] sm:$0xff]  ;;  %v527_v11 = vld [vmem:[#allocation5 + $0xda0] sm:$0xff]  ;;  %v3531_v16 = vpack.c.bf16 %v655_v6, %v643_v5  ;;  %v165_v59 = vld [vmem:[#allocation5 + $0x250] sm:$0xff] }
  0xb0   :  { %3520 = vmatpush1.bf16.msra.mxu1 %v3519_v39  ;;  %v528_v0 = vld [vmem:[#allocation5 + $0xda8] sm:$0xff]  ;;  %v3529_v4 = vpack.c.bf16 %v656_v60, %v644_v58  ;;  %3698 = vmatprep.subr.bf16.mxu0 %v3697_v61  ;;  %v539_v12 = vld [vmem:[#allocation5 + $0xe00] sm:$0xff]  ;;  %v3545_v58 = vpack.c.bf16 %v178_v48, %v166_v46  ;;  %v177_v60 = vld [vmem:[#allocation5 + $0x2b0] sm:$0xff] }
  0xb1   :  { %3522 = vmatprep.subr.bf16.mxu1 %v3521_v40  ;;  %v540_v1 = vld [vmem:[#allocation5 + $0xe08] sm:$0xff]  ;;  %1110 = vmatmul.mubr.f32.gmra.mrb[2].mxu0 %v4937_v2  ;;  %v3703_v21 = vpack.c.bf16 %v539_v12, %v527_v11  ;;  %v551_v24 = vld [vmem:[#allocation5 + $0xe60] sm:$0xff]  ;;  %v190_v61 = vld [vmem:[#allocation5 + $0x318] sm:$0xff]  ;;  %v3547_v6 = vpack.c.bf16 %v177_v60, %v165_v59 }
  0xb2   :  { %v3701_v10 = vpack.c.bf16 %v540_v1, %v528_v0  ;;  %v552_v13 = vld [vmem:[#allocation5 + $0xe68] sm:$0xff]  ;;  %3700 = vmatpush1.bf16.msra.mxu0 %v3699_v8  ;;  %v563_v25 = vld [vmem:[#allocation5 + $0xec0] sm:$0xff]  ;;  %1180 = vmatprep.mubr.f32.mxu0 %v4829_v15  ;;  %v202_v63 = vld [vmem:[#allocation5 + $0x378] sm:$0xff] }
  0xb3   :  { %v564_v14 = vld [vmem:[#allocation5 + $0xec8] sm:$0xff]  ;;  %v4945_v28 = vld [vmem:[#allocation2 + $0x10] sm:$0xff]  ;;  %v3707_v34 = vpack.c.bf16 %v563_v25, %v551_v24  ;;  %v3549_v7 = vpack.c.bf16 %v202_v63, %v190_v61  ;;  %v189_v8 = vld [vmem:[#allocation5 + $0x310] sm:$0xff] }
  0xb4   :  { %3524 = vmatpush1.bf16.msra.mxu1 %v3523_v52  ;;  %3702 = vmatprep.subr.bf16.mxu0 %v3701_v10  ;;  %v3705_v23 = vpack.c.bf16 %v564_v14, %v552_v13  ;;  %v576_v26 = vld [vmem:[#allocation5 + $0xf28] sm:$0xff]  ;;  %v575_v37 = vld [vmem:[#allocation5 + $0xf20] sm:$0xff]  ;;  %v214_v10 = vld [vmem:[#allocation5 + $0x3d8] sm:$0xff]  ;;  %v3551_v19 = vpack.c.bf16 %v201_v9, %v189_v8 }
  0xb5   :  { %3526 = vmatprep.subr.bf16.mxu1 %v3525_v53  ;;  %v588_v27 = vld [vmem:[#allocation5 + $0xf88] sm:$0xff]  ;;  %v587_v38 = vld [vmem:[#allocation5 + $0xf80] sm:$0xff]  ;;  %v226_v12 = vld [vmem:[#allocation5 + $0x438] sm:$0xff] }
  0xb6   :  { %3704 = vmatpush1.bf16.msra.mxu0 %v3703_v21  ;;  %v3709_v36 = vpack.c.bf16 %v588_v27, %v576_v26  ;;  %v600_v39 = vld [vmem:[#allocation5 + $0xfe8] sm:$0xff]  ;;  %v3711_v47 = vpack.c.bf16 %v587_v38, %v575_v37  ;;  %v599_v51 = vld [vmem:[#allocation5 + $0xfe0] sm:$0xff]  ;;  %v3553_v20 = vpack.c.bf16 %v226_v12, %v214_v10  ;;  %v213_v21 = vld [vmem:[#allocation5 + $0x3d0] sm:$0xff] }
  0xb7   :  { %3706 = vmatprep.subr.bf16.mxu0 %v3705_v23  ;;  %v612_v40 = vld [vmem:[#allocation5 + $0x1048] sm:$0xff]  ;;  %v611_v52 = vld [vmem:[#allocation5 + $0x1040] sm:$0xff]  ;;  %v225_v22 = vld [vmem:[#allocation5 + $0x430] sm:$0xff] }
  0xb8   :  { %3528 = vmatpush1.bf16.msra.mxu1 %v3527_v3  ;;  %v3713_v49 = vpack.c.bf16 %v612_v40, %v600_v39  ;;  %v624_v53 = vld [vmem:[#allocation5 + $0x10a8] sm:$0xff]  ;;  %v3715_v62 = vpack.c.bf16 %v611_v52, %v599_v51  ;;  %v623_v1 = vld [vmem:[#allocation5 + $0x10a0] sm:$0xff]  ;;  %v238_v23 = vld [vmem:[#allocation5 + $0x498] sm:$0xff]  ;;  %v3555_v32 = vpack.c.bf16 %v225_v22, %v213_v21 }
  0xb9   :  { %3530 = vmatprep.subr.bf16.mxu1 %v3529_v4  ;;  %v636_v54 = vld [vmem:[#allocation5 + $0x1108] sm:$0xff]  ;;  %v635_v3 = vld [vmem:[#allocation5 + $0x1100] sm:$0xff]  ;;  %v250_v25 = vld [vmem:[#allocation5 + $0x4f8] sm:$0xff] }
  0xba   :  { %3708 = vmatpush1.bf16.msra.mxu0 %v3707_v34  ;;  %v3717_v0 = vpack.c.bf16 %v636_v54, %v624_v53  ;;  %v648_v4 = vld [vmem:[#allocation5 + $0x1168] sm:$0xff]  ;;  %v3719_v11 = vpack.c.bf16 %v635_v3, %v623_v1  ;;  %v647_v14 = vld [vmem:[#allocation5 + $0x1160] sm:$0xff]  ;;  %v3557_v33 = vpack.c.bf16 %v250_v25, %v238_v23  ;;  %v237_v34 = vld [vmem:[#allocation5 + $0x490] sm:$0xff] }
  0xbb   :  { %3710 = vmatprep.subr.bf16.mxu0 %v3709_v36  ;;  %v660_v5 = vld [vmem:[#allocation5 + $0x11c8] sm:$0xff]  ;;  %v99_v27 = vld [vmem:[#allocation5 + $0x40] sm:$0xff]  ;;  %v249_v35 = vld [vmem:[#allocation5 + $0x4f0] sm:$0xff] }
  0xbc   :  { %3532 = vmatpush1.bf16.msra.mxu1 %v3531_v16  ;;  %v3721_v13 = vpack.c.bf16 %v660_v5, %v648_v4  ;;  %v659_v16 = vld [vmem:[#allocation5 + $0x11c0] sm:$0xff]  ;;  %v112_v18 = vld [vmem:[#allocation5 + $0xa8] sm:$0xff]  ;;  %v262_v36 = vld [vmem:[#allocation5 + $0x558] sm:$0xff]  ;;  %v3559_v45 = vpack.c.bf16 %v249_v35, %v237_v34 }
  0xbd   :  { %3534 = vmatprep.subr.bf16.mxu1 %v3533_v17  ;;  %v100_v17 = vld [vmem:[#allocation5 + $0x48] sm:$0xff]  ;;  %v3723_v24 = vpack.c.bf16 %v659_v16, %v647_v14  ;;  %v274_v38 = vld [vmem:[#allocation5 + $0x5b8] sm:$0xff]  ;;  %v123_v40 = vld [vmem:[#allocation5 + $0x100] sm:$0xff] }
  0xbe   :  { %3712 = vmatpush1.bf16.msra.mxu0 %v3711_v47  ;;  %v3821_v26 = vpack.c.bf16 %v112_v18, %v100_v17  ;;  %v136_v31 = vld [vmem:[#allocation5 + $0x168] sm:$0xff]  ;;  %v3561_v46 = vpack.c.bf16 %v274_v38, %v262_v36  ;;  %v261_v47 = vld [vmem:[#allocation5 + $0x550] sm:$0xff]  ;;  %v298_v52 = vld [vmem:[#allocation5 + $0x678] sm:$0xff] }
  0xbf   :  { %873 = vmatmul.mubr.f32.vlgmr.msra.gmra.mrb[0].mxu1 %v4945_v28  ;;  %3714 = vmatprep.subr.bf16.mxu0 %v3713_v49  ;;  %v160_v44 = vld [vmem:[#allocation5 + $0x228] sm:$0xff]  ;;  %v273_v48 = vld [vmem:[#allocation5 + $0x5b0] sm:$0xff]  ;;  %v286_v49 = vld [vmem:[#allocation5 + $0x618] sm:$0xff] }
  0xc0   :  { %3536 = vmatpush1.bf16.msra.mxu1 %v3535_v29  ;;  %878 = vmatprep.mubr.f32.mxu1 %v4829_v15  ;;  %v111_v29 = vld [vmem:[#allocation5 + $0xa0] sm:$0xff]  ;;  %v184_v59 = vld [vmem:[#allocation5 + $0x2e8] sm:$0xff]  ;;  %v3563_v60 = vpack.c.bf16 %v273_v48, %v261_v47  ;;  %v3565_v61 = vpack.c.bf16 %v298_v52, %v286_v49  ;;  %v297_v63 = vld [vmem:[#allocation5 + $0x670] sm:$0xff] }
  0xc1   :  { %3538 = vmatprep.subr.bf16.mxu1 %v3537_v30  ;;  %v124_v30 = vld [vmem:[#allocation5 + $0x108] sm:$0xff]  ;;  %v3823_v37 = vpack.c.bf16 %v111_v29, %v99_v27  ;;  %v147_v54 = vld [vmem:[#allocation5 + $0x1c0] sm:$0xff]  ;;  %v322_v3 = vld [vmem:[#allocation5 + $0x738] sm:$0xff] }
  0xc2   :  { %3716 = vmatpush1.bf16.msra.mxu0 %v3715_v62  ;;  %v3825_v39 = vpack.c.bf16 %v136_v31, %v124_v30  ;;  %v285_v62 = vld [vmem:[#allocation5 + $0x610] sm:$0xff]  ;;  %v171_v5 = vld [vmem:[#allocation5 + $0x280] sm:$0xff]  ;;  %v208_v8 = vld [vmem:[#allocation5 + $0x3a8] sm:$0xff] }
  0xc3   :  { %879 = vmatmul.mubr.f32.gmra.mrb[2].mxu1 %v4949_v41  ;;  %3718 = vmatprep.subr.bf16.mxu0 %v3717_v0  ;;  %v310_v0 = vld [vmem:[#allocation5 + $0x6d8] sm:$0xff]  ;;  %v3567_v9 = vpack.c.bf16 %v297_v63, %v285_v62  ;;  %v321_v12 = vld [vmem:[#allocation5 + $0x730] sm:$0xff]  ;;  %v195_v18 = vld [vmem:[#allocation5 + $0x340] sm:$0xff] }
  0xc4   :  { %3540 = vmatpush1.bf16.msra.mxu1 %v3539_v42  ;;  %949 = vmatprep.mubr.f32.mxu1 %v4927_v57  ;;  %v135_v42 = vld [vmem:[#allocation5 + $0x160] sm:$0xff]  ;;  %v3569_v10 = vpack.c.bf16 %v322_v3, %v310_v0  ;;  %v346_v16 = vld [vmem:[#allocation5 + $0x7f8] sm:$0xff]  ;;  %v232_v21 = vld [vmem:[#allocation5 + $0x468] sm:$0xff] }
  0xc5   :  { %3542 = vmatprep.subr.bf16.mxu1 %v3541_v43  ;;  %v148_v43 = vld [vmem:[#allocation5 + $0x1c8] sm:$0xff]  ;;  %v3827_v51 = vpack.c.bf16 %v135_v42, %v123_v40  ;;  %v333_v23 = vld [vmem:[#allocation5 + $0x790] sm:$0xff]  ;;  %v358_v25 = vld [vmem:[#allocation5 + $0x858] sm:$0xff] }
  0xc6   :  { %3720 = vmatpush1.bf16.msra.mxu0 %v3719_v11  ;;  %v3829_v53 = vpack.c.bf16 %v160_v44, %v148_v43  ;;  %v309_v11 = vld [vmem:[#allocation5 + $0x6d0] sm:$0xff]  ;;  %v370_v27 = vld [vmem:[#allocation5 + $0x8b8] sm:$0xff]  ;;  %v219_v30 = vld [vmem:[#allocation5 + $0x400] sm:$0xff] }
  0xc7   :  { %3722 = vmatprep.subr.bf16.mxu0 %v3721_v13  ;;  %v334_v13 = vld [vmem:[#allocation5 + $0x798] sm:$0xff]  ;;  %v231_v31 = vld [vmem:[#allocation5 + $0x460] sm:$0xff]  ;;  %v3577_v35 = vpack.c.bf16 %v370_v27, %v358_v25  ;;  %v357_v36 = vld [vmem:[#allocation5 + $0x850] sm:$0xff] }
  0xc8   :  { %3544 = vmatpush1.bf16.msra.mxu1 %v3543_v55  ;;  %v159_v55 = vld [vmem:[#allocation5 + $0x220] sm:$0xff]  ;;  %v3573_v22 = vpack.c.bf16 %v346_v16, %v334_v13  ;;  %v382_v38 = vld [vmem:[#allocation5 + $0x918] sm:$0xff]  ;;  %v381_v49 = vld [vmem:[#allocation5 + $0x910] sm:$0xff] }
  0xc9   :  { %3546 = vmatprep.subr.bf16.mxu1 %v3545_v58  ;;  %v172_v58 = vld [vmem:[#allocation5 + $0x288] sm:$0xff]  ;;  %v3831_v1 = vpack.c.bf16 %v159_v55, %v147_v54  ;;  %v394_v40 = vld [vmem:[#allocation5 + $0x978] sm:$0xff]  ;;  %v243_v43 = vld [vmem:[#allocation5 + $0x4c0] sm:$0xff] }
  0xca   :  { %3724 = vmatpush1.bf16.msra.mxu0 %v3723_v24  ;;  %v3833_v4 = vpack.c.bf16 %v184_v59, %v172_v58  ;;  %v345_v24 = vld [vmem:[#allocation5 + $0x7f0] sm:$0xff]  ;;  %v255_v44 = vld [vmem:[#allocation5 + $0x520] sm:$0xff]  ;;  %v3581_v48 = vpack.c.bf16 %v394_v40, %v382_v38  ;;  %v406_v52 = vld [vmem:[#allocation5 + $0x9d8] sm:$0xff] }
  0xcb   :  { %3822 = vmatprep.subr.bf16.mxu0 %v3821_v26  ;;  %v3575_v34 = vpack.c.bf16 %v345_v24, %v333_v23  ;;  %v418_v54 = vld [vmem:[#allocation5 + $0xa38] sm:$0xff]  ;;  %v267_v58 = vld [vmem:[#allocation5 + $0x580] sm:$0xff]  ;;  %v405_v0 = vld [vmem:[#allocation5 + $0x9d0] sm:$0xff] }
  0xcc   :  { %3548 = vmatpush1.bf16.msra.mxu1 %v3547_v6  ;;  %v183_v6 = vld [vmem:[#allocation5 + $0x2e0] sm:$0xff]  ;;  %v3585_v63 = vpack.c.bf16 %v418_v54, %v406_v52  ;;  %v430_v3 = vld [vmem:[#allocation5 + $0xa98] sm:$0xff]  ;;  %v429_v13 = vld [vmem:[#allocation5 + $0xa90] sm:$0xff] }
  0xcd   :  { %3550 = vmatprep.subr.bf16.mxu1 %v3549_v7  ;;  %1181 = vmatmul.mubr.f32.vlgmr.msra.gmra.mrb[0].mxu0 %v4945_v28  ;;  %v196_v7 = vld [vmem:[#allocation5 + $0x348] sm:$0xff]  ;;  %v3835_v14 = vpack.c.bf16 %v183_v6, %v171_v5  ;;  %v279_v59 = vld [vmem:[#allocation5 + $0x5e0] sm:$0xff]  ;;  %v442_v5 = vld [vmem:[#allocation5 + $0xaf8] sm:$0xff] }
  0xce   :  { %3824 = vmatpush1.bf16.msra.mxu0 %v3823_v37  ;;  %1186 = vmatprep.mubr.f32.mxu0 %v4829_v15  ;;  %v3837_v17 = vpack.c.bf16 %v208_v8, %v196_v7  ;;  %v369_v37 = vld [vmem:[#allocation5 + $0x8b0] sm:$0xff]  ;;  %v291_v7 = vld [vmem:[#allocation5 + $0x640] sm:$0xff]  ;;  %v454_v16 = vld [vmem:[#allocation5 + $0xb58] sm:$0xff] }
  0xcf   :  { %3826 = vmatprep.subr.bf16.mxu0 %v3825_v39  ;;  %v3843_v39 = vpack.c.bf16 %v231_v31, %v219_v30  ;;  %v3579_v47 = vpack.c.bf16 %v369_v37, %v357_v36  ;;  %v303_v8 = vld [vmem:[#allocation5 + $0x6a0] sm:$0xff]  ;;  %v453_v25 = vld [vmem:[#allocation5 + $0xb50] sm:$0xff]  ;;  %v478_v27 = vld [vmem:[#allocation5 + $0xc18] sm:$0xff] }
  0xd0   :  { %3552 = vmatpush1.bf16.msra.mxu1 %v3551_v19  ;;  %v207_v19 = vld [vmem:[#allocation5 + $0x3a0] sm:$0xff]  ;;  %v490_v30 = vld [vmem:[#allocation5 + $0xc78] sm:$0xff]  ;;  %v477_v38 = vld [vmem:[#allocation5 + $0xc10] sm:$0xff] }
  0xd1   :  { %3554 = vmatprep.subr.bf16.mxu1 %v3553_v20  ;;  %1187 = vmatmul.mubr.f32.gmra.mrb[2].mxu0 %v4949_v41  ;;  %v220_v20 = vld [vmem:[#allocation5 + $0x408] sm:$0xff]  ;;  %v3839_v26 = vpack.c.bf16 %v207_v19, %v195_v18  ;;  %v466_v18 = vld [vmem:[#allocation5 + $0xbb8] sm:$0xff]  ;;  %v3597_v37 = vpack.c.bf16 %v490_v30, %v478_v27  ;;  %v501_v52 = vld [vmem:[#allocation5 + $0xcd0] sm:$0xff] }
  0xd2   :  { %3828 = vmatpush1.bf16.msra.mxu0 %v3827_v51  ;;  %1411 = vmatprep.mubr.f32.mxu0 %v4927_v57  ;;  %v3571_v57 = vpack.c.bf16 %v321_v12, %v309_v11  ;;  %v3841_v29 = vpack.c.bf16 %v232_v21, %v220_v20  ;;  %v393_v51 = vld [vmem:[#allocation5 + $0x970] sm:$0xff]  ;;  %v3589_v12 = vpack.c.bf16 %v442_v5, %v430_v3  ;;  %v315_v20 = vld [vmem:[#allocation5 + $0x700] sm:$0xff]  ;;  %v502_v40 = vld [vmem:[#allocation5 + $0xcd8] sm:$0xff] }
  0xd3   :  { %3830 = vmatprep.subr.bf16.mxu0 %v3829_v53  ;;  %v3847_v53 = vpack.c.bf16 %v255_v44, %v243_v43  ;;  %v3583_v62 = vpack.c.bf16 %v393_v51, %v381_v49  ;;  %v327_v21 = vld [vmem:[#allocation5 + $0x760] sm:$0xff]  ;;  %v3593_v24 = vpack.c.bf16 %v466_v18, %v454_v16  ;;  %v514_v43 = vld [vmem:[#allocation5 + $0xd38] sm:$0xff]  ;;  %v525_v3 = vld [vmem:[#allocation5 + $0xd90] sm:$0xff] }
  0xd4   :  { %3556 = vmatpush1.bf16.msra.mxu1 %v3555_v32  ;;  %v244_v32 = vld [vmem:[#allocation5 + $0x4c8] sm:$0xff]  ;;  %v3601_v51 = vpack.c.bf16 %v514_v43, %v502_v40  ;;  %v526_v54 = vld [vmem:[#allocation5 + $0xd98] sm:$0xff]  ;;  %v561_v16 = vld [vmem:[#allocation5 + $0xeb0] sm:$0xff] }
  0xd5   :  { %3558 = vmatprep.subr.bf16.mxu1 %v3557_v33  ;;  %v256_v33 = vld [vmem:[#allocation5 + $0x528] sm:$0xff]  ;;  %v550_v5 = vld [vmem:[#allocation5 + $0xe58] sm:$0xff]  ;;  %v585_v27 = vld [vmem:[#allocation5 + $0xf70] sm:$0xff] }
  0xd6   :  { %3832 = vmatpush1.bf16.msra.mxu0 %v3831_v1  ;;  %v3845_v42 = vpack.c.bf16 %v256_v33, %v244_v32  ;;  %v417_v1 = vld [vmem:[#allocation5 + $0xa30] sm:$0xff]  ;;  %v339_v32 = vld [vmem:[#allocation5 + $0x7c0] sm:$0xff] }
  0xd7   :  { %3834 = vmatprep.subr.bf16.mxu0 %v3833_v4  ;;  %v3851_v4 = vpack.c.bf16 %v279_v59, %v267_v58  ;;  %v3587_v11 = vpack.c.bf16 %v417_v1, %v405_v0  ;;  %v351_v33 = vld [vmem:[#allocation5 + $0x820] sm:$0xff]  ;;  %v538_v58 = vld [vmem:[#allocation5 + $0xdf8] sm:$0xff]  ;;  %v609_v40 = vld [vmem:[#allocation5 + $0x1030] sm:$0xff] }
  0xd8   :  { %3560 = vmatpush1.bf16.msra.mxu1 %v3559_v45  ;;  %v268_v45 = vld [vmem:[#allocation5 + $0x588] sm:$0xff]  ;;  %v3605_v1 = vpack.c.bf16 %v538_v58, %v526_v54  ;;  %v633_v54 = vld [vmem:[#allocation5 + $0x10f0] sm:$0xff] }
  0xd9   :  { %3562 = vmatprep.subr.bf16.mxu1 %v3561_v46  ;;  %v280_v46 = vld [vmem:[#allocation5 + $0x5e8] sm:$0xff] }
  0xda   :  { %3836 = vmatpush1.bf16.msra.mxu0 %v3835_v14  ;;  %v3849_v55 = vpack.c.bf16 %v280_v46, %v268_v45  ;;  %v441_v14 = vld [vmem:[#allocation5 + $0xaf0] sm:$0xff]  ;;  %v363_v45 = vld [vmem:[#allocation5 + $0x880] sm:$0xff] }
  0xdb   :  { %3838 = vmatprep.subr.bf16.mxu0 %v3837_v17  ;;  %v3855_v17 = vpack.c.bf16 %v303_v8, %v291_v7  ;;  %v3591_v23 = vpack.c.bf16 %v441_v14, %v429_v13  ;;  %v375_v46 = vld [vmem:[#allocation5 + $0x8e0] sm:$0xff]  ;;  %v562_v7 = vld [vmem:[#allocation5 + $0xeb8] sm:$0xff]  ;;  %v549_v14 = vld [vmem:[#allocation5 + $0xe50] sm:$0xff] }
  0xdc   :  { %3564 = vmatpush1.bf16.msra.mxu1 %v3563_v60  ;;  %v292_v60 = vld [vmem:[#allocation5 + $0x648] sm:$0xff] }
  0xdd   :  { %3566 = vmatprep.subr.bf16.mxu1 %v3565_v61  ;;  %v304_v61 = vld [vmem:[#allocation5 + $0x6a8] sm:$0xff] }
  0xde   :  { %3840 = vmatpush1.bf16.msra.mxu0 %v3839_v26  ;;  %v3853_v6 = vpack.c.bf16 %v304_v61, %v292_v60  ;;  %v465_v26 = vld [vmem:[#allocation5 + $0xbb0] sm:$0xff]  ;;  %v387_v60 = vld [vmem:[#allocation5 + $0x940] sm:$0xff] }
  0xdf   :  { %3842 = vmatprep.subr.bf16.mxu0 %v3841_v29  ;;  %v3859_v29 = vpack.c.bf16 %v327_v21, %v315_v20  ;;  %v3595_v36 = vpack.c.bf16 %v465_v26, %v453_v25  ;;  %v399_v61 = vld [vmem:[#allocation5 + $0x9a0] sm:$0xff]  ;;  %v573_v26 = vld [vmem:[#allocation5 + $0xf10] sm:$0xff] }
  0xe0   :  { %3568 = vmatpush1.bf16.msra.mxu1 %v3567_v9  ;;  %v316_v9 = vld [vmem:[#allocation5 + $0x708] sm:$0xff]  ;;  %v435_v21 = vld [vmem:[#allocation5 + $0xac0] sm:$0xff] }
  0xe1   :  { %3570 = vmatprep.subr.bf16.mxu1 %v3569_v10  ;;  %v328_v10 = vld [vmem:[#allocation5 + $0x768] sm:$0xff] }
  0xe2   :  { %3844 = vmatpush1.bf16.msra.mxu0 %v3843_v39  ;;  %v3857_v19 = vpack.c.bf16 %v328_v10, %v316_v9  ;;  %v489_v39 = vld [vmem:[#allocation5 + $0xc70] sm:$0xff]  ;;  %v411_v9 = vld [vmem:[#allocation5 + $0xa00] sm:$0xff] }
  0xe3   :  { %3846 = vmatprep.subr.bf16.mxu0 %v3845_v42  ;;  %v3863_v42 = vpack.c.bf16 %v351_v33, %v339_v32  ;;  %v3599_v49 = vpack.c.bf16 %v489_v39, %v477_v38  ;;  %v423_v10 = vld [vmem:[#allocation5 + $0xa60] sm:$0xff]  ;;  %v597_v39 = vld [vmem:[#allocation5 + $0xfd0] sm:$0xff] }
  0xe4   :  { %3572 = vmatpush1.bf16.msra.mxu1 %v3571_v57  ;;  %v340_v57 = vld [vmem:[#allocation5 + $0x7c8] sm:$0xff]  ;;  %v3875_v18 = vpack.c.bf16 %v423_v10, %v411_v9  ;;  %v459_v33 = vld [vmem:[#allocation5 + $0xb80] sm:$0xff] }
  0xe5   :  { %3574 = vmatprep.subr.bf16.mxu1 %v3573_v22  ;;  %v352_v22 = vld [vmem:[#allocation5 + $0x828] sm:$0xff]  ;;  %v531_v10 = vld [vmem:[#allocation5 + $0xdc0] sm:$0xff] }
  0xe6   :  { %3848 = vmatpush1.bf16.msra.mxu0 %v3847_v53  ;;  %v3861_v31 = vpack.c.bf16 %v352_v22, %v340_v57  ;;  %v513_v53 = vld [vmem:[#allocation5 + $0xd30] sm:$0xff]  ;;  %v447_v57 = vld [vmem:[#allocation5 + $0xb20] sm:$0xff]  ;;  %v460_v22 = vld [vmem:[#allocation5 + $0xb88] sm:$0xff] }
  0xe7   :  { %3850 = vmatprep.subr.bf16.mxu0 %v3849_v55  ;;  %v3867_v55 = vpack.c.bf16 %v375_v46, %v363_v45  ;;  %v3603_v0 = vpack.c.bf16 %v513_v53, %v501_v52  ;;  %v3879_v30 = vpack.c.bf16 %v447_v57, %v435_v21  ;;  %v483_v46 = vld [vmem:[#allocation5 + $0xc40] sm:$0xff]  ;;  %v621_v53 = vld [vmem:[#allocation5 + $0x1090] sm:$0xff] }
  0xe8   :  { %3576 = vmatpush1.bf16.msra.mxu1 %v3575_v34  ;;  %v364_v34 = vld [vmem:[#allocation5 + $0x888] sm:$0xff]  ;;  %v555_v57 = vld [vmem:[#allocation5 + $0xe80] sm:$0xff] }
  0xe9   :  { %3578 = vmatprep.subr.bf16.mxu1 %v3577_v35  ;;  %v376_v35 = vld [vmem:[#allocation5 + $0x8e8] sm:$0xff] }
  0xea   :  { %3852 = vmatpush1.bf16.msra.mxu0 %v3851_v4  ;;  %v3865_v44 = vpack.c.bf16 %v376_v35, %v364_v34  ;;  %v537_v4 = vld [vmem:[#allocation5 + $0xdf0] sm:$0xff]  ;;  %v471_v34 = vld [vmem:[#allocation5 + $0xbe0] sm:$0xff]  ;;  %v484_v35 = vld [vmem:[#allocation5 + $0xc48] sm:$0xff] }
  0xeb   :  { %3854 = vmatprep.subr.bf16.mxu0 %v3853_v6  ;;  %v3871_v6 = vpack.c.bf16 %v399_v61, %v387_v60  ;;  %v3607_v13 = vpack.c.bf16 %v537_v4, %v525_v3  ;;  %v3883_v43 = vpack.c.bf16 %v471_v34, %v459_v33  ;;  %v507_v61 = vld [vmem:[#allocation5 + $0xd00] sm:$0xff]  ;;  %v645_v4 = vld [vmem:[#allocation5 + $0x1150] sm:$0xff] }
  0xec   :  { %3580 = vmatpush1.bf16.msra.mxu1 %v3579_v47  ;;  %v388_v47 = vld [vmem:[#allocation5 + $0x948] sm:$0xff]  ;;  %v579_v33 = vld [vmem:[#allocation5 + $0xf40] sm:$0xff] }
  0xed   :  { %3582 = vmatprep.subr.bf16.mxu1 %v3581_v48  ;;  %v400_v48 = vld [vmem:[#allocation5 + $0x9a8] sm:$0xff]  ;;  %v591_v34 = vld [vmem:[#allocation5 + $0xfa0] sm:$0xff] }
  0xee   :  { %3856 = vmatpush1.bf16.msra.mxu0 %v3855_v17  ;;  %v3869_v59 = vpack.c.bf16 %v400_v48, %v388_v47  ;;  %v574_v17 = vld [vmem:[#allocation5 + $0xf18] sm:$0xff]  ;;  %v495_v47 = vld [vmem:[#allocation5 + $0xca0] sm:$0xff]  ;;  %v508_v48 = vld [vmem:[#allocation5 + $0xd08] sm:$0xff] }
  0xef   :  { %3858 = vmatprep.subr.bf16.mxu0 %v3857_v19  ;;  %v586_v19 = vld [vmem:[#allocation5 + $0xf78] sm:$0xff]  ;;  %v3887_v58 = vpack.c.bf16 %v495_v47, %v483_v46  ;;  %v603_v46 = vld [vmem:[#allocation5 + $0x1000] sm:$0xff] }
  0xf0   :  { %3584 = vmatpush1.bf16.msra.mxu1 %v3583_v62  ;;  %v412_v62 = vld [vmem:[#allocation5 + $0xa08] sm:$0xff]  ;;  %v3613_v25 = vpack.c.bf16 %v586_v19, %v574_v17  ;;  %v109_v17 = vld [vmem:[#allocation5 + $0x90] sm:$0xff]  ;;  %v615_v47 = vld [vmem:[#allocation5 + $0x1060] sm:$0xff] }
  0xf1   :  { %3586 = vmatprep.subr.bf16.mxu1 %v3585_v63  ;;  %v424_v63 = vld [vmem:[#allocation5 + $0xa68] sm:$0xff] }
  0xf2   :  { %3860 = vmatpush1.bf16.msra.mxu0 %v3859_v29  ;;  %v3873_v8 = vpack.c.bf16 %v424_v63, %v412_v62  ;;  %v598_v29 = vld [vmem:[#allocation5 + $0xfd8] sm:$0xff]  ;;  %v519_v62 = vld [vmem:[#allocation5 + $0xd60] sm:$0xff]  ;;  %v532_v63 = vld [vmem:[#allocation5 + $0xdc8] sm:$0xff] }
  0xf3   :  { %3862 = vmatprep.subr.bf16.mxu0 %v3861_v31  ;;  %v610_v31 = vld [vmem:[#allocation5 + $0x1038] sm:$0xff] }
  0xf4   :  { %3588 = vmatpush1.bf16.msra.mxu1 %v3587_v11  ;;  %v436_v11 = vld [vmem:[#allocation5 + $0xac8] sm:$0xff]  ;;  %v3617_v38 = vpack.c.bf16 %v610_v31, %v598_v29  ;;  %v146_v29 = vld [vmem:[#allocation5 + $0x1b8] sm:$0xff] }
  0xf5   :  { %3590 = vmatprep.subr.bf16.mxu1 %v3589_v12  ;;  %v448_v12 = vld [vmem:[#allocation5 + $0xb28] sm:$0xff]  ;;  %v158_v31 = vld [vmem:[#allocation5 + $0x218] sm:$0xff] }
  0xf6   :  { %3864 = vmatpush1.bf16.msra.mxu0 %v3863_v42  ;;  %v3877_v20 = vpack.c.bf16 %v448_v12, %v436_v11  ;;  %v622_v42 = vld [vmem:[#allocation5 + $0x1098] sm:$0xff]  ;;  %v543_v11 = vld [vmem:[#allocation5 + $0xe20] sm:$0xff]  ;;  %v4962_v12 = vld [vmem:[#allocation2 + $0x20] sm:$0xff] }
  0xf7   :  { %3866 = vmatprep.subr.bf16.mxu0 %v3865_v44  ;;  %v634_v44 = vld [vmem:[#allocation5 + $0x10f8] sm:$0xff]  ;;  %v3895_v19 = vpack.c.bf16 %v543_v11, %v531_v10  ;;  %v651_v11 = vld [vmem:[#allocation5 + $0x1180] sm:$0xff] }
  0xf8   :  { %3592 = vmatpush1.bf16.msra.mxu1 %v3591_v23  ;;  %v472_v23 = vld [vmem:[#allocation5 + $0xbe8] sm:$0xff]  ;;  %v3621_v52 = vpack.c.bf16 %v634_v44, %v622_v42  ;;  %v170_v42 = vld [vmem:[#allocation5 + $0x278] sm:$0xff] }
  0xf9   :  { %3594 = vmatprep.subr.bf16.mxu1 %v3593_v24  ;;  %v3611_v24 = vpack.c.bf16 %v561_v16, %v549_v14  ;;  %v3881_v32 = vpack.c.bf16 %v472_v23, %v460_v22  ;;  %v97_v16 = vld [vmem:[#allocation5 + $0x30] sm:$0xff]  ;;  %v567_v22 = vld [vmem:[#allocation5 + $0xee0] sm:$0xff]  ;;  %v580_v23 = vld [vmem:[#allocation5 + $0xf48] sm:$0xff] }
  0xfa   :  { %3868 = vmatpush1.bf16.msra.mxu0 %v3867_v55  ;;  %v646_v55 = vld [vmem:[#allocation5 + $0x1158] sm:$0xff] }
  0xfb   :  { %3870 = vmatprep.subr.bf16.mxu0 %v3869_v59  ;;  %v658_v59 = vld [vmem:[#allocation5 + $0x11b8] sm:$0xff] }
  0xfc   :  { %3596 = vmatpush1.bf16.msra.mxu1 %v3595_v36  ;;  %v496_v36 = vld [vmem:[#allocation5 + $0xca8] sm:$0xff]  ;;  %v3625_v3 = vpack.c.bf16 %v658_v59, %v646_v55  ;;  %v182_v44 = vld [vmem:[#allocation5 + $0x2d8] sm:$0xff]  ;;  %v181_v55 = vld [vmem:[#allocation5 + $0x2d0] sm:$0xff]  ;;  %v3907_v59 = vpack.c.bf16 %v615_v47, %v603_v46 }
  0xfd   :  { %3598 = vmatprep.subr.bf16.mxu1 %v3597_v37  ;;  %v3615_v37 = vpack.c.bf16 %v585_v27, %v573_v26  ;;  %v3885_v45 = vpack.c.bf16 %v496_v36, %v484_v35  ;;  %v121_v26 = vld [vmem:[#allocation5 + $0xf0] sm:$0xff]  ;;  %v604_v35 = vld [vmem:[#allocation5 + $0x1008] sm:$0xff] }
  0xfe   :  { %3872 = vmatpush1.bf16.msra.mxu0 %v3871_v6  ;;  %v98_v6 = vld [vmem:[#allocation5 + $0x38] sm:$0xff]  ;;  %v133_v27 = vld [vmem:[#allocation5 + $0x150] sm:$0xff]  ;;  %v616_v36 = vld [vmem:[#allocation5 + $0x1068] sm:$0xff] }
  0xff   :  { %950 = vmatmul.mubr.f32.vlgmr.msra.gmra.mrb[4].mxu1 %v4931_v50  ;;  %3874 = vmatprep.subr.bf16.mxu0 %v3873_v8  ;;  %v110_v8 = vld [vmem:[#allocation5 + $0x98] sm:$0xff]  ;;  %v1691_v47 = vld [vmem:[#allocation8 + $0x60] sm:$0xff] }
 0x100   :  { %3600 = vmatpush1.bf16.msra.mxu1 %v3599_v49  ;;  %955 = vmatprep.mubr.f32.mxu1 %v4933_v56  ;;  %v3609_v56 = vpack.c.bf16 %v562_v7, %v550_v5  ;;  %v520_v49 = vld [vmem:[#allocation5 + $0xd68] sm:$0xff]  ;;  %v657_v5 = vld [vmem:[#allocation5 + $0x11b0] sm:$0xff]  ;;  %v3891_v7 = vpack.c.bf16 %v519_v62, %v507_v61  ;;  %v3725_v14 = vpack.c.bf16 %v110_v8, %v98_v6  ;;  %v627_v62 = vld [vmem:[#allocation5 + $0x10c0] sm:$0xff] }
 0x101   :  { %3602 = vmatprep.subr.bf16.mxu1 %v3601_v51  ;;  %v3619_v51 = vpack.c.bf16 %v609_v40, %v597_v39  ;;  %v3889_v60 = vpack.c.bf16 %v520_v49, %v508_v48  ;;  %v145_v39 = vld [vmem:[#allocation5 + $0x1b0] sm:$0xff]  ;;  %v628_v48 = vld [vmem:[#allocation5 + $0x10c8] sm:$0xff] }
 0x102   :  { %3876 = vmatpush1.bf16.msra.mxu0 %v3875_v18  ;;  %v122_v18 = vld [vmem:[#allocation5 + $0xf8] sm:$0xff]  ;;  %v157_v40 = vld [vmem:[#allocation5 + $0x210] sm:$0xff]  ;;  %v640_v49 = vld [vmem:[#allocation5 + $0x1128] sm:$0xff] }
 0x103   :  { %956 = vmatmul.mubr.f32.gmra.mrb[6].mxu1 %v4937_v2  ;;  %3878 = vmatprep.subr.bf16.mxu0 %v3877_v20  ;;  %v134_v20 = vld [vmem:[#allocation5 + $0x158] sm:$0xff]  ;;  %v3909_v61 = vpack.c.bf16 %v640_v49, %v628_v48  ;;  %v205_v6 = vld [vmem:[#allocation5 + $0x390] sm:$0xff]  ;;  %v1694_v48 = vld [vmem:[#allocation8 + $0x78] sm:$0xff] }
 0x104   :  { %3604 = vmatpush1.bf16.msra.mxu1 %v3603_v0  ;;  %1026 = vmatprep.mubr.f32.mxu1 %v4829_v15  ;;  %v544_v0 = vld [vmem:[#allocation5 + $0xe28] sm:$0xff] }
 0x105   :  { %3606 = vmatprep.subr.bf16.mxu1 %v3605_v1  ;;  %v3623_v1 = vpack.c.bf16 %v633_v54, %v621_v53  ;;  %v3893_v9 = vpack.c.bf16 %v544_v0, %v532_v63  ;;  %v3737_v53 = vpack.c.bf16 %v182_v44, %v170_v42  ;;  %v169_v54 = vld [vmem:[#allocation5 + $0x270] sm:$0xff]  ;;  %v639_v63 = vld [vmem:[#allocation5 + $0x1120] sm:$0xff]  ;;  %v652_v0 = vld [vmem:[#allocation5 + $0x1188] sm:$0xff] }
 0x106   :  { %3880 = vmatpush1.bf16.msra.mxu0 %v3879_v30  ;;  %v3899_v30 = vpack.c.bf16 %v567_v22, %v555_v57  ;;  %v3911_v8 = vpack.c.bf16 %v639_v63, %v627_v62  ;;  %v1679_v22 = vld [vmem:[#allocation8] sm:$0xff]  ;;  %v1698_v49 = vld [vmem:[#allocation8 + $0x98] sm:$0xff]  ;;  %v1697_v62 = vld [vmem:[#allocation8 + $0x90] sm:$0xff] }
 0x107   :  { %3882 = vmatprep.subr.bf16.mxu0 %v3881_v32  ;;  %v277_v42 = vld [vmem:[#allocation5 + $0x5d0] sm:$0xff] }
 0x108   :  { %3608 = vmatpush1.bf16.msra.mxu1 %v3607_v13  ;;  %v556_v13 = vld [vmem:[#allocation5 + $0xe88] sm:$0xff]  ;;  %v1700_v63 = vld [vmem:[#allocation8 + $0xa8] sm:$0xff] }
 0x109   :  { %3610 = vmatprep.subr.bf16.mxu1 %v3609_v56  ;;  %v568_v56 = vld [vmem:[#allocation5 + $0xee8] sm:$0xff] }
 0x10a   :  { %3884 = vmatpush1.bf16.msra.mxu0 %v3883_v43  ;;  %v3897_v21 = vpack.c.bf16 %v568_v56, %v556_v13  ;;  %v3903_v43 = vpack.c.bf16 %v591_v34, %v579_v33  ;;  %v663_v13 = vld [vmem:[#allocation5 + $0x11e0] sm:$0xff]  ;;  %v1680_v56 = vld [vmem:[#allocation8 + $0x8] sm:$0xff] }
 0x10b   :  { %3886 = vmatprep.subr.bf16.mxu0 %v3885_v45  ;;  %v3905_v45 = vpack.c.bf16 %v616_v36, %v604_v35  ;;  %v1685_v34 = vld [vmem:[#allocation8 + $0x30] sm:$0xff]  ;;  %v1688_v35 = vld [vmem:[#allocation8 + $0x48] sm:$0xff] }
 0x10c   :  { %3612 = vmatpush1.bf16.msra.mxu1 %v3611_v24  ;;  %v592_v24 = vld [vmem:[#allocation5 + $0xfa8] sm:$0xff]  ;;  %v1692_v36 = vld [vmem:[#allocation8 + $0x68] sm:$0xff]  ;;  %v4019_v44 = vpack.c.bf16 %v1688_v35, %v1685_v34 }
 0x10d   :  { %3614 = vmatprep.subr.bf16.mxu1 %v3613_v25  ;;  %1412 = vmatmul.mubr.f32.vlgmr.msra.gmra.mrb[4].mxu0 %v4931_v50  ;;  %v3627_v50 = vpack.c.bf16 %v657_v5, %v645_v4  ;;  %v3727_v25 = vpack.c.bf16 %v109_v17, %v97_v16  ;;  %v3901_v32 = vpack.c.bf16 %v592_v24, %v580_v23  ;;  %v193_v5 = vld [vmem:[#allocation5 + $0x330] sm:$0xff]  ;;  %v1682_v23 = vld [vmem:[#allocation8 + $0x18] sm:$0xff] }
 0x10e   :  { %3888 = vmatpush1.bf16.msra.mxu0 %v3887_v58  ;;  %1417 = vmatprep.mubr.f32.mxu0 %v4962_v12  ;;  %v194_v58 = vld [vmem:[#allocation5 + $0x338] sm:$0xff]  ;;  %v217_v17 = vld [vmem:[#allocation5 + $0x3f0] sm:$0xff]  ;;  %v1686_v24 = vld [vmem:[#allocation8 + $0x38] sm:$0xff] }
 0x10f   :  { %3890 = vmatprep.subr.bf16.mxu0 %v3889_v60  ;;  %v206_v60 = vld [vmem:[#allocation5 + $0x398] sm:$0xff]  ;;  %v1718_v34 = vld [vmem:[#allocation8 + $0x138] sm:$0xff] }
 0x110   :  { %3616 = vmatpush1.bf16.msra.mxu1 %v3615_v37  ;;  %v3731_v37 = vpack.c.bf16 %v133_v27, %v121_v26  ;;  %v3741_v4 = vpack.c.bf16 %v206_v60, %v194_v58  ;;  %v241_v27 = vld [vmem:[#allocation5 + $0x4b0] sm:$0xff]  ;;  %v314_v58 = vld [vmem:[#allocation5 + $0x6f8] sm:$0xff]  ;;  %v1722_v35 = vld [vmem:[#allocation8 + $0x158] sm:$0xff] }
 0x111   :  { %3618 = vmatprep.subr.bf16.mxu1 %v3617_v38  ;;  %1418 = vmatmul.mubr.f32.gmra.mrb[6].mxu0 %v4937_v2  ;;  %v3729_v2 = vpack.c.bf16 %v134_v20, %v122_v18  ;;  %v3733_v38 = vpack.c.bf16 %v158_v31, %v146_v29  ;;  %v229_v18 = vld [vmem:[#allocation5 + $0x450] sm:$0xff]  ;;  %v3915_v20 = vpack.c.bf16 %v663_v13, %v651_v11  ;;  %v326_v60 = vld [vmem:[#allocation5 + $0x758] sm:$0xff]  ;;  %v1706_v11 = vld [vmem:[#allocation8 + $0xd8] sm:$0xff] }
 0x112   :  { %3892 = vmatpush1.bf16.msra.mxu0 %v3891_v7  ;;  %1488 = vmatprep.mubr.f32.mxu0 %v4829_v15  ;;  %v218_v7 = vld [vmem:[#allocation5 + $0x3f8] sm:$0xff]  ;;  %v253_v29 = vld [vmem:[#allocation5 + $0x510] sm:$0xff]  ;;  %v4015_v31 = vpack.c.bf16 %v1682_v23, %v1679_v22  ;;  %v1710_v13 = vld [vmem:[#allocation8 + $0xf8] sm:$0xff] }
 0x113   :  { %3894 = vmatprep.subr.bf16.mxu0 %v3893_v9  ;;  %v230_v9 = vld [vmem:[#allocation5 + $0x458] sm:$0xff] }
 0x114   :  { %3620 = vmatpush1.bf16.msra.mxu1 %v3619_v51  ;;  %v3735_v51 = vpack.c.bf16 %v157_v40, %v145_v39  ;;  %v3745_v16 = vpack.c.bf16 %v230_v9, %v218_v7  ;;  %v265_v40 = vld [vmem:[#allocation5 + $0x570] sm:$0xff]  ;;  %v4027_v7 = vpack.c.bf16 %v1700_v63, %v1697_v62  ;;  %v1730_v62 = vld [vmem:[#allocation8 + $0x198] sm:$0xff] }
 0x115   :  { %3622 = vmatprep.subr.bf16.mxu1 %v3621_v52  ;;  %v4970_v52 = vld [vmem:[#allocation2 + $0x8] sm:$0xff]  ;;  %v1734_v63 = vld [vmem:[#allocation8 + $0x1b8] sm:$0xff] }
 0x116   :  { %3896 = vmatpush1.bf16.msra.mxu0 %v3895_v19  ;;  %v242_v19 = vld [vmem:[#allocation5 + $0x4b8] sm:$0xff] }
 0x117   :  { %3898 = vmatprep.subr.bf16.mxu0 %v3897_v21  ;;  %v254_v21 = vld [vmem:[#allocation5 + $0x518] sm:$0xff] }
 0x118   :  { %3624 = vmatpush1.bf16.msra.mxu1 %v3623_v1  ;;  %v664_v1 = vld [vmem:[#allocation5 + $0x11e8] sm:$0xff]  ;;  %v3749_v26 = vpack.c.bf16 %v254_v21, %v242_v19  ;;  %v1712_v22 = vld [vmem:[#allocation8 + $0x108] sm:$0xff] }
 0x119   :  { %3626 = vmatprep.subr.bf16.mxu1 %v3625_v3  ;;  %v3739_v3 = vpack.c.bf16 %v181_v55, %v169_v54  ;;  %v3913_v10 = vpack.c.bf16 %v664_v1, %v652_v0  ;;  %v289_v54 = vld [vmem:[#allocation5 + $0x630] sm:$0xff] }
 0x11a   :  { %3900 = vmatpush1.bf16.msra.mxu0 %v3899_v30  ;;  %v266_v30 = vld [vmem:[#allocation5 + $0x578] sm:$0xff]  ;;  %v301_v55 = vld [vmem:[#allocation5 + $0x690] sm:$0xff] }
 0x11b   :  { %3902 = vmatprep.subr.bf16.mxu0 %v3901_v32  ;;  %v278_v32 = vld [vmem:[#allocation5 + $0x5d8] sm:$0xff]  ;;  %v1707_v1 = vld [vmem:[#allocation8 + $0xe0] sm:$0xff] }
 0x11c   :  { %3628 = vmatpush1.bf16.msra.mxu1 %v3627_v50  ;;  %v1683_v50 = vld [vmem:[#allocation8 + $0x20] sm:$0xff]  ;;  %v3753_v39 = vpack.c.bf16 %v278_v32, %v266_v30  ;;  %v1704_v0 = vld [vmem:[#allocation8 + $0xc8] sm:$0xff] }
 0x11d   :  { %3726 = vmatprep.subr.bf16.mxu1 %v3725_v14  ;;  %v3743_v14 = vpack.c.bf16 %v205_v6, %v193_v5  ;;  %v4013_v57 = vpack.c.bf16 %v1683_v50, %v1680_v56  ;;  %v313_v5 = vld [vmem:[#allocation5 + $0x6f0] sm:$0xff]  ;;  %v338_v6 = vld [vmem:[#allocation5 + $0x7b8] sm:$0xff]  ;;  %v4029_v9 = vpack.c.bf16 %v1707_v1, %v1704_v0 }
 0x11e   :  { %3904 = vmatpush1.bf16.msra.mxu0 %v3903_v43  ;;  %v290_v43 = vld [vmem:[#allocation5 + $0x638] sm:$0xff] }
 0x11f   :  { %1027 = vmatmul.mubr.f32.vlgmr.msra.gmra.mrb[4].mxu1 %v4945_v28  ;;  %3906 = vmatprep.subr.bf16.mxu0 %v3905_v45  ;;  %v302_v45 = vld [vmem:[#allocation5 + $0x698] sm:$0xff] }
 0x120   :  { %3728 = vmatpush1.bf16.msra.mxu1 %v3727_v25  ;;  %1032 = vmatprep.mubr.f32.mxu1 %v4829_v15  ;;  %v1689_v25 = vld [vmem:[#allocation8 + $0x50] sm:$0xff]  ;;  %v1716_v23 = vld [vmem:[#allocation8 + $0x128] sm:$0xff] }
 0x121   :  { %3730 = vmatprep.subr.bf16.mxu1 %v3729_v2  ;;  %v3747_v2 = vpack.c.bf16 %v229_v18, %v217_v17  ;;  %v4017_v33 = vpack.c.bf16 %v1689_v25, %v1686_v24  ;;  %v1713_v56 = vld [vmem:[#allocation8 + $0x110] sm:$0xff]  ;;  %v349_v17 = vld [vmem:[#allocation5 + $0x810] sm:$0xff] }
 0x122   :  { %3908 = vmatpush1.bf16.msra.mxu0 %v3907_v59  ;;  %v4023_v59 = vpack.c.bf16 %v1694_v48, %v1691_v47  ;;  %v362_v18 = vld [vmem:[#allocation5 + $0x878] sm:$0xff]  ;;  %v4033_v21 = vpack.c.bf16 %v1713_v56, %v1710_v13  ;;  %v1719_v24 = vld [vmem:[#allocation8 + $0x140] sm:$0xff] }
 0x123   :  { %1033 = vmatmul.mubr.f32.gmra.mrb[6].mxu1 %v4949_v41  ;;  %3910 = vmatprep.subr.bf16.mxu0 %v3909_v61  ;;  %v4037_v32 = vpack.c.bf16 %v1719_v24, %v1716_v23  ;;  %v1724_v47 = vld [vmem:[#allocation8 + $0x168] sm:$0xff]  ;;  %v1737_v0 = vld [vmem:[#allocation8 + $0x1d0] sm:$0xff]  ;;  %v1743_v13 = vld [vmem:[#allocation8 + $0x200] sm:$0xff] }
 0x124   :  { %3732 = vmatpush1.bf16.msra.mxu1 %v3731_v37  ;;  %1257 = vmatprep.mubr.f32.mxu1 %v4970_v52  ;;  %v1695_v37 = vld [vmem:[#allocation8 + $0x80] sm:$0xff]  ;;  %v1728_v48 = vld [vmem:[#allocation8 + $0x188] sm:$0xff]  ;;  %v1749_v23 = vld [vmem:[#allocation8 + $0x230] sm:$0xff] }
 0x125   :  { %3734 = vmatprep.subr.bf16.mxu1 %v3733_v38  ;;  %v3751_v38 = vpack.c.bf16 %v253_v29, %v241_v27  ;;  %v4021_v46 = vpack.c.bf16 %v1695_v37, %v1692_v36  ;;  %v373_v27 = vld [vmem:[#allocation5 + $0x8d0] sm:$0xff]  ;;  %v386_v29 = vld [vmem:[#allocation5 + $0x938] sm:$0xff] }
 0x126   :  { %3912 = vmatpush1.bf16.msra.mxu0 %v3911_v8  ;;  %v350_v8 = vld [vmem:[#allocation5 + $0x818] sm:$0xff] }
 0x127   :  { %3914 = vmatprep.subr.bf16.mxu0 %v3913_v10  ;;  %v1703_v10 = vld [vmem:[#allocation8 + $0xc0] sm:$0xff]  ;;  %v1725_v36 = vld [vmem:[#allocation8 + $0x170] sm:$0xff] }
 0x128   :  { %3736 = vmatpush1.bf16.msra.mxu1 %v3735_v51  ;;  %v1701_v51 = vld [vmem:[#allocation8 + $0xb0] sm:$0xff]  ;;  %v4031_v19 = vpack.c.bf16 %v1706_v11, %v1703_v10  ;;  %v1736_v10 = vld [vmem:[#allocation8 + $0x1c8] sm:$0xff] }
 0x129   :  { %3738 = vmatprep.subr.bf16.mxu1 %v3737_v53  ;;  %v3755_v53 = vpack.c.bf16 %v277_v42, %v265_v40  ;;  %v4025_v61 = vpack.c.bf16 %v1701_v51, %v1698_v49  ;;  %v397_v40 = vld [vmem:[#allocation5 + $0x990] sm:$0xff]  ;;  %v410_v42 = vld [vmem:[#allocation5 + $0x9f8] sm:$0xff] }
 0x12a   :  { %3916 = vmatpush1.bf16.msra.mxu0 %v3915_v20  ;;  %v374_v20 = vld [vmem:[#allocation5 + $0x8d8] sm:$0xff]  ;;  %v1731_v49 = vld [vmem:[#allocation8 + $0x1a0] sm:$0xff] }
 0x12b   :  { %4014 = vmatprep.subr.bf16.mxu0 %v4013_v57  ;;  %v1709_v57 = vld [vmem:[#allocation8 + $0xf0] sm:$0xff]  ;;  %v1740_v11 = vld [vmem:[#allocation8 + $0x1e8] sm:$0xff] }
 0x12c   :  { %3740 = vmatpush1.bf16.msra.mxu1 %v3739_v3  ;;  %v3759_v3 = vpack.c.bf16 %v301_v55, %v289_v54  ;;  %v4035_v30 = vpack.c.bf16 %v1712_v22, %v1709_v57  ;;  %v421_v54 = vld [vmem:[#allocation5 + $0xa50] sm:$0xff]  ;;  %v434_v55 = vld [vmem:[#allocation5 + $0xab8] sm:$0xff]  ;;  %v1742_v57 = vld [vmem:[#allocation8 + $0x1f8] sm:$0xff] }
 0x12d   :  { %3742 = vmatprep.subr.bf16.mxu1 %v3741_v4  ;;  %1489 = vmatmul.mubr.f32.vlgmr.msra.gmra.mrb[4].mxu0 %v4945_v28  ;;  %v3757_v28 = vpack.c.bf16 %v302_v45, %v290_v43  ;;  %v3761_v4 = vpack.c.bf16 %v326_v60, %v314_v58  ;;  %v4041_v45 = vpack.c.bf16 %v1725_v36, %v1722_v35  ;;  %v1746_v22 = vld [vmem:[#allocation8 + $0x218] sm:$0xff]  ;;  %v1755_v35 = vld [vmem:[#allocation8 + $0x260] sm:$0xff] }
 0x12e   :  { %4016 = vmatpush1.bf16.msra.mxu0 %v4015_v31  ;;  %1494 = vmatprep.mubr.f32.mxu0 %v4829_v15  ;;  %v398_v31 = vld [vmem:[#allocation5 + $0x998] sm:$0xff]  ;;  %v4045_v60 = vpack.c.bf16 %v1731_v49, %v1728_v48  ;;  %v1758_v48 = vld [vmem:[#allocation8 + $0x278] sm:$0xff] }
 0x12f   :  { %4018 = vmatprep.subr.bf16.mxu0 %v4017_v33  ;;  %v1715_v33 = vld [vmem:[#allocation8 + $0x120] sm:$0xff]  ;;  %v1761_v49 = vld [vmem:[#allocation8 + $0x290] sm:$0xff] }
 0x130   :  { %3744 = vmatpush1.bf16.msra.mxu1 %v3743_v14  ;;  %v3765_v14 = vpack.c.bf16 %v350_v8, %v338_v6  ;;  %v4039_v43 = vpack.c.bf16 %v1718_v34, %v1715_v33  ;;  %v4049_v8 = vpack.c.bf16 %v1737_v0, %v1734_v63  ;;  %v1748_v33 = vld [vmem:[#allocation8 + $0x228] sm:$0xff]  ;;  %v4980_v63 = vld [vmem:[#allocation2 + $0x18] sm:$0xff] }
 0x131   :  { %3746 = vmatprep.subr.bf16.mxu1 %v3745_v16  ;;  %1495 = vmatmul.mubr.f32.gmra.mrb[6].mxu0 %v4949_v41  ;;  %v325_v41 = vld [vmem:[#allocation5 + $0x750] sm:$0xff] }
 0x132   :  { %4020 = vmatpush1.bf16.msra.mxu0 %v4019_v44  ;;  %v3763_v50 = vpack.c.bf16 %v325_v41, %v313_v5  ;;  %v337_v16 = vld [vmem:[#allocation5 + $0x7b0] sm:$0xff]  ;;  %v422_v44 = vld [vmem:[#allocation5 + $0xa58] sm:$0xff] }
 0x133   :  { %4022 = vmatprep.subr.bf16.mxu0 %v4021_v46  ;;  %v3767_v25 = vpack.c.bf16 %v349_v17, %v337_v16  ;;  %v1721_v46 = vld [vmem:[#allocation8 + $0x150] sm:$0xff]  ;;  %v445_v5 = vld [vmem:[#allocation5 + $0xb10] sm:$0xff] }
 0x134   :  { %3748 = vmatpush1.bf16.msra.mxu1 %v3747_v2  ;;  %v3769_v2 = vpack.c.bf16 %v374_v20, %v362_v18  ;;  %v4043_v58 = vpack.c.bf16 %v1724_v47, %v1721_v46  ;;  %v458_v41 = vld [vmem:[#allocation5 + $0xb78] sm:$0xff]  ;;  %v469_v16 = vld [vmem:[#allocation5 + $0xbd0] sm:$0xff]  ;;  %v4053_v20 = vpack.c.bf16 %v1743_v13, %v1740_v11  ;;  %v1754_v46 = vld [vmem:[#allocation8 + $0x258] sm:$0xff] }
 0x135   :  { %3750 = vmatprep.subr.bf16.mxu1 %v3749_v26  ;;  %v361_v26 = vld [vmem:[#allocation5 + $0x870] sm:$0xff]  ;;  %v482_v17 = vld [vmem:[#allocation5 + $0xc38] sm:$0xff]  ;;  %v1770_v11 = vld [vmem:[#allocation8 + $0x2d8] sm:$0xff] }
 0x136   :  { %4024 = vmatpush1.bf16.msra.mxu0 %v4023_v59  ;;  %v3771_v37 = vpack.c.bf16 %v373_v27, %v361_v26  ;;  %v446_v59 = vld [vmem:[#allocation5 + $0xb18] sm:$0xff]  ;;  %v493_v26 = vld [vmem:[#allocation5 + $0xc90] sm:$0xff] }
 0x137   :  { %4026 = vmatprep.subr.bf16.mxu0 %v4025_v61  ;;  %v1727_v61 = vld [vmem:[#allocation8 + $0x180] sm:$0xff]  ;;  %v506_v27 = vld [vmem:[#allocation5 + $0xcf8] sm:$0xff] }
 0x138   :  { %3752 = vmatpush1.bf16.msra.mxu1 %v3751_v38  ;;  %v3773_v38 = vpack.c.bf16 %v398_v31, %v386_v29  ;;  %v4047_v6 = vpack.c.bf16 %v1730_v62, %v1727_v61  ;;  %v4057_v31 = vpack.c.bf16 %v1749_v23, %v1746_v22  ;;  %v1752_v34 = vld [vmem:[#allocation8 + $0x248] sm:$0xff]  ;;  %v1757_v61 = vld [vmem:[#allocation8 + $0x270] sm:$0xff]  ;;  %v1779_v23 = vld [vmem:[#allocation8 + $0x320] sm:$0xff] }
 0x139   :  { %3754 = vmatprep.subr.bf16.mxu1 %v3753_v39  ;;  %v385_v39 = vld [vmem:[#allocation5 + $0x930] sm:$0xff]  ;;  %v1773_v13 = vld [vmem:[#allocation8 + $0x2f0] sm:$0xff] }
 0x13a   :  { %4028 = vmatpush1.bf16.msra.mxu0 %v4027_v7  ;;  %v3775_v51 = vpack.c.bf16 %v397_v40, %v385_v39  ;;  %v470_v7 = vld [vmem:[#allocation5 + $0xbd8] sm:$0xff]  ;;  %v517_v39 = vld [vmem:[#allocation5 + $0xd50] sm:$0xff] }
 0x13b   :  { %4030 = vmatprep.subr.bf16.mxu0 %v4029_v9  ;;  %v1733_v9 = vld [vmem:[#allocation8 + $0x1b0] sm:$0xff]  ;;  %v4976_v47 = vld [vmem:[#allocation2] sm:$0xff] }
 0x13c   :  { %3756 = vmatpush1.bf16.msra.mxu1 %v3755_v53  ;;  %v3777_v53 = vpack.c.bf16 %v422_v44, %v410_v42  ;;  %v4051_v18 = vpack.c.bf16 %v1736_v10, %v1733_v9  ;;  %v530_v40 = vld [vmem:[#allocation5 + $0xdb8] sm:$0xff]  ;;  %v4061_v44 = vpack.c.bf16 %v1755_v35, %v1752_v34  ;;  %v1763_v9 = vld [vmem:[#allocation8 + $0x2a0] sm:$0xff]  ;;  %v1766_v10 = vld [vmem:[#allocation8 + $0x2b8] sm:$0xff] }
 0x13d   :  { %3758 = vmatprep.subr.bf16.mxu1 %v3757_v28  ;;  %v409_v28 = vld [vmem:[#allocation5 + $0x9f0] sm:$0xff] }
 0x13e   :  { %4032 = vmatpush1.bf16.msra.mxu0 %v4031_v19  ;;  %v3779_v1 = vpack.c.bf16 %v421_v54, %v409_v28  ;;  %v494_v19 = vld [vmem:[#allocation5 + $0xc98] sm:$0xff]  ;;  %v529_v28 = vld [vmem:[#allocation5 + $0xdb0] sm:$0xff] }
 0x13f   :  { %4034 = vmatprep.subr.bf16.mxu0 %v4033_v21  ;;  %v1739_v21 = vld [vmem:[#allocation8 + $0x1e0] sm:$0xff]  ;;  %v1760_v62 = vld [vmem:[#allocation8 + $0x288] sm:$0xff] }
 0x140   :  { %3760 = vmatpush1.bf16.msra.mxu1 %v3759_v3  ;;  %v3781_v3 = vpack.c.bf16 %v446_v59, %v434_v55  ;;  %v4055_v29 = vpack.c.bf16 %v1742_v57, %v1739_v21  ;;  %v541_v54 = vld [vmem:[#allocation5 + $0xe10] sm:$0xff]  ;;  %v554_v55 = vld [vmem:[#allocation5 + $0xe78] sm:$0xff] }
 0x141   :  { %3762 = vmatprep.subr.bf16.mxu1 %v3761_v4  ;;  %v433_v4 = vld [vmem:[#allocation5 + $0xab0] sm:$0xff]  ;;  %v566_v59 = vld [vmem:[#allocation5 + $0xed8] sm:$0xff] }
 0x142   :  { %4036 = vmatpush1.bf16.msra.mxu0 %v4035_v30  ;;  %v3783_v56 = vpack.c.bf16 %v445_v5, %v433_v4  ;;  %v518_v30 = vld [vmem:[#allocation5 + $0xd58] sm:$0xff]  ;;  %v553_v4 = vld [vmem:[#allocation5 + $0xe70] sm:$0xff] }
 0x143   :  { %4038 = vmatprep.subr.bf16.mxu0 %v4037_v32  ;;  %v1745_v32 = vld [vmem:[#allocation8 + $0x210] sm:$0xff]  ;;  %v1764_v0 = vld [vmem:[#allocation8 + $0x2a8] sm:$0xff] }
 0x144   :  { %3764 = vmatpush1.bf16.msra.mxu1 %v3763_v50  ;;  %v3785_v50 = vpack.c.bf16 %v470_v7, %v458_v41  ;;  %v4059_v42 = vpack.c.bf16 %v1748_v33, %v1745_v32  ;;  %v565_v5 = vld [vmem:[#allocation5 + $0xed0] sm:$0xff]  ;;  %v578_v41 = vld [vmem:[#allocation5 + $0xf38] sm:$0xff] }
 0x145   :  { %3766 = vmatprep.subr.bf16.mxu1 %v3765_v14  ;;  %v457_v14 = vld [vmem:[#allocation5 + $0xb70] sm:$0xff]  ;;  %v590_v7 = vld [vmem:[#allocation5 + $0xf98] sm:$0xff] }
 0x146   :  { %4040 = vmatpush1.bf16.msra.mxu0 %v4039_v43  ;;  %v3787_v24 = vpack.c.bf16 %v469_v16, %v457_v14  ;;  %v542_v43 = vld [vmem:[#allocation5 + $0xe18] sm:$0xff]  ;;  %v577_v14 = vld [vmem:[#allocation5 + $0xf30] sm:$0xff] }
 0x147   :  { %4042 = vmatprep.subr.bf16.mxu0 %v4041_v45  ;;  %v1751_v45 = vld [vmem:[#allocation8 + $0x240] sm:$0xff]  ;;  %v1769_v21 = vld [vmem:[#allocation8 + $0x2d0] sm:$0xff]  ;;  %v1772_v57 = vld [vmem:[#allocation8 + $0x2e8] sm:$0xff] }
 0x148   :  { %3768 = vmatpush1.bf16.msra.mxu1 %v3767_v25  ;;  %v3789_v25 = vpack.c.bf16 %v494_v19, %v482_v17  ;;  %v589_v16 = vld [vmem:[#allocation5 + $0xf90] sm:$0xff]  ;;  %v602_v17 = vld [vmem:[#allocation5 + $0xff8] sm:$0xff] }
 0x149   :  { %3770 = vmatprep.subr.bf16.mxu1 %v3769_v2  ;;  %v481_v2 = vld [vmem:[#allocation5 + $0xc30] sm:$0xff]  ;;  %v614_v19 = vld [vmem:[#allocation5 + $0x1058] sm:$0xff] }
 0x14a   :  { %4044 = vmatpush1.bf16.msra.mxu0 %v4043_v58  ;;  %v3791_v36 = vpack.c.bf16 %v493_v26, %v481_v2  ;;  %v4063_v58 = vpack.c.bf16 %v1754_v46, %v1751_v45  ;;  %v1776_v22 = vld [vmem:[#allocation8 + $0x308] sm:$0xff] }
 0x14b   :  { %4046 = vmatprep.subr.bf16.mxu0 %v4045_v60  ;;  %v4065_v60 = vpack.c.bf16 %v1761_v49, %v1758_v48  ;;  %v601_v2 = vld [vmem:[#allocation5 + $0xff0] sm:$0xff] }
 0x14c   :  { %3772 = vmatpush1.bf16.msra.mxu1 %v3771_v37  ;;  %v3793_v37 = vpack.c.bf16 %v518_v30, %v506_v27  ;;  %v613_v26 = vld [vmem:[#allocation5 + $0x1050] sm:$0xff]  ;;  %v4075_v27 = vpack.c.bf16 %v1772_v57, %v1769_v21  ;;  %v638_v30 = vld [vmem:[#allocation5 + $0x1118] sm:$0xff] }
 0x14d   :  { %3774 = vmatprep.subr.bf16.mxu1 %v3773_v38  ;;  %v505_v38 = vld [vmem:[#allocation5 + $0xcf0] sm:$0xff]  ;;  %v3811_v32 = vpack.c.bf16 %v613_v26, %v601_v2 }
 0x14e   :  { %4048 = vmatpush1.bf16.msra.mxu0 %v4047_v6  ;;  %v4067_v6 = vpack.c.bf16 %v1760_v62, %v1757_v61  ;;  %v625_v34 = vld [vmem:[#allocation5 + $0x10b0] sm:$0xff]  ;;  %v4984_v61 = vld [vmem:[#allocation2 + $0x10] sm:$0xff] }
 0x14f   :  { %4050 = vmatprep.subr.bf16.mxu0 %v4049_v8  ;;  %v637_v35 = vld [vmem:[#allocation5 + $0x1110] sm:$0xff] }
 0x150   :  { %3776 = vmatpush1.bf16.msra.mxu1 %v3775_v51  ;;  %v3795_v51 = vpack.c.bf16 %v517_v39, %v505_v38  ;;  %v3815_v38 = vpack.c.bf16 %v637_v35, %v625_v34  ;;  %v101_v48 = vld [vmem:[#allocation5 + $0x50] sm:$0xff]  ;;  %v282_v34 = vld [vmem:[#allocation5 + $0x5f8] sm:$0xff] }
 0x151   :  { %3778 = vmatprep.subr.bf16.mxu1 %v3777_v53  ;;  %v3797_v53 = vpack.c.bf16 %v542_v43, %v530_v40  ;;  %v649_v40 = vld [vmem:[#allocation5 + $0x1170] sm:$0xff]  ;;  %v102_v43 = vld [vmem:[#allocation5 + $0x58] sm:$0xff] }
 0x152   :  { %4052 = vmatpush1.bf16.msra.mxu0 %v4051_v18  ;;  %v4071_v18 = vpack.c.bf16 %v1766_v10, %v1763_v9  ;;  %v113_v49 = vld [vmem:[#allocation5 + $0xb0] sm:$0xff]  ;;  %v198_v10 = vld [vmem:[#allocation5 + $0x358] sm:$0xff] }
 0x153   :  { %4054 = vmatprep.subr.bf16.mxu0 %v4053_v20  ;;  %v4073_v20 = vpack.c.bf16 %v1773_v13, %v1770_v11  ;;  %v185_v9 = vld [vmem:[#allocation5 + $0x2f0] sm:$0xff]  ;;  %v210_v11 = vld [vmem:[#allocation5 + $0x3b8] sm:$0xff] }
 0x154   :  { %3780 = vmatpush1.bf16.msra.mxu1 %v3779_v1  ;;  %v1767_v1 = vld [vmem:[#allocation8 + $0x2c0] sm:$0xff] }
 0x155   :  { %3782 = vmatprep.subr.bf16.mxu1 %v3781_v3  ;;  %v3801_v3 = vpack.c.bf16 %v566_v59, %v554_v55  ;;  %v4069_v8 = vpack.c.bf16 %v1767_v1, %v1764_v0  ;;  %v125_v55 = vld [vmem:[#allocation5 + $0x110] sm:$0xff]  ;;  %v150_v59 = vld [vmem:[#allocation5 + $0x1d8] sm:$0xff] }
 0x156   :  { %4056 = vmatpush1.bf16.msra.mxu0 %v4055_v29  ;;  %v626_v29 = vld [vmem:[#allocation5 + $0x10b8] sm:$0xff]  ;;  %v149_v1 = vld [vmem:[#allocation5 + $0x1d0] sm:$0xff] }
 0x157   :  { %4058 = vmatprep.subr.bf16.mxu0 %v4057_v31  ;;  %v4077_v31 = vpack.c.bf16 %v1779_v23, %v1776_v22  ;;  %v3813_v33 = vpack.c.bf16 %v638_v30, %v626_v29  ;;  %v221_v22 = vld [vmem:[#allocation5 + $0x410] sm:$0xff] }
 0x158   :  { %3784 = vmatpush1.bf16.msra.mxu1 %v3783_v56  ;;  %v3803_v56 = vpack.c.bf16 %v565_v5, %v553_v4  ;;  %v186_v4 = vld [vmem:[#allocation5 + $0x2f8] sm:$0xff]  ;;  %v233_v23 = vld [vmem:[#allocation5 + $0x470] sm:$0xff] }
 0x159   :  { %3786 = vmatprep.subr.bf16.mxu1 %v3785_v50  ;;  %v3805_v50 = vpack.c.bf16 %v590_v7, %v578_v41  ;;  %v4988_v5 = vld [vmem:[#allocation2 + $0x28] sm:$0xff]  ;;  %v671_v41 = vlaneseq  ;;  %v245_v30 = vld [vmem:[#allocation5 + $0x4d0] sm:$0xff] }
 0x15a   :  { %4060 = vmatpush1.bf16.msra.mxu0 %v4059_v42  ;;  %v661_v42 = vld [vmem:[#allocation5 + $0x11d0] sm:$0xff] }
 0x15b   :  { %4062 = vmatprep.subr.bf16.mxu0 %v4061_v44  ;;  %v114_v44 = vld [vmem:[#allocation5 + $0xb8] sm:$0xff]  ;;  %v3819_v45 = vpack.c.bf16 %v661_v42, %v649_v40  ;;  %v4992_v13 = vshrl.u32 %v671_v41, 7  ;;  %v1782_v42 = vld [vmem:[#allocation8 + $0x338] sm:$0xff]  ;;  %v293_v41 = vld [vmem:[#allocation5 + $0x650] sm:$0xff] }
 0x15c   :  { %3788 = vmatpush1.bf16.msra.mxu1 %v3787_v24  ;;  %v3807_v24 = vpack.c.bf16 %v589_v16, %v577_v14  ;;  %v3917_v46 = vpack.c.bf16 %v114_v44, %v102_v43  ;;  %v197_v14 = vld [vmem:[#allocation5 + $0x350] sm:$0xff]  ;;  %v1785_v43 = vld [vmem:[#allocation8 + $0x350] sm:$0xff] }
 0x15d   :  { %3790 = vmatprep.subr.bf16.mxu1 %v3789_v25  ;;  %v3809_v25 = vpack.c.bf16 %v614_v19, %v602_v17  ;;  %v209_v16 = vld [vmem:[#allocation5 + $0x3b0] sm:$0xff]  ;;  %v222_v17 = vld [vmem:[#allocation5 + $0x418] sm:$0xff]  ;;  %v4995_v19 = vsub.s32 0, %v4992_v13  ;;  %v5000_v21 = vsub.s32 1, %v4992_v13 }
 0x15e   :  { %4064 = vmatpush1.bf16.msra.mxu0 %v4063_v58  ;;  %v137_v58 = vld [vmem:[#allocation5 + $0x170] sm:$0xff] }
 0x15f   :  { %1258 = vmatmul.mubr.f32.vlgmr.msra.gmra.mrb[8].mxu1 %v4976_v47  ;;  %4066 = vmatprep.subr.bf16.mxu0 %v4065_v60  ;;  %v162_v60 = vld [vmem:[#allocation5 + $0x238] sm:$0xff]  ;;  %v3923_v62 = vpack.c.bf16 %v137_v58, %v125_v55 }
 0x160   :  { %3792 = vmatpush1.bf16.msra.mxu1 %v3791_v36  ;;  %1263 = vmatprep.mubr.f32.mxu1 %v4962_v12  ;;  %v3799_v12 = vpack.c.bf16 %v541_v54, %v529_v28  ;;  %v650_v36 = vld [vmem:[#allocation5 + $0x1178] sm:$0xff]  ;;  %v3919_v28 = vpack.c.bf16 %v113_v49, %v101_v48  ;;  %v3925_v0 = vpack.c.bf16 %v162_v60, %v150_v59 }
 0x161   :  { %3794 = vmatprep.subr.bf16.mxu1 %v3793_v37  ;;  %v662_v37 = vld [vmem:[#allocation5 + $0x11d8] sm:$0xff]  ;;  %v4081_v59 = vpack.c.bf16 %v1785_v43, %v1782_v42  ;;  %v1799_v42 = vld [vmem:[#allocation8 + $0x3c0] sm:$0xff]  ;;  %v1802_v43 = vld [vmem:[#allocation8 + $0x3d8] sm:$0xff] }
 0x162   :  { %4068 = vmatpush1.bf16.msra.mxu0 %v4067_v6  ;;  %v3817_v39 = vpack.c.bf16 %v662_v37, %v650_v36  ;;  %v1775_v37 = vld [vmem:[#allocation8 + $0x300] sm:$0xff]  ;;  %v1781_v60 = vld [vmem:[#allocation8 + $0x330] sm:$0xff] }
 0x163   :  { %1264 = vmatmul.mubr.f32.gmra.mrb[10].mxu1 %v4980_v63  ;;  %4070 = vmatprep.subr.bf16.mxu0 %v4069_v8  ;;  %v173_v8 = vld [vmem:[#allocation5 + $0x290] sm:$0xff] }
 0x164   :  { %3796 = vmatpush1.bf16.msra.mxu1 %v3795_v51  ;;  %1334 = vmatprep.mubr.f32.mxu1 %v4829_v15  ;;  %v126_v51 = vld [vmem:[#allocation5 + $0x118] sm:$0xff] }
 0x165   :  { %3798 = vmatprep.subr.bf16.mxu1 %v3797_v53  ;;  %v138_v53 = vld [vmem:[#allocation5 + $0x178] sm:$0xff] }
 0x166   :  { %4072 = vmatpush1.bf16.msra.mxu0 %v4071_v18  ;;  %v3921_v54 = vpack.c.bf16 %v138_v53, %v126_v51  ;;  %v234_v18 = vld [vmem:[#allocation5 + $0x478] sm:$0xff] }
 0x167   :  { %4074 = vmatprep.subr.bf16.mxu0 %v4073_v20  ;;  %v4997_v20 = vld [vmem:[#allocation7] sm:$0xff]  ;;  %v3937_v57 = vpack.c.bf16 %v234_v18, %v222_v17  ;;  %v294_v51 = vld [vmem:[#allocation5 + $0x658] sm:$0xff] }
 0x168   :  { %3800 = vmatpush1.bf16.msra.mxu1 %v3799_v12  ;;  %v161_v12 = vld [vmem:[#allocation5 + $0x230] sm:$0xff]  ;;  %v674_v2 = vrot.slane %v4997_v20, %v4995_v19  ;;  %v678_v26 = vrot.slane %v4997_v20, %v5000_v21  ;;  %v306_v53 = vld [vmem:[#allocation5 + $0x6b8] sm:$0xff]  ;;  %v1794_v17 = vld [vmem:[#allocation8 + $0x398] sm:$0xff] }
 0x169   :  { %3802 = vmatprep.subr.bf16.mxu1 %v3801_v3  ;;  %v174_v3 = vld [vmem:[#allocation5 + $0x298] sm:$0xff]  ;;  %v3927_v6 = vpack.c.bf16 %v161_v12, %v149_v1 }
 0x16a   :  { %4076 = vmatpush1.bf16.msra.mxu0 %v4075_v27  ;;  %v3929_v7 = vpack.c.bf16 %v186_v4, %v174_v3  ;;  %v3939_v27 = vpack.c.bf16 %v233_v23, %v221_v22  ;;  %v1788_v12 = vld [vmem:[#allocation8 + $0x368] sm:$0xff]  ;;  %v1791_v3 = vld [vmem:[#allocation8 + $0x380] sm:$0xff]  ;;  %v3949_v4 = vpack.c.bf16 %v306_v53, %v294_v51  ;;  %v1797_v18 = vld [vmem:[#allocation8 + $0x3b0] sm:$0xff] }
 0x16b   :  { %4078 = vmatprep.subr.bf16.mxu0 %v4077_v31  ;;  %v257_v31 = vld [vmem:[#allocation5 + $0x530] sm:$0xff]  ;;  %v342_v23 = vld [vmem:[#allocation5 + $0x7d8] sm:$0xff] }
 0x16c   :  { %3804 = vmatpush1.bf16.msra.mxu1 %v3803_v56  ;;  %v3931_v56 = vpack.c.bf16 %v185_v9, %v173_v8  ;;  %v3943_v40 = vpack.c.bf16 %v257_v31, %v245_v30  ;;  %v318_v8 = vld [vmem:[#allocation5 + $0x718] sm:$0xff]  ;;  %v329_v22 = vld [vmem:[#allocation5 + $0x770] sm:$0xff] }
 0x16d   :  { %3806 = vmatprep.subr.bf16.mxu1 %v3805_v50  ;;  %v3933_v50 = vpack.c.bf16 %v210_v11, %v198_v10  ;;  %v330_v9 = vld [vmem:[#allocation5 + $0x778] sm:$0xff]  ;;  %v1803_v31 = vld [vmem:[#allocation8 + $0x3e0] sm:$0xff] }
 0x16e   :  { %v1800_v30 = vld [vmem:[#allocation8 + $0x3c8] sm:$0xff] }
 0x16f   :  { %v365_v51 = vld [vmem:[#allocation5 + $0x890] sm:$0xff] }
 0x170   :  { %3808 = vmatpush1.bf16.msra.mxu1 %v3807_v24  ;;  %v246_v24 = vld [vmem:[#allocation5 + $0x4d8] sm:$0xff]  ;;  %v377_v53 = vld [vmem:[#allocation5 + $0x8f0] sm:$0xff] }
 0x171   :  { %3810 = vmatprep.subr.bf16.mxu1 %v3809_v25  ;;  %v258_v25 = vld [vmem:[#allocation5 + $0x538] sm:$0xff] }
 0x172   :  { %v3941_v29 = vpack.c.bf16 %v258_v25, %v246_v24  ;;  %v354_v24 = vld [vmem:[#allocation5 + $0x838] sm:$0xff] }
 0x174   :  { %3812 = vmatpush1.bf16.msra.mxu1 %v3811_v32 }
 0x175   :  { %3814 = vmatprep.subr.bf16.mxu1 %v3813_v33  ;;  %v270_v33 = vld [vmem:[#allocation5 + $0x598] sm:$0xff] }
 0x176   :  { %v3945_v44 = vpack.c.bf16 %v282_v34, %v270_v33  ;;  %v341_v33 = vld [vmem:[#allocation5 + $0x7d0] sm:$0xff] }
 0x177   :  { %v353_v34 = vld [vmem:[#allocation5 + $0x830] sm:$0xff] }
 0x178   :  { %3816 = vmatpush1.bf16.msra.mxu1 %v3815_v38  ;;  %v1778_v38 = vld [vmem:[#allocation8 + $0x318] sm:$0xff] }
 0x179   :  { %3818 = vmatprep.subr.bf16.mxu1 %v3817_v39 }
 0x17c   :  { %3820 = vmatpush1.bf16.msra.mxu1 %v3819_v45  ;;  %v269_v45 = vld [vmem:[#allocation5 + $0x590] sm:$0xff] }
 0x17d   :  { %3918 = vmatprep.subr.bf16.mxu1 %v3917_v46  ;;  %v281_v46 = vld [vmem:[#allocation5 + $0x5f0] sm:$0xff] }
 0x17e   :  { %v3947_v1 = vpack.c.bf16 %v281_v46, %v269_v45  ;;  %v1806_v45 = vld [vmem:[#allocation8 + $0x3f8] sm:$0xff]  ;;  %v1809_v46 = vld [vmem:[#allocation8 + $0x410] sm:$0xff] }
 0x17f   :  { %1335 = vmatmul.mubr.f32.vlgmr.msra.gmra.mrb[8].mxu1 %v4984_v61 }
 0x180   :  { %3920 = vmatpush1.bf16.msra.mxu1 %v3919_v28  ;;  %1340 = vmatprep.mubr.f32.mxu1 %v4829_v15  ;;  %v4079_v28 = vpack.c.bf16 %v1778_v38, %v1775_v37  ;;  %v378_v37 = vld [vmem:[#allocation5 + $0x8f8] sm:$0xff] }
 0x181   :  { %3922 = vmatprep.subr.bf16.mxu1 %v3921_v54 }
 0x183   :  { %1341 = vmatmul.mubr.f32.gmra.mrb[10].mxu1 %v4988_v5 }
 0x184   :  { %3924 = vmatpush1.bf16.msra.mxu1 %v3923_v62  ;;  %1565 = vmatprep.mubr.f32.mxu1 %v4970_v52  ;;  %v3935_v52 = vpack.c.bf16 %v209_v16, %v197_v14  ;;  %v1784_v62 = vld [vmem:[#allocation8 + $0x348] sm:$0xff]  ;;  %v1790_v14 = vld [vmem:[#allocation8 + $0x378] sm:$0xff] }
 0x185   :  { %3926 = vmatprep.subr.bf16.mxu1 %v3925_v0  ;;  %v4083_v10 = vpack.c.bf16 %v1784_v62, %v1781_v60  ;;  %v4097_v62 = vpack.c.bf16 %v1809_v46, %v1806_v45 }
 0x188   :  { %3928 = vmatpush1.bf16.msra.mxu1 %v3927_v6  ;;  %v305_v6 = vld [vmem:[#allocation5 + $0x6b0] sm:$0xff] }
 0x189   :  { %3930 = vmatprep.subr.bf16.mxu1 %v3929_v7  ;;  %v3951_v16 = vpack.c.bf16 %v305_v6, %v293_v41  ;;  %v1812_v41 = vld [vmem:[#allocation8 + $0x428] sm:$0xff]  ;;  %v1815_v6 = vld [vmem:[#allocation8 + $0x440] sm:$0xff] }
 0x18c   :  { %3932 = vmatpush1.bf16.msra.mxu1 %v3931_v56  ;;  %v4085_v56 = vpack.c.bf16 %v1791_v3, %v1788_v12  ;;  %v1808_v12 = vld [vmem:[#allocation8 + $0x408] sm:$0xff]  ;;  %v3963_v3 = vpack.c.bf16 %v377_v53, %v365_v51  ;;  %v1826_v51 = vld [vmem:[#allocation8 + $0x498] sm:$0xff] }
 0x18d   :  { %3934 = vmatprep.subr.bf16.mxu1 %v3933_v50  ;;  %v1787_v50 = vld [vmem:[#allocation8 + $0x360] sm:$0xff] }
 0x18e   :  { %v4087_v25 = vpack.c.bf16 %v1790_v14, %v1787_v50  ;;  %v426_v50 = vld [vmem:[#allocation5 + $0xa78] sm:$0xff] }
 0x190   :  { %3936 = vmatpush1.bf16.msra.mxu1 %v3935_v52  ;;  %v3953_v52 = vpack.c.bf16 %v330_v9, %v318_v8  ;;  %v389_v9 = vld [vmem:[#allocation5 + $0x950] sm:$0xff] }
 0x191   :  { %3938 = vmatprep.subr.bf16.mxu1 %v3937_v57  ;;  %v317_v57 = vld [vmem:[#allocation5 + $0x710] sm:$0xff] }
 0x192   :  { %v874_v32 = vpop.f32.mrb[0].mxu1 }
 0x193   :  { %v5006_v35 = vadd.f32 %v874_v32, %v674_v2  ;;  %v876_v36 = vpop.f32.mrb[1].mxu1  ;;  %v3957_v32 = vpack.c.bf16 %v354_v24, %v342_v23  ;;  %v1821_v23 = vld [vmem:[#allocation8 + $0x470] sm:$0xff] }
 0x194   :  { %v5008_v39 = vadd.f32 %v876_v36, %v678_v26  ;;  %3940 = vmatpush1.bf16.msra.mxu1 %v3939_v27  ;;  %v1796_v27 = vld [vmem:[#allocation8 + $0x3a8] sm:$0xff] }
 0x195   :  { %3942 = vmatprep.subr.bf16.mxu1 %v3941_v29  ;;  %v1655_v54 = vmax.f32 %v5006_v35, 0.0  ;;  %v3955_v29 = vpack.c.bf16 %v329_v22, %v317_v57  ;;  %v366_v36 = vld [vmem:[#allocation5 + $0x898] sm:$0xff]  ;;  %v1818_v22 = vld [vmem:[#allocation8 + $0x458] sm:$0xff] }
 0x196   :  { %v1656_v48 = vmax.f32 %v5008_v39, 0.0  ;;  %v880_v49 = vpop.f32.mrb[2].mxu1  ;;  %v1846_v35 = vld [vmem:[#allocation8 + $0x538] sm:$0xff] }
 0x197   :  { %v5012_v55 = vadd.f32 %v880_v49, %v674_v2  ;;  %v882_v58 = vpop.f32.mrb[3].mxu1  ;;  %v4089_v2 = vpack.c.bf16 %v1797_v18, %v1794_v17  ;;  %v3961_v49 = vpack.c.bf16 %v378_v37, %v366_v36  ;;  %v1811_v17 = vld [vmem:[#allocation8 + $0x420] sm:$0xff]  ;;  %v1814_v18 = vld [vmem:[#allocation8 + $0x438] sm:$0xff]  ;;  %v1824_v36 = vld [vmem:[#allocation8 + $0x488] sm:$0xff] }
 0x198   :  { %v5014_v0 = vadd.f32 %v882_v58, %v678_v26  ;;  %3944 = vmatpush1.bf16.msra.mxu1 %v3943_v40  ;;  %2336 = vmatprep.mubr.f32.mxu0 %v1656_v48  ;;  %v1793_v26 = vld [vmem:[#allocation8 + $0x390] sm:$0xff]  ;;  %v4093_v40 = vpack.c.bf16 %v1803_v31, %v1800_v30  ;;  %v4103_v30 = vpack.c.bf16 %v1814_v18, %v1811_v17  ;;  %v1827_v37 = vld [vmem:[#allocation8 + $0x4a0] sm:$0xff] }
 0x199   :  { %2337 = vmatmul.mubr.f32.vlgmr.msra.gmra.mrb[8].mxu0 %v1655_v54  ;;  %3946 = vmatprep.subr.bf16.mxu1 %v3945_v44  ;;  %v1667_v11 = vmax.f32 %v5012_v55, 0.0  ;;  %v4091_v38 = vpack.c.bf16 %v1796_v27, %v1793_v26  ;;  %v3959_v44 = vpack.c.bf16 %v353_v34, %v341_v33  ;;  %v402_v58 = vld [vmem:[#allocation5 + $0x9b8] sm:$0xff]  ;;  %v425_v26 = vld [vmem:[#allocation5 + $0xa70] sm:$0xff]  ;;  %v4105_v31 = vpack.c.bf16 %v1821_v23, %v1818_v22 }
 0x19a   :  { %v1668_v7 = vmax.f32 %v5014_v0, 0.0  ;;  %4080 = vmatpush1.bf16.msra.mxu0 %v4079_v28  ;;  %v390_v28 = vld [vmem:[#allocation5 + $0x958] sm:$0xff]  ;;  %v4109_v46 = vpack.c.bf16 %v1827_v37, %v1824_v36  ;;  %v497_v17 = vld [vmem:[#allocation5 + $0xcb0] sm:$0xff]  ;;  %v1898_v0 = vld [vmem:[#allocation8 + $0x6d8] sm:$0xff] }
 0x19b   :  { %4082 = vmatprep.subr.bf16.mxu0 %v4081_v59  ;;  %v4095_v59 = vpack.c.bf16 %v1802_v43, %v1799_v42  ;;  %v3965_v8 = vpack.c.bf16 %v402_v58, %v390_v28  ;;  %v438_v27 = vld [vmem:[#allocation5 + $0xad8] sm:$0xff]  ;;  %v449_v42 = vld [vmem:[#allocation5 + $0xb30] sm:$0xff]  ;;  %v1830_v28 = vld [vmem:[#allocation8 + $0x4b8] sm:$0xff] }
 0x19c   :  { %3948 = vmatpush1.bf16.msra.mxu1 %v3947_v1  ;;  %2342 = vmatprep.mubr.f32.mxu0 %v1668_v7  ;;  %v1805_v1 = vld [vmem:[#allocation8 + $0x3f0] sm:$0xff]  ;;  %v1820_v33 = vld [vmem:[#allocation8 + $0x468] sm:$0xff] }
 0x19d   :  { %2343 = vmatmul.mubr.f32.gmra.mrb[10].mxu0 %v1667_v11  ;;  %3950 = vmatprep.subr.bf16.mxu1 %v3949_v4  ;;  %v4099_v14 = vpack.c.bf16 %v1808_v12, %v1805_v1  ;;  %v462_v43 = vld [vmem:[#allocation5 + $0xb98] sm:$0xff]  ;;  %v473_v1 = vld [vmem:[#allocation5 + $0xbf0] sm:$0xff] }
 0x19e   :  { %4084 = vmatpush1.bf16.msra.mxu0 %v4083_v10  ;;  %v401_v10 = vld [vmem:[#allocation5 + $0x9b0] sm:$0xff]  ;;  %v1833_v58 = vld [vmem:[#allocation8 + $0x4d0] sm:$0xff] }
 0x19f   :  { %4086 = vmatprep.subr.bf16.mxu0 %v4085_v56  ;;  %v414_v56 = vld [vmem:[#allocation5 + $0xa18] sm:$0xff]  ;;  %v3967_v57 = vpack.c.bf16 %v401_v10, %v389_v9 }
 0x1a0   :  { %3952 = vmatpush1.bf16.msra.mxu1 %v3951_v16  ;;  %v5026_v60 = vpop.f32.mrb[0].mxu0  ;;  %v4101_v16 = vpack.c.bf16 %v1815_v6, %v1812_v41  ;;  %v486_v12 = vld [vmem:[#allocation5 + $0xc58] sm:$0xff]  ;;  %v4113_v6 = vpack.c.bf16 %v1833_v58, %v1830_v28 }
 0x1a1   :  { %3954 = vmatprep.subr.bf16.mxu1 %v3953_v52  ;;  %v5028_v4 = vpop.f32.mrb[1].mxu0  ;;  %v1832_v9 = vld [vmem:[#allocation8 + $0x4c8] sm:$0xff] }
 0x1a2   :  { %4088 = vmatpush1.bf16.msra.mxu0 %v4087_v25  ;;  %v3969_v25 = vpack.c.bf16 %v426_v50, %v414_v56  ;;  %v1836_v56 = vld [vmem:[#allocation8 + $0x4e8] sm:$0xff]  ;;  %v1839_v50 = vld [vmem:[#allocation8 + $0x500] sm:$0xff] }
 0x1a3   :  { %4090 = vmatprep.subr.bf16.mxu0 %v4089_v2  ;;  %v413_v2 = vld [vmem:[#allocation5 + $0xa10] sm:$0xff]  ;;  %v510_v18 = vld [vmem:[#allocation5 + $0xd18] sm:$0xff]  ;;  %v4117_v23 = vpack.c.bf16 %v1839_v50, %v1836_v56 }
 0x1a4   :  { %3956 = vmatpush1.bf16.msra.mxu1 %v3955_v29  ;;  %v5030_v52 = vpop.f32.mrb[2].mxu0  ;;  %v450_v29 = vld [vmem:[#allocation5 + $0xb38] sm:$0xff]  ;;  %v3971_v34 = vpack.c.bf16 %v425_v26, %v413_v2  ;;  %v1838_v2 = vld [vmem:[#allocation8 + $0x4f8] sm:$0xff] }
 0x1a5   :  { %3958 = vmatprep.subr.bf16.mxu1 %v3957_v32  ;;  %v5032_v24 = vpop.f32.mrb[3].mxu0  ;;  %v1817_v32 = vld [vmem:[#allocation8 + $0x450] sm:$0xff]  ;;  %v1852_v55 = vld [vmem:[#allocation8 + $0x568] sm:$0xff] }
 0x1a6   :  { %4092 = vmatpush1.bf16.msra.mxu0 %v4091_v38  ;;  %v3973_v38 = vpack.c.bf16 %v450_v29, %v438_v27  ;;  %v4107_v45 = vpack.c.bf16 %v1820_v33, %v1817_v32  ;;  %v1842_v27 = vld [vmem:[#allocation8 + $0x518] sm:$0xff]  ;;  %v1845_v29 = vld [vmem:[#allocation8 + $0x530] sm:$0xff]  ;;  %v521_v32 = vld [vmem:[#allocation5 + $0xd70] sm:$0xff] }
 0x1a7   :  { %4094 = vmatprep.subr.bf16.mxu0 %v4093_v40  ;;  %v437_v40 = vld [vmem:[#allocation5 + $0xad0] sm:$0xff]  ;;  %v534_v33 = vld [vmem:[#allocation5 + $0xdd8] sm:$0xff]  ;;  %v4121_v37 = vpack.c.bf16 %v1845_v29, %v1842_v27 }
 0x1a8   :  { %3960 = vmatpush1.bf16.msra.mxu1 %v3959_v44  ;;  %v474_v44 = vld [vmem:[#allocation5 + $0xbf8] sm:$0xff]  ;;  %v3975_v53 = vpack.c.bf16 %v449_v42, %v437_v40  ;;  %v1859_v29 = vld [vmem:[#allocation8 + $0x5a0] sm:$0xff] }
 0x1a9   :  { %3962 = vmatprep.subr.bf16.mxu1 %v3961_v49  ;;  %v1823_v49 = vld [vmem:[#allocation8 + $0x480] sm:$0xff]  ;;  %v1844_v40 = vld [vmem:[#allocation8 + $0x528] sm:$0xff]  ;;  %v1853_v50 = vld [vmem:[#allocation8 + $0x570] sm:$0xff] }
 0x1aa   :  { %4096 = vmatpush1.bf16.msra.mxu0 %v4095_v59  ;;  %v3977_v59 = vpack.c.bf16 %v474_v44, %v462_v43  ;;  %v4111_v41 = vpack.c.bf16 %v1826_v51, %v1823_v49  ;;  %v4678_v43 = vld [vmem:[#allocation2 + $0x20] sm:$0xff]  ;;  %v570_v28 = vld [vmem:[#allocation5 + $0xef8] sm:$0xff] }
 0x1ab   :  { %4098 = vmatprep.subr.bf16.mxu0 %v4097_v62  ;;  %v461_v62 = vld [vmem:[#allocation5 + $0xb90] sm:$0xff] }
 0x1ac   :  { %3964 = vmatpush1.bf16.msra.mxu1 %v3963_v3  ;;  %v498_v3 = vld [vmem:[#allocation5 + $0xcb8] sm:$0xff]  ;;  %v3979_v10 = vpack.c.bf16 %v473_v1, %v461_v62  ;;  %v533_v49 = vld [vmem:[#allocation5 + $0xdd0] sm:$0xff]  ;;  %v1850_v62 = vld [vmem:[#allocation8 + $0x558] sm:$0xff] }
 0x1ad   :  { %3966 = vmatprep.subr.bf16.mxu1 %v3965_v8  ;;  %v1829_v8 = vld [vmem:[#allocation8 + $0x4b0] sm:$0xff]  ;;  %v1848_v44 = vld [vmem:[#allocation8 + $0x548] sm:$0xff] }
 0x1ae   :  { %4100 = vmatpush1.bf16.msra.mxu0 %v4099_v14  ;;  %v3981_v14 = vpack.c.bf16 %v498_v3, %v486_v12  ;;  %v4115_v22 = vpack.c.bf16 %v1832_v9, %v1829_v8  ;;  %v545_v51 = vld [vmem:[#allocation5 + $0xe30] sm:$0xff]  ;;  %v1854_v12 = vld [vmem:[#allocation8 + $0x578] sm:$0xff]  ;;  %v1857_v3 = vld [vmem:[#allocation8 + $0x590] sm:$0xff] }
 0x1af   :  { %4102 = vmatprep.subr.bf16.mxu0 %v4101_v16  ;;  %v485_v16 = vld [vmem:[#allocation5 + $0xc50] sm:$0xff]  ;;  %v3991_v1 = vpack.c.bf16 %v545_v51, %v533_v49  ;;  %v582_v9 = vld [vmem:[#allocation5 + $0xf58] sm:$0xff] }
 0x1b0   :  { %3968 = vmatpush1.bf16.msra.mxu1 %v3967_v57  ;;  %v522_v57 = vld [vmem:[#allocation5 + $0xd78] sm:$0xff]  ;;  %v3983_v26 = vpack.c.bf16 %v497_v17, %v485_v16  ;;  %v569_v8 = vld [vmem:[#allocation5 + $0xef0] sm:$0xff] }
 0x1b1   :  { %3970 = vmatprep.subr.bf16.mxu1 %v3969_v25  ;;  %v1835_v25 = vld [vmem:[#allocation8 + $0x4e0] sm:$0xff]  ;;  %v1860_v17 = vld [vmem:[#allocation8 + $0x5a8] sm:$0xff] }
 0x1b2   :  { %4104 = vmatpush1.bf16.msra.mxu0 %v4103_v30  ;;  %v3985_v30 = vpack.c.bf16 %v522_v57, %v510_v18  ;;  %v4119_v36 = vpack.c.bf16 %v1838_v2, %v1835_v25  ;;  %v1863_v18 = vld [vmem:[#allocation8 + $0x5c0] sm:$0xff]  ;;  %v606_v25 = vld [vmem:[#allocation5 + $0x1018] sm:$0xff] }
 0x1b3   :  { %4106 = vmatprep.subr.bf16.mxu0 %v4105_v31  ;;  %v509_v31 = vld [vmem:[#allocation5 + $0xd10] sm:$0xff]  ;;  %v618_v2 = vld [vmem:[#allocation5 + $0x1078] sm:$0xff]  ;;  %v4133_v27 = vpack.c.bf16 %v1863_v18, %v1860_v17 }
 0x1b4   :  { %3972 = vmatpush1.bf16.msra.mxu1 %v3971_v34  ;;  %v546_v34 = vld [vmem:[#allocation5 + $0xe38] sm:$0xff]  ;;  %v3987_v42 = vpack.c.bf16 %v521_v32, %v509_v31  ;;  %v1866_v32 = vld [vmem:[#allocation8 + $0x5d8] sm:$0xff]  ;;  %v1875_v51 = vld [vmem:[#allocation8 + $0x620] sm:$0xff] }
 0x1b5   :  { %3974 = vmatprep.subr.bf16.mxu1 %v3973_v38  ;;  %v1841_v38 = vld [vmem:[#allocation8 + $0x510] sm:$0xff]  ;;  %v1872_v49 = vld [vmem:[#allocation8 + $0x608] sm:$0xff] }
 0x1b6   :  { %4108 = vmatpush1.bf16.msra.mxu0 %v4107_v45  ;;  %v1851_v45 = vld [vmem:[#allocation8 + $0x560] sm:$0xff]  ;;  %v4123_v58 = vpack.c.bf16 %v1844_v40, %v1841_v38  ;;  %v630_v38 = vld [vmem:[#allocation5 + $0x10d8] sm:$0xff] }
 0x1b7   :  { %4110 = vmatprep.subr.bf16.mxu0 %v4109_v46  ;;  %v3989_v46 = vpack.c.bf16 %v546_v34, %v534_v33  ;;  %v1869_v33 = vld [vmem:[#allocation8 + $0x5f0] sm:$0xff]  ;;  %v4001_v34 = vpack.c.bf16 %v618_v2, %v606_v25  ;;  %v1744_v25 = vld [vmem:[#allocation8 + $0x208] sm:$0xff] }
 0x1b8   :  { %3976 = vmatpush1.bf16.msra.mxu1 %v3975_v53  ;;  %v558_v53 = vld [vmem:[#allocation5 + $0xe98] sm:$0xff] }
 0x1b9   :  { %3978 = vmatprep.subr.bf16.mxu1 %v3977_v59  ;;  %v1847_v59 = vld [vmem:[#allocation8 + $0x540] sm:$0xff]  ;;  %v642_v40 = vld [vmem:[#allocation5 + $0x1138] sm:$0xff] }
 0x1ba   :  { %4112 = vmatpush1.bf16.msra.mxu0 %v4111_v41  ;;  %v3993_v41 = vpack.c.bf16 %v570_v28, %v558_v53  ;;  %v4127_v56 = vpack.c.bf16 %v1850_v62, %v1847_v59  ;;  %v4005_v53 = vpack.c.bf16 %v642_v40, %v630_v38  ;;  %v629_v28 = vld [vmem:[#allocation5 + $0x10d0] sm:$0xff]  ;;  %v666_v59 = vld [vmem:[#allocation5 + $0x11f8] sm:$0xff] }
 0x1bb   :  { %4114 = vmatprep.subr.bf16.mxu0 %v4113_v6  ;;  %v557_v6 = vld [vmem:[#allocation5 + $0xe90] sm:$0xff]  ;;  %v1705_v40 = vld [vmem:[#allocation8 + $0xd0] sm:$0xff] }
 0x1bc   :  { %3980 = vmatpush1.bf16.msra.mxu1 %v3979_v10  ;;  %v594_v10 = vld [vmem:[#allocation5 + $0xfb8] sm:$0xff]  ;;  %v3995_v16 = vpack.c.bf16 %v569_v8, %v557_v6  ;;  %v665_v6 = vld [vmem:[#allocation5 + $0x11f0] sm:$0xff] }
 0x1bd   :  { %3982 = vmatprep.subr.bf16.mxu1 %v3981_v14  ;;  %v1856_v14 = vld [vmem:[#allocation8 + $0x588] sm:$0xff]  ;;  %v3997_v57 = vpack.c.bf16 %v594_v10, %v582_v9  ;;  %v1729_v8 = vld [vmem:[#allocation8 + $0x190] sm:$0xff] }
 0x1be   :  { %4116 = vmatpush1.bf16.msra.mxu0 %v4115_v22  ;;  %v581_v22 = vld [vmem:[#allocation5 + $0xf50] sm:$0xff] }
 0x1bf   :  { %1566 = vmatmul.mubr.f32.vlgmr.msra.gmra.mrb[12].mxu1 %v4976_v47  ;;  %4118 = vmatprep.subr.bf16.mxu0 %v4117_v23  ;;  %v4125_v47 = vpack.c.bf16 %v1851_v45, %v1848_v44  ;;  %v593_v23 = vld [vmem:[#allocation5 + $0xfb0] sm:$0xff]  ;;  %v1865_v44 = vld [vmem:[#allocation8 + $0x5d0] sm:$0xff] }
 0x1c0   :  { %3984 = vmatpush1.bf16.msra.mxu1 %v3983_v26  ;;  %1571 = vmatprep.mubr.f32.mxu1 %v4678_v43  ;;  %v4131_v26 = vpack.c.bf16 %v1856_v14, %v1853_v50  ;;  %v3999_v31 = vpack.c.bf16 %v593_v23, %v581_v22  ;;  %v4137_v43 = vpack.c.bf16 %v1869_v33, %v1866_v32  ;;  %v1868_v45 = vld [vmem:[#allocation8 + $0x5e8] sm:$0xff]  ;;  %v1735_v14 = vld [vmem:[#allocation8 + $0x1c0] sm:$0xff]  ;;  %v1690_v22 = vld [vmem:[#allocation8 + $0x58] sm:$0xff] }
 0x1c1   :  { %3986 = vmatprep.subr.bf16.mxu1 %v3985_v30  ;;  %v1862_v30 = vld [vmem:[#allocation8 + $0x5b8] sm:$0xff]  ;;  %v4139_v62 = vpack.c.bf16 %v1868_v45, %v1865_v44  ;;  %v1732_v9 = vld [vmem:[#allocation8 + $0x1a8] sm:$0xff]  ;;  %v1741_v23 = vld [vmem:[#allocation8 + $0x1f0] sm:$0xff] }
 0x1c2   :  { %4120 = vmatpush1.bf16.msra.mxu0 %v4119_v36  ;;  %v605_v36 = vld [vmem:[#allocation5 + $0x1010] sm:$0xff]  ;;  %v1762_v44 = vld [vmem:[#allocation8 + $0x298] sm:$0xff] }
 0x1c3   :  { %1572 = vmatmul.mubr.f32.gmra.mrb[14].mxu1 %v4980_v63  ;;  %4122 = vmatprep.subr.bf16.mxu0 %v4121_v37  ;;  %v4129_v63 = vpack.c.bf16 %v1857_v3, %v1854_v12  ;;  %v617_v37 = vld [vmem:[#allocation5 + $0x1070] sm:$0xff] }
 0x1c4   :  { %3988 = vmatpush1.bf16.msra.mxu1 %v3987_v42  ;;  %1642 = vmatprep.mubr.f32.mxu1 %v4829_v15  ;;  %v4135_v42 = vpack.c.bf16 %v1862_v30, %v1859_v29  ;;  %v1684_v50 = vld [vmem:[#allocation8 + $0x28] sm:$0xff]  ;;  %v1747_v30 = vld [vmem:[#allocation8 + $0x220] sm:$0xff] }
 0x1c5   :  { %3990 = vmatprep.subr.bf16.mxu1 %v3989_v46  ;;  %v4003_v46 = vpack.c.bf16 %v617_v37, %v605_v36  ;;  %v1696_v29 = vld [vmem:[#allocation8 + $0x88] sm:$0xff]  ;;  %v1753_v36 = vld [vmem:[#allocation8 + $0x250] sm:$0xff] }
 0x1c6   :  { %4124 = vmatpush1.bf16.msra.mxu0 %v4123_v58  ;;  %v641_v58 = vld [vmem:[#allocation5 + $0x1130] sm:$0xff] }
 0x1c7   :  { %4126 = vmatprep.subr.bf16.mxu0 %v4125_v47  ;;  %v654_v47 = vld [vmem:[#allocation5 + $0x1198] sm:$0xff]  ;;  %v4007_v12 = vpack.c.bf16 %v641_v58, %v629_v28  ;;  %v693_v58 = vsub.s32 5, %v4992_v13 }
 0x1c8   :  { %3992 = vmatpush1.bf16.msra.mxu1 %v3991_v1  ;;  %v4141_v1 = vpack.c.bf16 %v1875_v51, %v1872_v49  ;;  %v4009_v3 = vpack.c.bf16 %v666_v59, %v654_v47  ;;  %v1714_v49 = vld [vmem:[#allocation8 + $0x118] sm:$0xff]  ;;  %v1765_v51 = vld [vmem:[#allocation8 + $0x2b0] sm:$0xff] }
 0x1c9   :  { %3994 = vmatprep.subr.bf16.mxu1 %v3993_v41  ;;  %v653_v41 = vld [vmem:[#allocation5 + $0x1190] sm:$0xff] }
 0x1ca   :  { %4128 = vmatpush1.bf16.msra.mxu0 %v4127_v56  ;;  %v4011_v10 = vpack.c.bf16 %v665_v6, %v653_v41  ;;  %v4397_v56 = vpack.c.bf16 %v1732_v9, %v1729_v8  ;;  %v1771_v41 = vld [vmem:[#allocation8 + $0x2e0] sm:$0xff]  ;;  %v1774_v6 = vld [vmem:[#allocation8 + $0x2f8] sm:$0xff] }
 0x1cb   :  { %4130 = vmatprep.subr.bf16.mxu0 %v4129_v63  ;;  %v1681_v63 = vld [vmem:[#allocation8 + $0x10] sm:$0xff] }
 0x1cc   :  { %3996 = vmatpush1.bf16.msra.mxu1 %v3995_v16  ;;  %v1738_v16 = vld [vmem:[#allocation8 + $0x1d8] sm:$0xff]  ;;  %v4399_v17 = vpack.c.bf16 %v1684_v50, %v1681_v63  ;;  %v5055_v63 = vrot.slane %v4997_v20, %v693_v58 }
 0x1cd   :  { %3998 = vmatprep.subr.bf16.mxu1 %v3997_v57  ;;  %v4401_v18 = vpack.c.bf16 %v1738_v16, %v1735_v14  ;;  %v1687_v57 = vld [vmem:[#allocation8 + $0x40] sm:$0xff]  ;;  %v1878_v16 = vld [vmem:[#allocation8 + $0x638] sm:$0xff] }
 0x1ce   :  { %4132 = vmatpush1.bf16.msra.mxu0 %v4131_v26  ;;  %v4403_v2 = vpack.c.bf16 %v1690_v22, %v1687_v57  ;;  %v4405_v26 = vpack.c.bf16 %v1744_v25, %v1741_v23  ;;  %v1723_v57 = vld [vmem:[#allocation8 + $0x160] sm:$0xff]  ;;  %v1726_v22 = vld [vmem:[#allocation8 + $0x178] sm:$0xff] }
 0x1cf   :  { %4134 = vmatprep.subr.bf16.mxu0 %v4133_v27  ;;  %v1693_v27 = vld [vmem:[#allocation8 + $0x70] sm:$0xff]  ;;  %v1890_v58 = vld [vmem:[#allocation8 + $0x698] sm:$0xff] }
 0x1d0   :  { %4000 = vmatpush1.bf16.msra.mxu1 %v3999_v31  ;;  %v1750_v31 = vld [vmem:[#allocation8 + $0x238] sm:$0xff]  ;;  %v4407_v32 = vpack.c.bf16 %v1696_v29, %v1693_v27  ;;  %v1828_v27 = vld [vmem:[#allocation8 + $0x4a8] sm:$0xff] }
 0x1d1   :  { %4002 = vmatprep.subr.bf16.mxu1 %v4001_v34  ;;  %v4409_v33 = vpack.c.bf16 %v1750_v31, %v1747_v30  ;;  %v1702_v34 = vld [vmem:[#allocation8 + $0xb8] sm:$0xff] }
 0x1d2   :  { %4136 = vmatpush1.bf16.msra.mxu0 %v4135_v42  ;;  %v1708_v42 = vld [vmem:[#allocation8 + $0xe8] sm:$0xff] }
 0x1d3   :  { %4138 = vmatprep.subr.bf16.mxu0 %v4137_v43  ;;  %v1759_v43 = vld [vmem:[#allocation8 + $0x280] sm:$0xff]  ;;  %v4415_v39 = vpack.c.bf16 %v1708_v42, %v1705_v40  ;;  %v1777_v40 = vld [vmem:[#allocation8 + $0x310] sm:$0xff]  ;;  %v1780_v42 = vld [vmem:[#allocation8 + $0x328] sm:$0xff] }
 0x1d4   :  { %4004 = vmatpush1.bf16.msra.mxu1 %v4003_v46  ;;  %v4417_v45 = vpack.c.bf16 %v1762_v44, %v1759_v43  ;;  %v1711_v46 = vld [vmem:[#allocation8 + $0x100] sm:$0xff] }
 0x1d5   :  { %4006 = vmatprep.subr.bf16.mxu1 %v4005_v53  ;;  %v1768_v53 = vld [vmem:[#allocation8 + $0x2c8] sm:$0xff]  ;;  %v4419_v59 = vpack.c.bf16 %v1714_v49, %v1711_v46  ;;  %v1831_v44 = vld [vmem:[#allocation8 + $0x4c0] sm:$0xff] }
 0x1d6   :  { %4140 = vmatpush1.bf16.msra.mxu0 %v4139_v62  ;;  %v4421_v62 = vpack.c.bf16 %v1768_v53, %v1765_v51  ;;  %v1883_v49 = vld [vmem:[#allocation8 + $0x660] sm:$0xff]  ;;  %v1886_v51 = vld [vmem:[#allocation8 + $0x678] sm:$0xff] }
 0x1d7   :  { %4142 = vmatprep.subr.bf16.mxu0 %v4141_v1  ;;  %v1717_v1 = vld [vmem:[#allocation8 + $0x130] sm:$0xff] }
 0x1d8   :  { %4008 = vmatpush1.bf16.msra.mxu1 %v4007_v12  ;;  %v1720_v12 = vld [vmem:[#allocation8 + $0x148] sm:$0xff] }
 0x1d9   :  { %4010 = vmatprep.subr.bf16.mxu1 %v4009_v3  ;;  %v4423_v14 = vpack.c.bf16 %v1720_v12, %v1717_v1  ;;  %v1786_v1 = vld [vmem:[#allocation8 + $0x358] sm:$0xff]  ;;  %v4151_v12 = vpack.c.bf16 %v1886_v51, %v1883_v49  ;;  %v1855_v49 = vld [vmem:[#allocation8 + $0x580] sm:$0xff] }
 0x1da   :  { %v1858_v51 = vld [vmem:[#allocation8 + $0x598] sm:$0xff] }
 0x1dc   :  { %4012 = vmatpush1.bf16.msra.mxu1 %v4011_v10  ;;  %v1871_v10 = vld [vmem:[#allocation8 + $0x600] sm:$0xff] }
 0x1dd   :  { %4398 = vmatprep.subr.bf16.mxu1 %v4397_v56  ;;  %v1874_v56 = vld [vmem:[#allocation8 + $0x618] sm:$0xff] }
 0x1df   :  { %1643 = vmatmul.mubr.f32.vlgmr.msra.gmra.mrb[12].mxu1 %v4984_v61  ;;  %v1699_v61 = vld [vmem:[#allocation8 + $0xa0] sm:$0xff] }
 0x1e0   :  { %4400 = vmatpush3.bf16.msra.mxu1 %v4399_v17  ;;  %1648 = vmatprep.mubr.f32.mxu1 %v4829_v15  ;;  %v1756_v15 = vld [vmem:[#allocation8 + $0x268] sm:$0xff]  ;;  %v4411_v37 = vpack.c.bf16 %v1702_v34, %v1699_v61  ;;  %v1881_v17 = vld [vmem:[#allocation8 + $0x650] sm:$0xff]  ;;  %v5065_v61 = vadd.f32 %v5028_v4, %v5055_v63 }
 0x1e1   :  { %4402 = vmatprep.subr.bf16.mxu1 %v4401_v18  ;;  %v4413_v38 = vpack.c.bf16 %v1756_v15, %v1753_v36  ;;  %v4425_v18 = vpack.c.bf16 %v1774_v6, %v1771_v41  ;;  %v4145_v31 = vpack.c.bf16 %v1881_v17, %v1878_v16  ;;  %v4427_v36 = vpack.c.bf16 %v1726_v22, %v1723_v57  ;;  %v1884_v15 = vld [vmem:[#allocation8 + $0x668] sm:$0xff]  ;;  %v1899_v16 = vld [vmem:[#allocation8 + $0x6e0] sm:$0xff] }
 0x1e2   :  { %v1660_v53 = vmax.f32 %v5065_v61, 0.0  ;;  %v1840_v41 = vld [vmem:[#allocation8 + $0x508] sm:$0xff]  ;;  %v1959_v61 = vld [vmem:[#allocation8 + $0x8c0] sm:$0xff] }
 0x1e3   :  { %1649 = vmatmul.mubr.f32.gmra.mrb[14].mxu1 %v4988_v5  ;;  %v5043_v5 = vsub.s32 2, %v4992_v13  ;;  %v1792_v57 = vld [vmem:[#allocation8 + $0x388] sm:$0xff] }
 0x1e4   :  { %4404 = vmatpush3.bf16.msra.mxu1 %v4403_v2  ;;  %2798 = vmatprep.mubr.f32.mxu1 %v1656_v48  ;;  %v685_v48 = vsub.s32 3, %v4992_v13  ;;  %v4143_v2 = vpack.c.bf16 %v1874_v56, %v1871_v10  ;;  %v1892_v10 = vld [vmem:[#allocation8 + $0x6a8] sm:$0xff] }
 0x1e5   :  { %4406 = vmatprep.subr.bf16.mxu1 %v4405_v26  ;;  %v682_v28 = vrot.slane %v4997_v20, %v5043_v5  ;;  %v1825_v26 = vld [vmem:[#allocation8 + $0x490] sm:$0xff] }
 0x1e6   :  { %v686_v47 = vrot.slane %v4997_v20, %v685_v48 }
 0x1e8   :  { %4408 = vmatpush3.bf16.msra.mxu1 %v4407_v32  ;;  %v1877_v32 = vld [vmem:[#allocation8 + $0x630] sm:$0xff] }
 0x1e9   :  { %4410 = vmatprep.subr.bf16.mxu1 %v4409_v33  ;;  %v1880_v33 = vld [vmem:[#allocation8 + $0x648] sm:$0xff] }
 0x1ea   :  { %v4147_v4 = vpack.c.bf16 %v1880_v33, %v1877_v32  ;;  %v1798_v32 = vld [vmem:[#allocation8 + $0x3b8] sm:$0xff] }
 0x1ec   :  { %4412 = vmatpush3.bf16.msra.mxu1 %v4411_v37  ;;  %v1887_v37 = vld [vmem:[#allocation8 + $0x680] sm:$0xff] }
 0x1ed   :  { %4414 = vmatprep.subr.bf16.mxu1 %v4413_v38  ;;  %v4429_v38 = vpack.c.bf16 %v1828_v27, %v1825_v26  ;;  %v4149_v46 = vpack.c.bf16 %v1887_v37, %v1884_v15  ;;  %v1902_v26 = vld [vmem:[#allocation8 + $0x6f8] sm:$0xff]  ;;  %v1905_v27 = vld [vmem:[#allocation8 + $0x710] sm:$0xff]  ;;  %v1904_v37 = vld [vmem:[#allocation8 + $0x708] sm:$0xff] }
 0x1ee   :  { %v1901_v15 = vld [vmem:[#allocation8 + $0x6f0] sm:$0xff] }
 0x1f0   :  { %4416 = vmatpush3.bf16.msra.mxu1 %v4415_v39  ;;  %v1834_v39 = vld [vmem:[#allocation8 + $0x4d8] sm:$0xff] }
 0x1f1   :  { %4418 = vmatprep.subr.bf16.mxu1 %v4417_v45 }
 0x1f2   :  { %v1028_v3 = vpop.f32.mrb[4].mxu1 }
 0x1f3   :  { %v5052_v8 = vadd.f32 %v1028_v3, %v682_v28  ;;  %v1030_v9 = vpop.f32.mrb[5].mxu1  ;;  %v1837_v3 = vld [vmem:[#allocation8 + $0x4f0] sm:$0xff] }
 0x1f4   :  { %v5057_v50 = vadd.f32 %v1030_v9, %v686_v47  ;;  %4420 = vmatpush3.bf16.msra.mxu1 %v4419_v59  ;;  %v4433_v59 = vpack.c.bf16 %v1834_v39, %v1831_v44  ;;  %v1889_v9 = vld [vmem:[#allocation8 + $0x690] sm:$0xff]  ;;  %v4437_v17 = vpack.c.bf16 %v1840_v41, %v1837_v3  ;;  %v1804_v39 = vld [vmem:[#allocation8 + $0x3e8] sm:$0xff]  ;;  %v4449_v41 = vpack.c.bf16 %v1858_v51, %v1855_v49  ;;  %v1935_v49 = vld [vmem:[#allocation8 + $0x800] sm:$0xff] }
 0x1f5   :  { %4422 = vmatprep.subr.bf16.mxu1 %v4421_v62  ;;  %v1657_v29 = vmax.f32 %v5052_v8, 0.0  ;;  %v1783_v62 = vld [vmem:[#allocation8 + $0x340] sm:$0xff]  ;;  %v4155_v22 = vpack.c.bf16 %v1892_v10, %v1889_v9  ;;  %v1801_v44 = vld [vmem:[#allocation8 + $0x3d0] sm:$0xff]  ;;  %v1810_v9 = vld [vmem:[#allocation8 + $0x418] sm:$0xff] }
 0x1f6   :  { %v1658_v23 = vmax.f32 %v5057_v50, 0.0  ;;  %v1034_v25 = vpop.f32.mrb[6].mxu1  ;;  %v4435_v56 = vpack.c.bf16 %v1786_v1, %v1783_v62  ;;  %v4447_v62 = vpack.c.bf16 %v1804_v39, %v1801_v44  ;;  %v1914_v1 = vld [vmem:[#allocation8 + $0x758] sm:$0xff]  ;;  %v1928_v44 = vld [vmem:[#allocation8 + $0x7c8] sm:$0xff] }
 0x1f7   :  { %v5061_v20 = vadd.f32 %v1034_v25, %v682_v28  ;;  %v1036_v30 = vpop.f32.mrb[7].mxu1  ;;  %v4431_v28 = vpack.c.bf16 %v1780_v42, %v1777_v40  ;;  %v1843_v25 = vld [vmem:[#allocation8 + $0x520] sm:$0xff]  ;;  %v1942_v8 = vld [vmem:[#allocation8 + $0x838] sm:$0xff] }
 0x1f8   :  { %v5067_v34 = vadd.f32 %v1036_v30, %v686_v47  ;;  %2413 = vmatprep.mubr.f32.mxu0 %v1658_v23  ;;  %4424 = vmatpush3.bf16.msra.mxu1 %v4423_v14  ;;  %v1893_v47 = vld [vmem:[#allocation8 + $0x6b0] sm:$0xff]  ;;  %v1896_v14 = vld [vmem:[#allocation8 + $0x6c8] sm:$0xff]  ;;  %v4441_v30 = vpack.c.bf16 %v1846_v35, %v1843_v25  ;;  %v1911_v40 = vld [vmem:[#allocation8 + $0x740] sm:$0xff] }
 0x1f9   :  { %2414 = vmatmul.mubr.f32.vlgmr.msra.gmra.mrb[8].mxu0 %v1657_v29  ;;  %4426 = vmatprep.subr.bf16.mxu1 %v4425_v18  ;;  %v1669_v45 = vmax.f32 %v5061_v20, 0.0  ;;  %v4153_v6 = vpack.c.bf16 %v1893_v47, %v1890_v58  ;;  %v1789_v18 = vld [vmem:[#allocation8 + $0x370] sm:$0xff]  ;;  %v1907_v58 = vld [vmem:[#allocation8 + $0x720] sm:$0xff]  ;;  %v1910_v47 = vld [vmem:[#allocation8 + $0x738] sm:$0xff] }
 0x1fa   :  { %v1670_v43 = vmax.f32 %v5067_v34, 0.0  ;;  %4144 = vmatpush1.bf16.msra.mxu0 %v4143_v2  ;;  %v1895_v2 = vld [vmem:[#allocation8 + $0x6c0] sm:$0xff]  ;;  %v4167_v10 = vpack.c.bf16 %v1910_v47, %v1907_v58  ;;  %v1876_v58 = vld [vmem:[#allocation8 + $0x628] sm:$0xff]  ;;  %v1946_v34 = vld [vmem:[#allocation8 + $0x858] sm:$0xff] }
 0x1fb   :  { %4146 = vmatprep.subr.bf16.mxu0 %v4145_v31  ;;  %v1795_v31 = vld [vmem:[#allocation8 + $0x3a0] sm:$0xff]  ;;  %v4159_v33 = vpack.c.bf16 %v1898_v0, %v1895_v2  ;;  %v1816_v2 = vld [vmem:[#allocation8 + $0x448] sm:$0xff] }
 0x1fc   :  { %2419 = vmatprep.mubr.f32.mxu0 %v1670_v43  ;;  %4428 = vmatpush3.bf16.msra.mxu1 %v4427_v36  ;;  %v1849_v36 = vld [vmem:[#allocation8 + $0x550] sm:$0xff]  ;;  %v4443_v50 = vpack.c.bf16 %v1798_v32, %v1795_v31  ;;  %v1923_v25 = vld [vmem:[#allocation8 + $0x7a0] sm:$0xff]  ;;  %v1922_v31 = vld [vmem:[#allocation8 + $0x798] sm:$0xff] }
 0x1fd   :  { %2420 = vmatmul.mubr.f32.gmra.mrb[10].mxu0 %v1669_v45  ;;  %4430 = vmatprep.subr.bf16.mxu1 %v4429_v38  ;;  %v1948_v20 = vld [vmem:[#allocation8 + $0x868] sm:$0xff] }
 0x1fe   :  { %4148 = vmatpush1.bf16.msra.mxu0 %v4147_v4  ;;  %2490 = vmatprep.mubr.f32.mxu0 %v1660_v53  ;;  %v4445_v4 = vpack.c.bf16 %v1852_v55, %v1849_v36  ;;  %v1929_v36 = vld [vmem:[#allocation8 + $0x7d0] sm:$0xff] }
 0x1ff   :  { %2799 = vmatmul.mubr.f32.vlgmr.msra.gmra.mrb[16].mxu1 %v1655_v54  ;;  %4150 = vmatprep.subr.bf16.mxu0 %v4149_v46  ;;  %v4157_v54 = vpack.c.bf16 %v1899_v16, %v1896_v14  ;;  %v4163_v46 = vpack.c.bf16 %v1904_v37, %v1901_v15  ;;  %v1864_v14 = vld [vmem:[#allocation8 + $0x5c8] sm:$0xff]  ;;  %v1822_v15 = vld [vmem:[#allocation8 + $0x478] sm:$0xff] }
 0x200   :  { %2803 = vmatprep.mubr.f32.mxu1 %v1668_v7  ;;  %4432 = vmatpush3.bf16.msra.mxu1 %v4431_v28  ;;  %v4439_v7 = vpack.c.bf16 %v1792_v57, %v1789_v18  ;;  %v5090_v38 = vpop.f32.mrb[4].mxu0  ;;  %v1916_v18 = vld [vmem:[#allocation8 + $0x768] sm:$0xff] }
 0x201   :  { %4434 = vmatprep.subr.bf16.mxu1 %v4433_v59  ;;  %v5092_v42 = vpop.f32.mrb[5].mxu0 }
 0x202   :  { %4152 = vmatpush1.bf16.msra.mxu0 %v4151_v12  ;;  %v1917_v12 = vld [vmem:[#allocation8 + $0x770] sm:$0xff] }
 0x203   :  { %2804 = vmatmul.mubr.f32.gmra.mrb[18].mxu1 %v1667_v11  ;;  %4154 = vmatprep.subr.bf16.mxu0 %v4153_v6  ;;  %v4161_v11 = vpack.c.bf16 %v1905_v27, %v1902_v26  ;;  %v1807_v6 = vld [vmem:[#allocation8 + $0x400] sm:$0xff]  ;;  %v4169_v16 = vpack.c.bf16 %v1917_v12, %v1914_v1  ;;  %v1870_v26 = vld [vmem:[#allocation8 + $0x5f8] sm:$0xff] }
 0x204   :  { %4436 = vmatpush3.bf16.msra.mxu1 %v4435_v56  ;;  %2873 = vmatprep.mubr.f32.mxu1 %v1658_v23  ;;  %v1908_v23 = vld [vmem:[#allocation8 + $0x728] sm:$0xff]  ;;  %v5094_v59 = vpop.f32.mrb[6].mxu0  ;;  %v1861_v56 = vld [vmem:[#allocation8 + $0x5b0] sm:$0xff]  ;;  %v4451_v57 = vpack.c.bf16 %v1810_v9, %v1807_v6  ;;  %v1930_v1 = vld [vmem:[#allocation8 + $0x7d8] sm:$0xff] }
 0x205   :  { %4438 = vmatprep.subr.bf16.mxu1 %v4437_v17  ;;  %v4165_v28 = vpack.c.bf16 %v1911_v40, %v1908_v23  ;;  %v5096_v3 = vpop.f32.mrb[7].mxu0  ;;  %v1913_v17 = vld [vmem:[#allocation8 + $0x750] sm:$0xff]  ;;  %v4453_v35 = vpack.c.bf16 %v1864_v14, %v1861_v56  ;;  %v1924_v23 = vld [vmem:[#allocation8 + $0x7a8] sm:$0xff]  ;;  %v1934_v6 = vld [vmem:[#allocation8 + $0x7f8] sm:$0xff] }
 0x206   :  { %4156 = vmatpush1.bf16.msra.mxu0 %v4155_v22  ;;  %v1920_v22 = vld [vmem:[#allocation8 + $0x788] sm:$0xff]  ;;  %v4171_v0 = vpack.c.bf16 %v1916_v18, %v1913_v17  ;;  %v1941_v56 = vld [vmem:[#allocation8 + $0x830] sm:$0xff]  ;;  %v1882_v17 = vld [vmem:[#allocation8 + $0x658] sm:$0xff] }
 0x207   :  { %4158 = vmatprep.subr.bf16.mxu0 %v4157_v54  ;;  %v1813_v54 = vld [vmem:[#allocation8 + $0x430] sm:$0xff]  ;;  %v4173_v27 = vpack.c.bf16 %v1923_v25, %v1920_v22  ;;  %v1936_v22 = vld [vmem:[#allocation8 + $0x808] sm:$0xff] }
 0x208   :  { %4440 = vmatpush3.bf16.msra.mxu1 %v4439_v7  ;;  %v1867_v7 = vld [vmem:[#allocation8 + $0x5e0] sm:$0xff]  ;;  %v4455_v32 = vpack.c.bf16 %v1816_v2, %v1813_v54  ;;  %v1940_v54 = vld [vmem:[#allocation8 + $0x828] sm:$0xff] }
 0x209   :  { %4442 = vmatprep.subr.bf16.mxu1 %v4441_v30  ;;  %v1919_v30 = vld [vmem:[#allocation8 + $0x780] sm:$0xff]  ;;  %v4457_v55 = vpack.c.bf16 %v1870_v26, %v1867_v7 }
 0x20a   :  { %4160 = vmatpush1.bf16.msra.mxu0 %v4159_v33  ;;  %v1926_v33 = vld [vmem:[#allocation8 + $0x7b8] sm:$0xff]  ;;  %v4175_v37 = vpack.c.bf16 %v1922_v31, %v1919_v30  ;;  %v1947_v7 = vld [vmem:[#allocation8 + $0x860] sm:$0xff]  ;;  %v1888_v30 = vld [vmem:[#allocation8 + $0x688] sm:$0xff] }
 0x20b   :  { %4162 = vmatprep.subr.bf16.mxu0 %v4161_v11  ;;  %v1819_v11 = vld [vmem:[#allocation8 + $0x460] sm:$0xff]  ;;  %v4177_v40 = vpack.c.bf16 %v1929_v36, %v1926_v33  ;;  %v1950_v36 = vld [vmem:[#allocation8 + $0x878] sm:$0xff] }
 0x20c   :  { %4444 = vmatpush3.bf16.msra.mxu1 %v4443_v50  ;;  %v1921_v50 = vld [vmem:[#allocation8 + $0x790] sm:$0xff]  ;;  %v4459_v39 = vpack.c.bf16 %v1822_v15, %v1819_v11  ;;  %v1943_v33 = vld [vmem:[#allocation8 + $0x840] sm:$0xff] }
 0x20d   :  { %4446 = vmatprep.subr.bf16.mxu1 %v4445_v4  ;;  %v1925_v4 = vld [vmem:[#allocation8 + $0x7b0] sm:$0xff]  ;;  %v4461_v51 = vpack.c.bf16 %v1924_v23, %v1921_v50  ;;  %v1891_v15 = vld [vmem:[#allocation8 + $0x6a0] sm:$0xff]  ;;  %v4191_v50 = vpack.c.bf16 %v1946_v34, %v1943_v33 }
 0x20e   :  { %4164 = vmatpush1.bf16.msra.mxu0 %v4163_v46  ;;  %v1932_v46 = vld [vmem:[#allocation8 + $0x7e8] sm:$0xff]  ;;  %v4179_v47 = vpack.c.bf16 %v1928_v44, %v1925_v4  ;;  %v1945_v23 = vld [vmem:[#allocation8 + $0x850] sm:$0xff]  ;;  %v1967_v34 = vld [vmem:[#allocation8 + $0x900] sm:$0xff] }
 0x20f   :  { %4166 = vmatprep.subr.bf16.mxu0 %v4165_v28  ;;  %v1873_v28 = vld [vmem:[#allocation8 + $0x610] sm:$0xff]  ;;  %v4181_v12 = vpack.c.bf16 %v1935_v49, %v1932_v46  ;;  %v1952_v4 = vld [vmem:[#allocation8 + $0x888] sm:$0xff] }
 0x210   :  { %4448 = vmatpush3.bf16.msra.mxu1 %v4447_v62  ;;  %v1927_v62 = vld [vmem:[#allocation8 + $0x7c0] sm:$0xff]  ;;  %v4463_v9 = vpack.c.bf16 %v1876_v58, %v1873_v28  ;;  %v1897_v46 = vld [vmem:[#allocation8 + $0x6d0] sm:$0xff]  ;;  %v1900_v49 = vld [vmem:[#allocation8 + $0x6e8] sm:$0xff] }
 0x211   :  { %4450 = vmatprep.subr.bf16.mxu1 %v4449_v41  ;;  %v1931_v41 = vld [vmem:[#allocation8 + $0x7e0] sm:$0xff]  ;;  %v4465_v14 = vpack.c.bf16 %v1930_v1, %v1927_v62  ;;  %v1954_v58 = vld [vmem:[#allocation8 + $0x898] sm:$0xff] }
 0x212   :  { %4168 = vmatpush1.bf16.msra.mxu0 %v4167_v10  ;;  %v1938_v10 = vld [vmem:[#allocation8 + $0x818] sm:$0xff]  ;;  %v4183_v18 = vpack.c.bf16 %v1934_v6, %v1931_v41  ;;  %v1951_v28 = vld [vmem:[#allocation8 + $0x880] sm:$0xff]  ;;  %v4479_v41 = vpack.c.bf16 %v1900_v49, %v1897_v46 }
 0x213   :  { %4170 = vmatprep.subr.bf16.mxu0 %v4169_v16  ;;  %v1879_v16 = vld [vmem:[#allocation8 + $0x640] sm:$0xff]  ;;  %v4185_v25 = vpack.c.bf16 %v1941_v56, %v1938_v10  ;;  %v1962_v6 = vld [vmem:[#allocation8 + $0x8d8] sm:$0xff]  ;;  %v4481_v10 = vpack.c.bf16 %v1954_v58, %v1951_v28  ;;  %v1972_v28 = vld [vmem:[#allocation8 + $0x928] sm:$0xff] }
 0x214   :  { %4452 = vmatpush3.bf16.msra.mxu1 %v4451_v57  ;;  %v1933_v57 = vld [vmem:[#allocation8 + $0x7f0] sm:$0xff]  ;;  %v4467_v2 = vpack.c.bf16 %v1882_v17, %v1879_v16  ;;  %v1955_v1 = vld [vmem:[#allocation8 + $0x8a0] sm:$0xff] }
 0x215   :  { %4454 = vmatprep.subr.bf16.mxu1 %v4453_v35  ;;  %v1937_v35 = vld [vmem:[#allocation8 + $0x810] sm:$0xff]  ;;  %v4469_v26 = vpack.c.bf16 %v1936_v22, %v1933_v57  ;;  %v1903_v56 = vld [vmem:[#allocation8 + $0x700] sm:$0xff] }
 0x216   :  { %4172 = vmatpush1.bf16.msra.mxu0 %v4171_v0  ;;  %v1944_v0 = vld [vmem:[#allocation8 + $0x848] sm:$0xff]  ;;  %v4187_v31 = vpack.c.bf16 %v1940_v54, %v1937_v35  ;;  %v1957_v17 = vld [vmem:[#allocation8 + $0x8b0] sm:$0xff]  ;;  %v1983_v46 = vld [vmem:[#allocation8 + $0x980] sm:$0xff] }
 0x217   :  { %4174 = vmatprep.subr.bf16.mxu0 %v4173_v27  ;;  %v1885_v27 = vld [vmem:[#allocation8 + $0x670] sm:$0xff]  ;;  %v1964_v54 = vld [vmem:[#allocation8 + $0x8e8] sm:$0xff] }
 0x218   :  { %4456 = vmatpush3.bf16.msra.mxu1 %v4455_v32  ;;  %v1939_v32 = vld [vmem:[#allocation8 + $0x820] sm:$0xff]  ;;  %v5107_v57 = vld [vmem:[#allocation7] sm:$0xff] }
 0x219   :  { %4458 = vmatprep.subr.bf16.mxu1 %v4457_v55  ;;  %v1953_v55 = vld [vmem:[#allocation8 + $0x890] sm:$0xff]  ;;  %v4473_v11 = vpack.c.bf16 %v1942_v8, %v1939_v32  ;;  %v1963_v32 = vld [vmem:[#allocation8 + $0x8e0] sm:$0xff]  ;;  %v1966_v8 = vld [vmem:[#allocation8 + $0x8f8] sm:$0xff] }
 0x21a   :  { %4176 = vmatpush1.bf16.msra.mxu0 %v4175_v37  ;;  %v1894_v37 = vld [vmem:[#allocation8 + $0x6b8] sm:$0xff]  ;;  %v1961_v35 = vld [vmem:[#allocation8 + $0x8d0] sm:$0xff] }
 0x21b   :  { %4178 = vmatprep.subr.bf16.mxu0 %v4177_v40  ;;  %v1949_v40 = vld [vmem:[#allocation8 + $0x870] sm:$0xff]  ;;  %v4475_v44 = vpack.c.bf16 %v1894_v37, %v1891_v15  ;;  %v4489_v37 = vpack.c.bf16 %v1966_v8, %v1963_v32  ;;  %v2035_v32 = vld [vmem:[#allocation8 + $0xb20] sm:$0xff]  ;;  %v2038_v8 = vld [vmem:[#allocation8 + $0xb38] sm:$0xff] }
 0x21c   :  { %4460 = vmatpush3.bf16.msra.mxu1 %v4459_v39  ;;  %v1956_v39 = vld [vmem:[#allocation8 + $0x8a8] sm:$0xff]  ;;  %v1977_v15 = vld [vmem:[#allocation8 + $0x950] sm:$0xff] }
 0x21d   :  { %4462 = vmatprep.subr.bf16.mxu1 %v4461_v51  ;;  %v4195_v51 = vpack.c.bf16 %v1952_v4, %v1949_v40  ;;  %v4197_v62 = vpack.c.bf16 %v1959_v61, %v1956_v39  ;;  %v2020_v40 = vld [vmem:[#allocation8 + $0xaa8] sm:$0xff]  ;;  %v1973_v39 = vld [vmem:[#allocation8 + $0x930] sm:$0xff] }
 0x21e   :  { %4180 = vmatpush1.bf16.msra.mxu0 %v4179_v47  ;;  %v689_v47 = vsub.s32 4, %v4992_v13  ;;  %v1976_v61 = vld [vmem:[#allocation8 + $0x948] sm:$0xff] }
 0x21f   :  { %2874 = vmatmul.mubr.f32.vlgmr.msra.gmra.mrb[20].mxu1 %v1657_v29  ;;  %4182 = vmatprep.subr.bf16.mxu0 %v4181_v12  ;;  %v4189_v29 = vpack.c.bf16 %v1947_v7, %v1944_v0  ;;  %v1958_v12 = vld [vmem:[#allocation8 + $0x8b8] sm:$0xff]  ;;  %v1968_v0 = vld [vmem:[#allocation8 + $0x908] sm:$0xff]  ;;  %v1971_v7 = vld [vmem:[#allocation8 + $0x920] sm:$0xff]  ;;  %v4211_v58 = vpack.c.bf16 %v1976_v61, %v1973_v39 }
 0x220   :  { %2878 = vmatprep.mubr.f32.mxu1 %v1670_v43  ;;  %4464 = vmatpush3.bf16.msra.mxu1 %v4463_v9  ;;  %v4471_v43 = vpack.c.bf16 %v1888_v30, %v1885_v27  ;;  %v1965_v9 = vld [vmem:[#allocation8 + $0x8f0] sm:$0xff]  ;;  %v4199_v16 = vpack.c.bf16 %v1958_v12, %v1955_v1  ;;  %v690_v22 = vrot.slane %v5107_v57, %v689_v47  ;;  %v1912_v30 = vld [vmem:[#allocation8 + $0x748] sm:$0xff]  ;;  %v2023_v47 = vld [vmem:[#allocation8 + $0xac0] sm:$0xff] }
 0x221   :  { %4466 = vmatprep.subr.bf16.mxu1 %v4465_v14  ;;  %v1906_v14 = vld [vmem:[#allocation8 + $0x718] sm:$0xff]  ;;  %v1909_v27 = vld [vmem:[#allocation8 + $0x730] sm:$0xff]  ;;  %v4205_v33 = vpack.c.bf16 %v1971_v7, %v1968_v0  ;;  %v1979_v12 = vld [vmem:[#allocation8 + $0x960] sm:$0xff] }
 0x222   :  { %4184 = vmatpush1.bf16.msra.mxu0 %v4183_v18  ;;  %v1960_v18 = vld [vmem:[#allocation8 + $0x8c8] sm:$0xff]  ;;  %v4599_v4 = vadd.f32 %v5030_v52, %v690_v22  ;;  %v1995_v7 = vld [vmem:[#allocation8 + $0x9e0] sm:$0xff] }
 0x223   :  { %2879 = vmatmul.mubr.f32.gmra.mrb[22].mxu1 %v1669_v45  ;;  %4186 = vmatprep.subr.bf16.mxu0 %v4185_v25  ;;  %v4193_v45 = vpack.c.bf16 %v1953_v55, %v1950_v36  ;;  %v4201_v25 = vpack.c.bf16 %v1965_v9, %v1962_v6  ;;  %v4600_v36 = vadd.f32 %v5032_v24, %v5055_v63  ;;  %v1986_v9 = vld [vmem:[#allocation8 + $0x998] sm:$0xff]  ;;  %v1992_v0 = vld [vmem:[#allocation8 + $0x9c8] sm:$0xff]  ;;  %v2007_v39 = vld [vmem:[#allocation8 + $0xa40] sm:$0xff] }
 0x224   :  { %4468 = vmatpush3.bf16.msra.mxu1 %v4467_v2  ;;  %2948 = vmatprep.mubr.f32.mxu1 %v1660_v53  ;;  %v4477_v53 = vpack.c.bf16 %v1948_v20, %v1945_v23  ;;  %v4483_v2 = vpack.c.bf16 %v1906_v14, %v1903_v56  ;;  %v4487_v55 = vpack.c.bf16 %v1912_v30, %v1909_v27  ;;  %v1918_v23 = vld [vmem:[#allocation8 + $0x778] sm:$0xff]  ;;  %v1671_v52 = vmax.f32 %v4599_v4, 0.0  ;;  %v1975_v14 = vld [vmem:[#allocation8 + $0x940] sm:$0xff]  ;;  %v1981_v27 = vld [vmem:[#allocation8 + $0x970] sm:$0xff] }
 0x225   :  { %4470 = vmatprep.subr.bf16.mxu1 %v4469_v26  ;;  %v4485_v26 = vpack.c.bf16 %v1960_v18, %v1957_v17  ;;  %v1672_v24 = vmax.f32 %v4600_v36, 0.0  ;;  %v2029_v18 = vld [vmem:[#allocation8 + $0xaf0] sm:$0xff]  ;;  %v1984_v30 = vld [vmem:[#allocation8 + $0x988] sm:$0xff]  ;;  %v1998_v36 = vld [vmem:[#allocation8 + $0x9f8] sm:$0xff] }
 0x226   :  { %4188 = vmatpush1.bf16.msra.mxu0 %v4187_v31  ;;  %v4203_v31 = vpack.c.bf16 %v1964_v54, %v1961_v35  ;;  %v1985_v35 = vld [vmem:[#allocation8 + $0x990] sm:$0xff]  ;;  %v1988_v54 = vld [vmem:[#allocation8 + $0x9a8] sm:$0xff] }
 0x227   :  { %4190 = vmatprep.subr.bf16.mxu0 %v4189_v29  ;;  %v4597_v29 = vadd.f32 %v5026_v60, %v690_v22  ;;  %v2032_v22 = vld [vmem:[#allocation8 + $0xb08] sm:$0xff] }
 0x228   :  { %4472 = vmatpush3.bf16.msra.mxu1 %v4471_v43  ;;  %v1970_v43 = vld [vmem:[#allocation8 + $0x918] sm:$0xff] }
 0x229   :  { %4474 = vmatprep.subr.bf16.mxu1 %v4473_v11  ;;  %v1974_v11 = vld [vmem:[#allocation8 + $0x938] sm:$0xff]  ;;  %v4207_v20 = vpack.c.bf16 %v1970_v43, %v1967_v34  ;;  %v1659_v60 = vmax.f32 %v4597_v29, 0.0  ;;  %v4221_v29 = vpack.c.bf16 %v1995_v7, %v1992_v0  ;;  %v4503_v43 = vpack.c.bf16 %v1984_v30, %v1981_v27  ;;  %v2005_v0 = vld [vmem:[#allocation8 + $0xa30] sm:$0xff]  ;;  %v2008_v7 = vld [vmem:[#allocation8 + $0xa48] sm:$0xff] }
 0x22a   :  { %4192 = vmatpush1.bf16.msra.mxu0 %v4191_v50  ;;  %v1915_v50 = vld [vmem:[#allocation8 + $0x760] sm:$0xff]  ;;  %v1994_v34 = vld [vmem:[#allocation8 + $0x9d8] sm:$0xff] }
 0x22b   :  { %4194 = vmatprep.subr.bf16.mxu0 %v4193_v45  ;;  %v2017_v45 = vld [vmem:[#allocation8 + $0xa90] sm:$0xff]  ;;  %v4491_v63 = vpack.c.bf16 %v1918_v23, %v1915_v50  ;;  %v2059_v30 = vld [vmem:[#allocation8 + $0xbe0] sm:$0xff] }
 0x22c   :  { %4476 = vmatpush3.bf16.msra.mxu1 %v4475_v44  ;;  %v4209_v44 = vpack.c.bf16 %v1977_v15, %v1974_v11  ;;  %v4493_v49 = vpack.c.bf16 %v2020_v40, %v2017_v45  ;;  %v4505_v11 = vpack.c.bf16 %v2038_v8, %v2035_v32  ;;  %v1987_v15 = vld [vmem:[#allocation8 + $0x9a0] sm:$0xff]  ;;  %v2041_v23 = vld [vmem:[#allocation8 + $0xb50] sm:$0xff] }
 0x22d   :  { %4478 = vmatprep.subr.bf16.mxu1 %v4477_v53  ;;  %v1980_v53 = vld [vmem:[#allocation8 + $0x968] sm:$0xff]  ;;  %v1997_v40 = vld [vmem:[#allocation8 + $0x9f0] sm:$0xff] }
 0x22e   :  { %4196 = vmatpush1.bf16.msra.mxu0 %v4195_v51  ;;  %v1969_v51 = vld [vmem:[#allocation8 + $0x910] sm:$0xff]  ;;  %v4213_v1 = vpack.c.bf16 %v1983_v46, %v1980_v53  ;;  %v2047_v46 = vld [vmem:[#allocation8 + $0xb80] sm:$0xff] }
 0x22f   :  { %4198 = vmatprep.subr.bf16.mxu0 %v4197_v62  ;;  %v2026_v62 = vld [vmem:[#allocation8 + $0xad8] sm:$0xff]  ;;  %v4495_v6 = vpack.c.bf16 %v1972_v28, %v1969_v51  ;;  %v2003_v28 = vld [vmem:[#allocation8 + $0xa20] sm:$0xff] }
 0x230   :  { %4480 = vmatpush3.bf16.msra.mxu1 %v4479_v41  ;;  %v1982_v41 = vld [vmem:[#allocation8 + $0x978] sm:$0xff]  ;;  %v4497_v56 = vpack.c.bf16 %v2026_v62, %v2023_v47  ;;  %v701_v62 = vsub.s32 7, %v4992_v13 }
 0x231   :  { %4482 = vmatprep.subr.bf16.mxu1 %v4481_v10  ;;  %v1989_v10 = vld [vmem:[#allocation8 + $0x9b0] sm:$0xff]  ;;  %v4215_v17 = vpack.c.bf16 %v1982_v41, %v1979_v12  ;;  %v1999_v41 = vld [vmem:[#allocation8 + $0xa00] sm:$0xff] }
 0x232   :  { %4200 = vmatpush1.bf16.msra.mxu0 %v4199_v16  ;;  %v1978_v16 = vld [vmem:[#allocation8 + $0x958] sm:$0xff] }
 0x233   :  { %4202 = vmatprep.subr.bf16.mxu0 %v4201_v25  ;;  %v4217_v25 = vpack.c.bf16 %v1989_v10, %v1986_v9  ;;  %v2053_v10 = vld [vmem:[#allocation8 + $0xbb0] sm:$0xff] }
 0x234   :  { %4484 = vmatpush3.bf16.msra.mxu1 %v4483_v2  ;;  %v4499_v2 = vpack.c.bf16 %v1978_v16, %v1975_v14  ;;  %v2009_v16 = vld [vmem:[#allocation8 + $0xa50] sm:$0xff] }
 0x235   :  { %4486 = vmatprep.subr.bf16.mxu1 %v4485_v26  ;;  %v4501_v26 = vpack.c.bf16 %v2032_v22, %v2029_v18  ;;  %v702_v18 = vrot.slane %v5107_v57, %v701_v62 }
 0x236   :  { %4204 = vmatpush1.bf16.msra.mxu0 %v4203_v31  ;;  %v4219_v31 = vpack.c.bf16 %v1988_v54, %v1985_v35  ;;  %v2019_v35 = vld [vmem:[#allocation8 + $0xaa0] sm:$0xff]  ;;  %v697_v54 = vsub.s32 6, %v4992_v13 }
 0x237   :  { %4206 = vmatprep.subr.bf16.mxu0 %v4205_v33  ;;  %v1991_v33 = vld [vmem:[#allocation8 + $0x9c0] sm:$0xff] }
 0x238   :  { %4488 = vmatpush3.bf16.msra.mxu1 %v4487_v55  ;;  %v2001_v55 = vld [vmem:[#allocation8 + $0xa10] sm:$0xff]  ;;  %v4223_v50 = vpack.c.bf16 %v1994_v34, %v1991_v33  ;;  %v2018_v33 = vld [vmem:[#allocation8 + $0xa98] sm:$0xff] }
 0x239   :  { %2491 = vmatmul.mubr.f32.vlgmr.msra.gmra.mrb[8].mxu0 %v1659_v60  ;;  %4490 = vmatprep.subr.bf16.mxu1 %v4489_v37  ;;  %v1990_v37 = vld [vmem:[#allocation8 + $0x9b8] sm:$0xff]  ;;  %v4225_v45 = vpack.c.bf16 %v2001_v55, %v1998_v36  ;;  %v2025_v55 = vld [vmem:[#allocation8 + $0xad0] sm:$0xff] }
 0x23a   :  { %2496 = vmatprep.mubr.f32.mxu0 %v1672_v24  ;;  %4208 = vmatpush1.bf16.msra.mxu0 %v4207_v20  ;;  %v2044_v20 = vld [vmem:[#allocation8 + $0xb68] sm:$0xff]  ;;  %v4507_v4 = vpack.c.bf16 %v1990_v37, %v1987_v15  ;;  %v2022_v36 = vld [vmem:[#allocation8 + $0xab8] sm:$0xff]  ;;  %v2011_v37 = vld [vmem:[#allocation8 + $0xa60] sm:$0xff] }
 0x23b   :  { %4210 = vmatprep.subr.bf16.mxu0 %v4209_v44  ;;  %v2004_v44 = vld [vmem:[#allocation8 + $0xa28] sm:$0xff]  ;;  %v4509_v61 = vpack.c.bf16 %v2044_v20, %v2041_v23 }
 0x23c   :  { %4492 = vmatpush3.bf16.msra.mxu1 %v4491_v63  ;;  %v1996_v63 = vld [vmem:[#allocation8 + $0x9e8] sm:$0xff]  ;;  %v4229_v51 = vpack.c.bf16 %v2007_v39, %v2004_v44  ;;  %v4241_v44 = vpack.c.bf16 %v2025_v55, %v2022_v36  ;;  %v2131_v36 = vld [vmem:[#allocation8 + $0xe20] sm:$0xff]  ;;  %v2134_v55 = vld [vmem:[#allocation8 + $0xe38] sm:$0xff] }
 0x23d   :  { %2497 = vmatmul.mubr.f32.gmra.mrb[10].mxu0 %v1671_v52  ;;  %4494 = vmatprep.subr.bf16.mxu1 %v4493_v49  ;;  %v2050_v49 = vld [vmem:[#allocation8 + $0xb98] sm:$0xff] }
 0x23e   :  { %4212 = vmatpush1.bf16.msra.mxu0 %v4211_v58  ;;  %v2006_v58 = vld [vmem:[#allocation8 + $0xa38] sm:$0xff]  ;;  %v4513_v12 = vpack.c.bf16 %v2050_v49, %v2047_v46  ;;  %v2031_v46 = vld [vmem:[#allocation8 + $0xb00] sm:$0xff] }
 0x23f   :  { %2949 = vmatmul.mubr.f32.vlgmr.msra.gmra.mrb[24].mxu1 %v1659_v60  ;;  %4214 = vmatprep.subr.bf16.mxu0 %v4213_v1  ;;  %v2000_v60 = vld [vmem:[#allocation8 + $0xa08] sm:$0xff]  ;;  %v2013_v1 = vld [vmem:[#allocation8 + $0xa70] sm:$0xff]  ;;  %v4231_v9 = vpack.c.bf16 %v2006_v58, %v2003_v28 }
 0x240   :  { %2953 = vmatprep.mubr.f32.mxu1 %v1672_v24  ;;  %4496 = vmatpush3.bf16.msra.mxu1 %v4495_v6  ;;  %v1993_v24 = vld [vmem:[#allocation8 + $0x9d0] sm:$0xff]  ;;  %v4227_v53 = vpack.c.bf16 %v2000_v60, %v1997_v40  ;;  %v2002_v6 = vld [vmem:[#allocation8 + $0xa18] sm:$0xff]  ;;  %v2116_v60 = vld [vmem:[#allocation8 + $0xda8] sm:$0xff] }
 0x241   :  { %4498 = vmatprep.subr.bf16.mxu1 %v4497_v56  ;;  %v4511_v47 = vpack.c.bf16 %v1996_v63, %v1993_v24  ;;  %v2056_v56 = vld [vmem:[#allocation8 + $0xbc8] sm:$0xff]  ;;  %v4515_v22 = vpack.c.bf16 %v2002_v6, %v1999_v41  ;;  %v2113_v40 = vld [vmem:[#allocation8 + $0xd90] sm:$0xff]  ;;  %v2027_v6 = vld [vmem:[#allocation8 + $0xae0] sm:$0xff] }
 0x242   :  { %4216 = vmatpush1.bf16.msra.mxu0 %v4215_v17  ;;  %v2012_v17 = vld [vmem:[#allocation8 + $0xa68] sm:$0xff]  ;;  %v2065_v28 = vld [vmem:[#allocation8 + $0xc10] sm:$0xff] }
 0x243   :  { %2954 = vmatmul.mubr.f32.gmra.mrb[26].mxu1 %v1671_v52  ;;  %4218 = vmatprep.subr.bf16.mxu0 %v4217_v25  ;;  %v2010_v52 = vld [vmem:[#allocation8 + $0xa58] sm:$0xff]  ;;  %v2016_v25 = vld [vmem:[#allocation8 + $0xa88] sm:$0xff]  ;;  %v4235_v27 = vpack.c.bf16 %v2012_v17, %v2009_v16  ;;  %v2037_v16 = vld [vmem:[#allocation8 + $0xb30] sm:$0xff] }
 0x244   :  { %4500 = vmatpush3.bf16.msra.mxu1 %v4499_v2  ;;  %v4233_v14 = vpack.c.bf16 %v2013_v1, %v2010_v52  ;;  %v4517_v2 = vpack.c.bf16 %v2056_v56, %v2053_v10  ;;  %v4237_v8 = vpack.c.bf16 %v2019_v35, %v2016_v25  ;;  %v2024_v24 = vld [vmem:[#allocation8 + $0xac8] sm:$0xff]  ;;  %v2119_v52 = vld [vmem:[#allocation8 + $0xdc0] sm:$0xff]  ;;  %v2122_v1 = vld [vmem:[#allocation8 + $0xdd8] sm:$0xff] }
 0x245   :  { %4502 = vmatprep.subr.bf16.mxu1 %v4501_v26  ;;  %v2068_v58 = vld [vmem:[#allocation8 + $0xc28] sm:$0xff]  ;;  %v2074_v25 = vld [vmem:[#allocation8 + $0xc58] sm:$0xff] }
 0x246   :  { %4220 = vmatpush1.bf16.msra.mxu0 %v4219_v31  ;;  %v2062_v31 = vld [vmem:[#allocation8 + $0xbf8] sm:$0xff]  ;;  %v4527_v56 = vpack.c.bf16 %v2068_v58, %v2065_v28  ;;  %v2055_v28 = vld [vmem:[#allocation8 + $0xbc0] sm:$0xff] }
 0x247   :  { %4222 = vmatprep.subr.bf16.mxu0 %v4221_v29  ;;  %v2015_v29 = vld [vmem:[#allocation8 + $0xa80] sm:$0xff]  ;;  %v4521_v15 = vpack.c.bf16 %v2062_v31, %v2059_v30  ;;  %v2036_v30 = vld [vmem:[#allocation8 + $0xb28] sm:$0xff] }
 0x248   :  { %4504 = vmatpush3.bf16.msra.mxu1 %v4503_v43  ;;  %v4519_v43 = vpack.c.bf16 %v2008_v7, %v2005_v0  ;;  %v4239_v20 = vpack.c.bf16 %v2018_v33, %v2015_v29  ;;  %v2128_v0 = vld [vmem:[#allocation8 + $0xe08] sm:$0xff]  ;;  %v2077_v29 = vld [vmem:[#allocation8 + $0xc70] sm:$0xff] }
 0x249   :  { %4506 = vmatprep.subr.bf16.mxu1 %v4505_v11  ;;  %v698_v11 = vrot.slane %v5107_v57, %v697_v54  ;;  %v2080_v33 = vld [vmem:[#allocation8 + $0xc88] sm:$0xff] }
 0x24a   :  { %4224 = vmatpush1.bf16.msra.mxu0 %v4223_v50  ;;  %v2014_v50 = vld [vmem:[#allocation8 + $0xa78] sm:$0xff] }
 0x24b   :  { %4226 = vmatprep.subr.bf16.mxu0 %v4225_v45  ;;  %v4523_v57 = vpack.c.bf16 %v2014_v50, %v2011_v37  ;;  %v2042_v37 = vld [vmem:[#allocation8 + $0xb58] sm:$0xff]  ;;  %v4535_v50 = vpack.c.bf16 %v2080_v33, %v2077_v29  ;;  %v2067_v29 = vld [vmem:[#allocation8 + $0xc20] sm:$0xff] }
 0x24c   :  { %4508 = vmatpush3.bf16.msra.mxu1 %v4507_v4  ;;  %v5118_v4 = vld [vmem:[#allocation7 + $0x8] sm:$0xf] }
 0x24d   :  { %4510 = vmatprep.subr.bf16.mxu1 %v4509_v61  ;;  %v2021_v61 = vld [vmem:[#allocation8 + $0xab0] sm:$0xff] }
 0x24e   :  { %4228 = vmatpush1.bf16.msra.mxu0 %v4227_v53  ;;  %v2028_v53 = vld [vmem:[#allocation8 + $0xae8] sm:$0xff]  ;;  %v4243_v62 = vpack.c.bf16 %v2024_v24, %v2021_v61 }
 0x24f   :  { %4230 = vmatprep.subr.bf16.mxu0 %v4229_v51  ;;  %v4525_v51 = vpack.c.bf16 %v2116_v60, %v2113_v40  ;;  %v4245_v41 = vpack.c.bf16 %v2031_v46, %v2028_v53  ;;  %v2083_v40 = vld [vmem:[#allocation8 + $0xca0] sm:$0xff]  ;;  %v2086_v60 = vld [vmem:[#allocation8 + $0xcb8] sm:$0xff]  ;;  %v2140_v61 = vld [vmem:[#allocation8 + $0xe68] sm:$0xff] }
 0x250   :  { %4512 = vmatpush3.bf16.msra.mxu1 %v4511_v47  ;;  %v5126_v47 = vrot.slane %v5118_v4, %v5000_v21  ;;  %v2048_v53 = vld [vmem:[#allocation8 + $0xb88] sm:$0xff]  ;;  %v4539_v46 = vpack.c.bf16 %v2086_v60, %v2083_v40  ;;  %v2073_v40 = vld [vmem:[#allocation8 + $0xc50] sm:$0xff]  ;;  %v706_v60 = vrot.slane %v5118_v4, %v4995_v19 }
 0x251   :  { %4514 = vmatprep.subr.bf16.mxu1 %v4513_v12 }
 0x252   :  { %4232 = vmatpush1.bf16.msra.mxu0 %v4231_v9  ;;  %v1336_v26 = vpop.f32.mrb[8].mxu1  ;;  %v2030_v9 = vld [vmem:[#allocation8 + $0xaf8] sm:$0xff]  ;;  %v5134_v35 = vadd.f32 %v5092_v42, %v5126_v47  ;;  %v2040_v42 = vld [vmem:[#allocation8 + $0xb48] sm:$0xff] }
 0x253   :  { %v1338_v32 = vpop.f32.mrb[9].mxu1  ;;  %4234 = vmatprep.subr.bf16.mxu0 %v4233_v14  ;;  %v5122_v49 = vadd.f32 %v1336_v26, %v698_v11  ;;  %v2034_v14 = vld [vmem:[#allocation8 + $0xb18] sm:$0xff]  ;;  %v4247_v54 = vpack.c.bf16 %v2030_v9, %v2027_v6 }
 0x254   :  { %v4602_v34 = vadd.f32 %v1338_v32, %v702_v18  ;;  %4516 = vmatpush3.bf16.msra.mxu1 %v4515_v22  ;;  %v2071_v22 = vld [vmem:[#allocation8 + $0xc40] sm:$0xff]  ;;  %v4249_v26 = vpack.c.bf16 %v2037_v16, %v2034_v14  ;;  %v2146_v6 = vld [vmem:[#allocation8 + $0xe98] sm:$0xff] }
 0x255   :  { %4518 = vmatprep.subr.bf16.mxu1 %v4517_v2  ;;  %v1661_v17 = vmax.f32 %v5122_v49, 0.0  ;;  %v2125_v2 = vld [vmem:[#allocation8 + $0xdf0] sm:$0xff]  ;;  %v4531_v31 = vpack.c.bf16 %v2074_v25, %v2071_v22  ;;  %v2043_v32 = vld [vmem:[#allocation8 + $0xb60] sm:$0xff]  ;;  %v2054_v14 = vld [vmem:[#allocation8 + $0xbb8] sm:$0xff] }
 0x256   :  { %v1662_v23 = vmax.f32 %v4602_v34, 0.0  ;;  %4236 = vmatpush1.bf16.msra.mxu0 %v4235_v27  ;;  %v1342_v45 = vpop.f32.mrb[10].mxu1  ;;  %v2033_v27 = vld [vmem:[#allocation8 + $0xb10] sm:$0xff]  ;;  %v1664_v34 = vmax.f32 %v5134_v35, 0.0  ;;  %v2078_v49 = vld [vmem:[#allocation8 + $0xc78] sm:$0xff] }
 0x257   :  { %4238 = vmatprep.subr.bf16.mxu0 %v4237_v8  ;;  %v1344_v39 = vpop.f32.mrb[11].mxu1  ;;  %v5128_v12 = vadd.f32 %v1342_v45, %v698_v11  ;;  %v4533_v8 = vpack.c.bf16 %v2128_v0, %v2125_v2  ;;  %v4253_v11 = vpack.c.bf16 %v2043_v32, %v2040_v42  ;;  %v4537_v45 = vpack.c.bf16 %v2134_v55, %v2131_v36  ;;  %v2061_v22 = vld [vmem:[#allocation8 + $0xbf0] sm:$0xff]  ;;  %v2098_v2 = vld [vmem:[#allocation8 + $0xd18] sm:$0xff]  ;;  %v2060_v42 = vld [vmem:[#allocation8 + $0xbe8] sm:$0xff] }
 0x258   :  { %2567 = vmatprep.mubr.f32.mxu0 %v1662_v23  ;;  %4520 = vmatpush3.bf16.msra.mxu1 %v4519_v43  ;;  %v5120_v63 = vadd.f32 %v1344_v39, %v702_v18  ;;  %v4529_v18 = vpack.c.bf16 %v2122_v1, %v2119_v52  ;;  %v4251_v43 = vpack.c.bf16 %v2036_v30, %v2033_v27  ;;  %v2137_v39 = vld [vmem:[#allocation8 + $0xe50] sm:$0xff]  ;;  %v2092_v52 = vld [vmem:[#allocation8 + $0xce8] sm:$0xff] }
 0x259   :  { %3023 = vmatprep.mubr.f32.mxu1 %v1662_v23  ;;  %4522 = vmatprep.subr.bf16.mxu1 %v4521_v15  ;;  %v1673_v7 = vmax.f32 %v5128_v12, 0.0  ;;  %v2039_v15 = vld [vmem:[#allocation8 + $0xb40] sm:$0xff]  ;;  %v2046_v23 = vld [vmem:[#allocation8 + $0xb78] sm:$0xff]  ;;  %v4541_v58 = vpack.c.bf16 %v2140_v61, %v2137_v39  ;;  %v2152_v27 = vld [vmem:[#allocation8 + $0xec8] sm:$0xff] }
 0x25a   :  { %4240 = vmatpush1.bf16.msra.mxu0 %v4239_v20  ;;  %v1674_v10 = vmax.f32 %v5120_v63, 0.0  ;;  %v2049_v20 = vld [vmem:[#allocation8 + $0xb90] sm:$0xff]  ;;  %v2104_v36 = vld [vmem:[#allocation8 + $0xd48] sm:$0xff]  ;;  %v2107_v39 = vld [vmem:[#allocation8 + $0xd60] sm:$0xff] }
 0x25b   :  { %4242 = vmatprep.subr.bf16.mxu0 %v4241_v44  ;;  %v4255_v44 = vpack.c.bf16 %v2042_v37, %v2039_v15  ;;  %v4257_v24 = vpack.c.bf16 %v2049_v20, %v2046_v23  ;;  %v2158_v15 = vld [vmem:[#allocation8 + $0xef8] sm:$0xff]  ;;  %v2081_v12 = vld [vmem:[#allocation8 + $0xc90] sm:$0xff] }
 0x25c   :  { %4524 = vmatpush3.bf16.msra.mxu1 %v4523_v57  ;;  %v2045_v57 = vld [vmem:[#allocation8 + $0xb70] sm:$0xff]  ;;  %v2066_v23 = vld [vmem:[#allocation8 + $0xc18] sm:$0xff] }
 0x25d   :  { %4526 = vmatprep.subr.bf16.mxu1 %v4525_v51  ;;  %v2052_v51 = vld [vmem:[#allocation8 + $0xba8] sm:$0xff]  ;;  %v4259_v1 = vpack.c.bf16 %v2048_v53, %v2045_v57  ;;  %v2110_v61 = vld [vmem:[#allocation8 + $0xd78] sm:$0xff]  ;;  %v2209_v57 = vld [vmem:[#allocation8 + $0x1090] sm:$0xff] }
 0x25e   :  { %4244 = vmatpush1.bf16.msra.mxu0 %v4243_v62  ;;  %v2089_v62 = vld [vmem:[#allocation8 + $0xcd0] sm:$0xff]  ;;  %v4261_v9 = vpack.c.bf16 %v2055_v28, %v2052_v51  ;;  %v2212_v53 = vld [vmem:[#allocation8 + $0x10a8] sm:$0xff] }
 0x25f   :  { %3024 = vmatmul.mubr.f32.vlgmr.msra.gmra.mrb[28].mxu1 %v1661_v17  ;;  %4246 = vmatprep.subr.bf16.mxu0 %v4245_v41  ;;  %v2143_v41 = vld [vmem:[#allocation8 + $0xe80] sm:$0xff]  ;;  %v4543_v16 = vpack.c.bf16 %v2092_v52, %v2089_v62  ;;  %v2069_v51 = vld [vmem:[#allocation8 + $0xc30] sm:$0xff]  ;;  %v2072_v28 = vld [vmem:[#allocation8 + $0xc48] sm:$0xff] }
 0x260   :  { %4528 = vmatpush3.bf16.msra.mxu1 %v4527_v56  ;;  %3028 = vmatprep.mubr.f32.mxu1 %v1674_v10  ;;  %v2051_v56 = vld [vmem:[#allocation8 + $0xba0] sm:$0xff]  ;;  %v4545_v25 = vpack.c.bf16 %v2146_v6, %v2143_v41  ;;  %v2076_v62 = vld [vmem:[#allocation8 + $0xc68] sm:$0xff]  ;;  %v4557_v41 = vpack.c.bf16 %v2212_v53, %v2209_v57  ;;  %v2161_v6 = vld [vmem:[#allocation8 + $0xf10] sm:$0xff] }
 0x261   :  { %4530 = vmatprep.subr.bf16.mxu1 %v4529_v18  ;;  %v2058_v18 = vld [vmem:[#allocation8 + $0xbd8] sm:$0xff]  ;;  %v4263_v0 = vpack.c.bf16 %v2054_v14, %v2051_v56  ;;  %v2079_v52 = vld [vmem:[#allocation8 + $0xc80] sm:$0xff]  ;;  %v5155_v56 = vadd.f32 %v5096_v3, %v5126_v47  ;;  %v4275_v14 = vpack.c.bf16 %v2072_v28, %v2069_v51  ;;  %v5161_v3 = vadd.f32 %v5094_v59, %v706_v60  ;;  %v2096_v57 = vld [vmem:[#allocation8 + $0xd08] sm:$0xff] }
 0x262   :  { %4248 = vmatpush1.bf16.msra.mxu0 %v4247_v54  ;;  %v2095_v54 = vld [vmem:[#allocation8 + $0xd00] sm:$0xff]  ;;  %v4265_v30 = vpack.c.bf16 %v2061_v22, %v2058_v18  ;;  %v2218_v18 = vld [vmem:[#allocation8 + $0x10d8] sm:$0xff]  ;;  %v2100_v53 = vld [vmem:[#allocation8 + $0xd28] sm:$0xff] }
 0x263   :  { %3029 = vmatmul.mubr.f32.gmra.mrb[30].mxu1 %v1673_v7  ;;  %4250 = vmatprep.subr.bf16.mxu0 %v4249_v26  ;;  %v2149_v26 = vld [vmem:[#allocation8 + $0xeb0] sm:$0xff]  ;;  %v4547_v32 = vpack.c.bf16 %v2098_v2, %v2095_v54  ;;  %v2075_v22 = vld [vmem:[#allocation8 + $0xc60] sm:$0xff]  ;;  %v1675_v35 = vmax.f32 %v5161_v3, 0.0  ;;  %v2190_v3 = vld [vmem:[#allocation8 + $0xff8] sm:$0xff] }
 0x264   :  { %4532 = vmatpush3.bf16.msra.mxu1 %v4531_v31  ;;  %3098 = vmatprep.mubr.f32.mxu1 %v1664_v34  ;;  %v2057_v31 = vld [vmem:[#allocation8 + $0xbd0] sm:$0xff]  ;;  %v4549_v33 = vpack.c.bf16 %v2152_v27, %v2149_v26  ;;  %v2167_v47 = vld [vmem:[#allocation8 + $0xf40] sm:$0xff]  ;;  %v4279_v26 = vpack.c.bf16 %v2078_v49, %v2075_v22 }
 0x265   :  { %4534 = vmatprep.subr.bf16.mxu1 %v4533_v8  ;;  %v2064_v8 = vld [vmem:[#allocation8 + $0xc08] sm:$0xff]  ;;  %v4267_v55 = vpack.c.bf16 %v2060_v42, %v2057_v31  ;;  %v2221_v27 = vld [vmem:[#allocation8 + $0x10f0] sm:$0xff]  ;;  %v2091_v42 = vld [vmem:[#allocation8 + $0xce0] sm:$0xff] }
 0x266   :  { %4252 = vmatpush1.bf16.msra.mxu0 %v4251_v43  ;;  %v2101_v43 = vld [vmem:[#allocation8 + $0xd30] sm:$0xff]  ;;  %v4269_v37 = vpack.c.bf16 %v2067_v29, %v2064_v8  ;;  %v2088_v31 = vld [vmem:[#allocation8 + $0xcc8] sm:$0xff] }
 0x267   :  { %4254 = vmatprep.subr.bf16.mxu0 %v4253_v11  ;;  %v2155_v11 = vld [vmem:[#allocation8 + $0xee0] sm:$0xff]  ;;  %v4551_v20 = vpack.c.bf16 %v2104_v36, %v2101_v43  ;;  %v2173_v8 = vld [vmem:[#allocation8 + $0xf70] sm:$0xff]  ;;  %v2176_v29 = vld [vmem:[#allocation8 + $0xf88] sm:$0xff] }
 0x268   :  { %4536 = vmatpush3.bf16.msra.mxu1 %v4535_v50  ;;  %v2063_v50 = vld [vmem:[#allocation8 + $0xc00] sm:$0xff]  ;;  %v2230_v36 = vld [vmem:[#allocation8 + $0x1138] sm:$0xff] }
 0x269   :  { %4538 = vmatprep.subr.bf16.mxu1 %v4537_v45  ;;  %v2070_v45 = vld [vmem:[#allocation8 + $0xc38] sm:$0xff]  ;;  %v2227_v43 = vld [vmem:[#allocation8 + $0x1120] sm:$0xff] }
 0x26a   :  { %4256 = vmatpush1.bf16.msra.mxu0 %v4255_v44  ;;  %v4553_v44 = vpack.c.bf16 %v2158_v15, %v2155_v11  ;;  %v2087_v11 = vld [vmem:[#allocation8 + $0xcc0] sm:$0xff]  ;;  %v2090_v15 = vld [vmem:[#allocation8 + $0xcd8] sm:$0xff] }
 0x26b   :  { %4258 = vmatprep.subr.bf16.mxu0 %v4257_v24  ;;  %v4271_v24 = vpack.c.bf16 %v2066_v23, %v2063_v50  ;;  %v2097_v50 = vld [vmem:[#allocation8 + $0xd10] sm:$0xff]  ;;  %v4567_v23 = vpack.c.bf16 %v2176_v29, %v2173_v8  ;;  %v2254_v8 = vld [vmem:[#allocation8 + $0x11f8] sm:$0xff] }
 0x26c   :  { %4540 = vmatpush3.bf16.msra.mxu1 %v4539_v46  ;;  %v4273_v46 = vpack.c.bf16 %v2073_v40, %v2070_v45  ;;  %v2179_v45 = vld [vmem:[#allocation8 + $0xfa0] sm:$0xff]  ;;  %v2182_v40 = vld [vmem:[#allocation8 + $0xfb8] sm:$0xff] }
 0x26d   :  { %4542 = vmatprep.subr.bf16.mxu1 %v4541_v58  ;;  %v4555_v58 = vpack.c.bf16 %v2110_v61, %v2107_v39  ;;  %v2236_v39 = vld [vmem:[#allocation8 + $0x1168] sm:$0xff]  ;;  %v4571_v51 = vpack.c.bf16 %v2182_v40, %v2179_v45  ;;  %v2117_v45 = vld [vmem:[#allocation8 + $0xdb0] sm:$0xff] }
 0x26e   :  { %4260 = vmatpush1.bf16.msra.mxu0 %v4259_v1  ;;  %v5149_v1 = vadd.f32 %v5090_v38, %v706_v60  ;;  %v4277_v38 = vpack.c.bf16 %v2079_v52, %v2076_v62  ;;  %v4287_v60 = vpack.c.bf16 %v2090_v15, %v2087_v11  ;;  %v2188_v62 = vld [vmem:[#allocation8 + $0xfe8] sm:$0xff] }
 0x26f   :  { %4262 = vmatprep.subr.bf16.mxu0 %v4261_v9  ;;  %v2164_v9 = vld [vmem:[#allocation8 + $0xf28] sm:$0xff] }
 0x270   :  { %4544 = vmatpush3.bf16.msra.mxu1 %v4543_v16  ;;  %v2215_v16 = vld [vmem:[#allocation8 + $0x10c0] sm:$0xff]  ;;  %v4559_v54 = vpack.c.bf16 %v2164_v9, %v2161_v6  ;;  %v1663_v2 = vmax.f32 %v5149_v1, 0.0  ;;  %v2242_v6 = vld [vmem:[#allocation8 + $0x1198] sm:$0xff]  ;;  %v2120_v40 = vld [vmem:[#allocation8 + $0xdc8] sm:$0xff] }
 0x271   :  { %4546 = vmatprep.subr.bf16.mxu1 %v4545_v25  ;;  %v2085_v25 = vld [vmem:[#allocation8 + $0xcb0] sm:$0xff]  ;;  %v4561_v63 = vpack.c.bf16 %v2218_v18, %v2215_v16  ;;  %v2102_v16 = vld [vmem:[#allocation8 + $0xd38] sm:$0xff] }
 0x272   :  { %4264 = vmatpush1.bf16.msra.mxu0 %v4263_v0  ;;  %v1676_v0 = vmax.f32 %v5155_v56, 0.0  ;;  %v2106_v18 = vld [vmem:[#allocation8 + $0xd58] sm:$0xff]  ;;  %v2181_v1 = vld [vmem:[#allocation8 + $0xfb0] sm:$0xff] }
 0x273   :  { %4266 = vmatprep.subr.bf16.mxu0 %v4265_v30  ;;  %v2224_v30 = vld [vmem:[#allocation8 + $0x1108] sm:$0xff] }
 0x274   :  { %4548 = vmatpush3.bf16.msra.mxu1 %v4547_v32 }
 0x275   :  { %4550 = vmatprep.subr.bf16.mxu1 %v4549_v33 }
 0x276   :  { %4268 = vmatpush1.bf16.msra.mxu0 %v4267_v55  ;;  %v4285_v55 = vpack.c.bf16 %v2091_v42, %v2088_v31  ;;  %v2197_v31 = vld [vmem:[#allocation8 + $0x1030] sm:$0xff]  ;;  %v2200_v42 = vld [vmem:[#allocation8 + $0x1048] sm:$0xff] }
 0x277   :  { %4270 = vmatprep.subr.bf16.mxu0 %v4269_v37  ;;  %v2094_v37 = vld [vmem:[#allocation8 + $0xcf8] sm:$0xff]  ;;  %v4583_v11 = vpack.c.bf16 %v2200_v42, %v2197_v31  ;;  %v714_v31 = vrot.slane %v5118_v4, %v5043_v5 }
 0x278   :  { %4552 = vmatpush3.bf16.msra.mxu1 %v4551_v20  ;;  %v4569_v20 = vpack.c.bf16 %v2230_v36, %v2227_v43  ;;  %v4289_v61 = vpack.c.bf16 %v2097_v50, %v2094_v37  ;;  %v2114_v43 = vld [vmem:[#allocation8 + $0xd98] sm:$0xff]  ;;  %v2203_v37 = vld [vmem:[#allocation8 + $0x1060] sm:$0xff] }
 0x279   :  { %2568 = vmatmul.mubr.f32.vlgmr.msra.gmra.mrb[8].mxu0 %v1661_v17  ;;  %4554 = vmatprep.subr.bf16.mxu1 %v4553_v44  ;;  %v2082_v17 = vld [vmem:[#allocation8 + $0xc98] sm:$0xff]  ;;  %v2233_v44 = vld [vmem:[#allocation8 + $0x1150] sm:$0xff] }
 0x27a   :  { %2573 = vmatprep.mubr.f32.mxu0 %v1674_v10  ;;  %4272 = vmatpush1.bf16.msra.mxu0 %v4271_v24  ;;  %v2170_v10 = vld [vmem:[#allocation8 + $0xf58] sm:$0xff]  ;;  %v4281_v59 = vpack.c.bf16 %v2085_v25, %v2082_v17  ;;  %v2093_v24 = vld [vmem:[#allocation8 + $0xcf0] sm:$0xff]  ;;  %v4573_v28 = vpack.c.bf16 %v2236_v39, %v2233_v44  ;;  %v2191_v17 = vld [vmem:[#allocation8 + $0x1000] sm:$0xff] }
 0x27b   :  { %4274 = vmatprep.subr.bf16.mxu0 %v4273_v46  ;;  %v4563_v32 = vpack.c.bf16 %v2170_v10, %v2167_v47  ;;  %v2103_v46 = vld [vmem:[#allocation8 + $0xd40] sm:$0xff]  ;;  %v4291_v52 = vpack.c.bf16 %v2096_v57, %v2093_v24  ;;  %v2194_v25 = vld [vmem:[#allocation8 + $0x1018] sm:$0xff]  ;;  %v2248_v47 = vld [vmem:[#allocation8 + $0x11c8] sm:$0xff] }
 0x27c   :  { %4556 = vmatpush3.bf16.msra.mxu1 %v4555_v58  ;;  %v2185_v58 = vld [vmem:[#allocation8 + $0xfd0] sm:$0xff]  ;;  %v4293_v9 = vpack.c.bf16 %v2103_v46, %v2100_v53  ;;  %v2118_v36 = vld [vmem:[#allocation8 + $0xdb8] sm:$0xff]  ;;  %v2127_v44 = vld [vmem:[#allocation8 + $0xe00] sm:$0xff] }
 0x27d   :  { %2574 = vmatmul.mubr.f32.gmra.mrb[10].mxu0 %v1673_v7  ;;  %4558 = vmatprep.subr.bf16.mxu1 %v4557_v41  ;;  %v2084_v7 = vld [vmem:[#allocation8 + $0xca8] sm:$0xff]  ;;  %v2239_v41 = vld [vmem:[#allocation8 + $0x1180] sm:$0xff]  ;;  %v4575_v22 = vpack.c.bf16 %v2188_v62, %v2185_v58  ;;  %v2206_v50 = vld [vmem:[#allocation8 + $0x1078] sm:$0xff] }
 0x27e   :  { %4276 = vmatpush1.bf16.msra.mxu0 %v4275_v14  ;;  %2644 = vmatprep.mubr.f32.mxu0 %v1664_v34  ;;  %v4565_v34 = vpack.c.bf16 %v2224_v30, %v2221_v27  ;;  %v4283_v33 = vpack.c.bf16 %v2084_v7, %v2081_v12  ;;  %v2099_v14 = vld [vmem:[#allocation8 + $0xd20] sm:$0xff]  ;;  %v4577_v49 = vpack.c.bf16 %v2242_v6, %v2239_v41  ;;  %v2108_v27 = vld [vmem:[#allocation8 + $0xd68] sm:$0xff]  ;;  %v2126_v53 = vld [vmem:[#allocation8 + $0xdf8] sm:$0xff] }
 0x27f   :  { %3099 = vmatmul.mubr.f32.vlgmr.msra.gmra.mrb[32].mxu1 %v1663_v2  ;;  %4278 = vmatprep.subr.bf16.mxu0 %v4277_v38  ;;  %v2109_v38 = vld [vmem:[#allocation8 + $0xd70] sm:$0xff]  ;;  %v2112_v30 = vld [vmem:[#allocation8 + $0xd88] sm:$0xff]  ;;  %v4579_v12 = vpack.c.bf16 %v2194_v25, %v2191_v17  ;;  %v4587_v39 = vpack.c.bf16 %v2206_v50, %v2203_v37  ;;  %v2123_v57 = vld [vmem:[#allocation8 + $0xde0] sm:$0xff] }
 0x280   :  { %3103 = vmatprep.mubr.f32.mxu1 %v1676_v0  ;;  %4560 = vmatpush3.bf16.msra.mxu1 %v4559_v54  ;;  %v4295_v54 = vpack.c.bf16 %v2102_v16, %v2099_v14  ;;  %v4297_v10 = vpack.c.bf16 %v2109_v38, %v2106_v18  ;;  %v2130_v46 = vld [vmem:[#allocation8 + $0xe18] sm:$0xff]  ;;  %v2129_v62 = vld [vmem:[#allocation8 + $0xe10] sm:$0xff]  ;;  %v2136_v41 = vld [vmem:[#allocation8 + $0xe48] sm:$0xff] }
 0x281   :  { %4562 = vmatprep.subr.bf16.mxu1 %v4561_v63  ;;  %v2245_v63 = vld [vmem:[#allocation8 + $0x11b0] sm:$0xff]  ;;  %v2139_v6 = vld [vmem:[#allocation8 + $0xe60] sm:$0xff]  ;;  %v2138_v18 = vld [vmem:[#allocation8 + $0xe58] sm:$0xff] }
 0x282   :  { %4280 = vmatpush1.bf16.msra.mxu0 %v4279_v26  ;;  %v2105_v26 = vld [vmem:[#allocation8 + $0xd50] sm:$0xff]  ;;  %v4581_v7 = vpack.c.bf16 %v2248_v47, %v2245_v63  ;;  %v4317_v14 = vpack.c.bf16 %v2139_v6, %v2136_v41  ;;  %v2135_v16 = vld [vmem:[#allocation8 + $0xe40] sm:$0xff]  ;;  %v2142_v38 = vld [vmem:[#allocation8 + $0xe78] sm:$0xff] }
 0x283   :  { %3104 = vmatmul.mubr.f32.gmra.mrb[34].mxu1 %v1675_v35  ;;  %4282 = vmatprep.subr.bf16.mxu0 %v4281_v59  ;;  %v2115_v59 = vld [vmem:[#allocation8 + $0xda0] sm:$0xff]  ;;  %v2141_v25 = vld [vmem:[#allocation8 + $0xe70] sm:$0xff]  ;;  %v2148_v63 = vld [vmem:[#allocation8 + $0xea8] sm:$0xff] }
 0x284   :  { %4564 = vmatpush3.bf16.msra.mxu1 %v4563_v32  ;;  %v4299_v32 = vpack.c.bf16 %v2108_v27, %v2105_v26  ;;  %v4301_v29 = vpack.c.bf16 %v2115_v59, %v2112_v30  ;;  %v2151_v47 = vld [vmem:[#allocation8 + $0xec0] sm:$0xff]  ;;  %v2150_v30 = vld [vmem:[#allocation8 + $0xeb8] sm:$0xff] }
 0x285   :  { %4566 = vmatprep.subr.bf16.mxu1 %v4565_v34  ;;  %v2251_v34 = vld [vmem:[#allocation8 + $0x11e0] sm:$0xff]  ;;  %v4325_v26 = vpack.c.bf16 %v2151_v47, %v2148_v63  ;;  %v2154_v59 = vld [vmem:[#allocation8 + $0xed8] sm:$0xff]  ;;  %v2192_v63 = vld [vmem:[#allocation8 + $0x1008] sm:$0xff] }
 0x286   :  { %4284 = vmatpush1.bf16.msra.mxu0 %v4283_v33  ;;  %v2111_v33 = vld [vmem:[#allocation8 + $0xd80] sm:$0xff]  ;;  %v4585_v15 = vpack.c.bf16 %v2254_v8, %v2251_v34  ;;  %v2156_v34 = vld [vmem:[#allocation8 + $0xee8] sm:$0xff]  ;;  %v718_v8 = vrot.slane %v5118_v4, %v685_v48  ;;  %v2162_v50 = vld [vmem:[#allocation8 + $0xf18] sm:$0xff] }
 0x287   :  { %4286 = vmatprep.subr.bf16.mxu0 %v4285_v55  ;;  %v2121_v55 = vld [vmem:[#allocation8 + $0xdd0] sm:$0xff]  ;;  %v2147_v27 = vld [vmem:[#allocation8 + $0xea0] sm:$0xff]  ;;  %v2174_v41 = vld [vmem:[#allocation8 + $0xf78] sm:$0xff] }
 0x288   :  { %4568 = vmatpush3.bf16.msra.mxu1 %v4567_v23  ;;  %v4303_v23 = vpack.c.bf16 %v2114_v43, %v2111_v33  ;;  %v2163_v33 = vld [vmem:[#allocation8 + $0xf20] sm:$0xff]  ;;  %v2178_v6 = vld [vmem:[#allocation8 + $0xf98] sm:$0xff]  ;;  %v2196_v47 = vld [vmem:[#allocation8 + $0x1028] sm:$0xff] }
 0x289   :  { %4570 = vmatprep.subr.bf16.mxu1 %v4569_v20  ;;  %v4305_v20 = vpack.c.bf16 %v2121_v55, %v2118_v36  ;;  %v2159_v37 = vld [vmem:[#allocation8 + $0xf00] sm:$0xff] }
 0x28a   :  { %4288 = vmatpush1.bf16.msra.mxu0 %v4287_v60  ;;  %v2124_v60 = vld [vmem:[#allocation8 + $0xde8] sm:$0xff]  ;;  %v4335_v4 = vpack.c.bf16 %v2162_v50, %v2159_v37  ;;  %v2210_v37 = vld [vmem:[#allocation8 + $0x1098] sm:$0xff] }
 0x28b   :  { %4290 = vmatprep.subr.bf16.mxu0 %v4289_v61  ;;  %v4307_v61 = vpack.c.bf16 %v2120_v40, %v2117_v45  ;;  %v4309_v24 = vpack.c.bf16 %v2127_v44, %v2124_v60  ;;  %v2169_v45 = vld [vmem:[#allocation8 + $0xf50] sm:$0xff] }
 0x28c   :  { %4572 = vmatpush3.bf16.msra.mxu1 %v4571_v51  ;;  %v2133_v51 = vld [vmem:[#allocation8 + $0xe30] sm:$0xff] }
 0x28d   :  { %4574 = vmatprep.subr.bf16.mxu1 %v4573_v28  ;;  %v4311_v28 = vpack.c.bf16 %v2126_v53, %v2123_v57  ;;  %v4313_v58 = vpack.c.bf16 %v2133_v51, %v2130_v46  ;;  %v2172_v53 = vld [vmem:[#allocation8 + $0xf68] sm:$0xff]  ;;  %v2175_v46 = vld [vmem:[#allocation8 + $0xf80] sm:$0xff] }
 0x28e   :  { %4292 = vmatpush1.bf16.msra.mxu0 %v4291_v52  ;;  %v2132_v52 = vld [vmem:[#allocation8 + $0xe28] sm:$0xff] }
 0x28f   :  { %4294 = vmatprep.subr.bf16.mxu0 %v4293_v9  ;;  %v4315_v9 = vpack.c.bf16 %v2132_v52, %v2129_v62  ;;  %v4341_v62 = vpack.c.bf16 %v2175_v46, %v2172_v53  ;;  %v2171_v52 = vld [vmem:[#allocation8 + $0xf60] sm:$0xff] }
 0x290   :  { %4576 = vmatpush3.bf16.msra.mxu1 %v4575_v22  ;;  %v2145_v22 = vld [vmem:[#allocation8 + $0xe90] sm:$0xff]  ;;  %v4343_v56 = vpack.c.bf16 %v2174_v41, %v2171_v52  ;;  %v2223_v53 = vld [vmem:[#allocation8 + $0x1100] sm:$0xff]  ;;  %v2222_v52 = vld [vmem:[#allocation8 + $0x10f8] sm:$0xff] }
 0x291   :  { %4578 = vmatprep.subr.bf16.mxu1 %v4577_v49  ;;  %v4319_v49 = vpack.c.bf16 %v2138_v18, %v2135_v16  ;;  %v4321_v17 = vpack.c.bf16 %v2145_v22, %v2142_v38  ;;  %v2187_v16 = vld [vmem:[#allocation8 + $0xfe0] sm:$0xff]  ;;  %v2226_v41 = vld [vmem:[#allocation8 + $0x1118] sm:$0xff] }
 0x292   :  { %4296 = vmatpush1.bf16.msra.mxu0 %v4295_v54  ;;  %v2144_v54 = vld [vmem:[#allocation8 + $0xe88] sm:$0xff]  ;;  %v2183_v22 = vld [vmem:[#allocation8 + $0xfc0] sm:$0xff] }
 0x293   :  { %4298 = vmatprep.subr.bf16.mxu0 %v4297_v10  ;;  %v4323_v10 = vpack.c.bf16 %v2144_v54, %v2141_v25  ;;  %v2189_v54 = vld [vmem:[#allocation8 + $0xff0] sm:$0xff] }
 0x294   :  { %4580 = vmatpush3.bf16.msra.mxu1 %v4579_v12  ;;  %v2157_v12 = vld [vmem:[#allocation8 + $0xef0] sm:$0xff] }
 0x295   :  { %4582 = vmatprep.subr.bf16.mxu1 %v4581_v7  ;;  %v4327_v7 = vpack.c.bf16 %v2150_v30, %v2147_v27  ;;  %v4329_v42 = vpack.c.bf16 %v2157_v12, %v2154_v59  ;;  %v2195_v30 = vld [vmem:[#allocation8 + $0x1020] sm:$0xff]  ;;  %v2198_v59 = vld [vmem:[#allocation8 + $0x1038] sm:$0xff] }
 0x296   :  { %4300 = vmatpush1.bf16.msra.mxu0 %v4299_v32  ;;  %v2153_v32 = vld [vmem:[#allocation8 + $0xed0] sm:$0xff]  ;;  %v2202_v12 = vld [vmem:[#allocation8 + $0x1058] sm:$0xff] }
 0x297   :  { %4302 = vmatprep.subr.bf16.mxu0 %v4301_v29  ;;  %v2160_v29 = vld [vmem:[#allocation8 + $0xf08] sm:$0xff]  ;;  %v4331_v36 = vpack.c.bf16 %v2156_v34, %v2153_v32  ;;  %v2201_v32 = vld [vmem:[#allocation8 + $0x1050] sm:$0xff] }
 0x298   :  { %4584 = vmatpush3.bf16.msra.mxu1 %v4583_v11  ;;  %v2204_v34 = vld [vmem:[#allocation8 + $0x1068] sm:$0xff] }
 0x299   :  { %4586 = vmatprep.subr.bf16.mxu1 %v4585_v15  ;;  %v4333_v15 = vpack.c.bf16 %v2163_v33, %v2160_v29  ;;  %v2211_v29 = vld [vmem:[#allocation8 + $0x10a0] sm:$0xff] }
 0x29a   :  { %4304 = vmatpush1.bf16.msra.mxu0 %v4303_v23 }
 0x29b   :  { %4306 = vmatprep.subr.bf16.mxu0 %v4305_v20  ;;  %v2166_v20 = vld [vmem:[#allocation8 + $0xf38] sm:$0xff] }
 0x29c   :  { %4588 = vmatpush3.bf16.msra.mxu1 %v4587_v39  ;;  %v4337_v39 = vpack.c.bf16 %v2169_v45, %v2166_v20  ;;  %v2217_v20 = vld [vmem:[#allocation8 + $0x10d0] sm:$0xff] }
 0x29e   :  { %4308 = vmatpush1.bf16.msra.mxu0 %v4307_v61  ;;  %v2165_v61 = vld [vmem:[#allocation8 + $0xf30] sm:$0xff] }
 0x29f   :  { %4310 = vmatprep.subr.bf16.mxu0 %v4309_v24  ;;  %v2168_v24 = vld [vmem:[#allocation8 + $0xf48] sm:$0xff] }
 0x2a2   :  { %4312 = vmatpush1.bf16.msra.mxu0 %v4311_v28 }
 0x2a3   :  { %4314 = vmatprep.subr.bf16.mxu0 %v4313_v58  ;;  %v4339_v58 = vpack.c.bf16 %v2168_v24, %v2165_v61  ;;  %v2220_v24 = vld [vmem:[#allocation8 + $0x10e8] sm:$0xff] }
 0x2a6   :  { %4316 = vmatpush1.bf16.msra.mxu0 %v4315_v9  ;;  %v2180_v9 = vld [vmem:[#allocation8 + $0xfa8] sm:$0xff] }
 0x2a7   :  { %4318 = vmatprep.subr.bf16.mxu0 %v4317_v14  ;;  %v2184_v14 = vld [vmem:[#allocation8 + $0xfc8] sm:$0xff] }
 0x2a8   :  { %v4349_v38 = vpack.c.bf16 %v2187_v16, %v2184_v14  ;;  %v2235_v14 = vld [vmem:[#allocation8 + $0x1160] sm:$0xff] }
 0x2aa   :  { %4320 = vmatpush1.bf16.msra.mxu0 %v4319_v49  ;;  %v2186_v49 = vld [vmem:[#allocation8 + $0xfd8] sm:$0xff] }
 0x2ab   :  { %4322 = vmatprep.subr.bf16.mxu0 %v4321_v17  ;;  %v4351_v17 = vpack.c.bf16 %v2186_v49, %v2183_v22  ;;  %v2234_v22 = vld [vmem:[#allocation8 + $0x1158] sm:$0xff] }
 0x2ac   :  { %v2238_v49 = vld [vmem:[#allocation8 + $0x1178] sm:$0xff] }
 0x2ae   :  { %4324 = vmatpush1.bf16.msra.mxu0 %v4323_v10  ;;  %v2199_v10 = vld [vmem:[#allocation8 + $0x1040] sm:$0xff] }
 0x2af   :  { %4326 = vmatprep.subr.bf16.mxu0 %v4325_v26  ;;  %v4355_v26 = vpack.c.bf16 %v2192_v63, %v2189_v54  ;;  %v4357_v27 = vpack.c.bf16 %v2199_v10, %v2196_v47  ;;  %v2240_v54 = vld [vmem:[#allocation8 + $0x1188] sm:$0xff]  ;;  %v2247_v47 = vld [vmem:[#allocation8 + $0x11c0] sm:$0xff] }
 0x2b0   :  { %v2244_v63 = vld [vmem:[#allocation8 + $0x11a8] sm:$0xff] }
 0x2b2   :  { %4328 = vmatpush1.bf16.msra.mxu0 %v4327_v7  ;;  %v1644_v43 = vpop.f32.mrb[12].mxu1  ;;  %v2205_v7 = vld [vmem:[#allocation8 + $0x1070] sm:$0xff] }
 0x2b3   :  { %v5180_v55 = vadd.f32 %v1644_v43, %v714_v31  ;;  %v1646_v11 = vpop.f32.mrb[13].mxu1  ;;  %4330 = vmatprep.subr.bf16.mxu0 %v4329_v42  ;;  %v4361_v42 = vpack.c.bf16 %v2205_v7, %v2202_v12  ;;  %v4363_v43 = vpack.c.bf16 %v2204_v34, %v2201_v32  ;;  %v2253_v12 = vld [vmem:[#allocation8 + $0x11f0] sm:$0xff]  ;;  %v2255_v7 = vld [vmem:[#allocation10] sm:$0x7]  ;;  %v2252_v34 = vld [vmem:[#allocation8 + $0x11e8] sm:$0xff] }
 0x2b4   :  { %v4610_v23 = vadd.f32 %v1646_v11, %v718_v8  ;;  %v2249_v32 = vld [vmem:[#allocation8 + $0x11d0] sm:$0xff] }
 0x2b5   :  { %v1665_v40 = vmax.f32 %v5180_v55, 0.0 }
 0x2b6   :  { %v1666_v13 = vmax.f32 %v4610_v23, 0.0  ;;  %4332 = vmatpush1.bf16.msra.mxu0 %v4331_v36  ;;  %v1650_v48 = vpop.f32.mrb[14].mxu1  ;;  %v2214_v23 = vld [vmem:[#allocation8 + $0x10b8] sm:$0xff] }
 0x2b7   :  { %v5183_v60 = vadd.f32 %v1650_v48, %v714_v31  ;;  %v1652_v44 = vpop.f32.mrb[15].mxu1  ;;  %4334 = vmatprep.subr.bf16.mxu0 %v4333_v15  ;;  %v4359_v31 = vpack.c.bf16 %v2198_v59, %v2195_v30  ;;  %v2207_v15 = vld [vmem:[#allocation8 + $0x1080] sm:$0xff]  ;;  %v2246_v30 = vld [vmem:[#allocation8 + $0x11b8] sm:$0xff] }
 0x2b8   :  { %v5185_v57 = vadd.f32 %v1652_v44, %v718_v8  ;;  %3173 = vmatprep.mubr.f32.mxu1 %v1666_v13  ;;  %v2208_v8 = vld [vmem:[#allocation8 + $0x1088] sm:$0xff]  ;;  %v2213_v44 = vld [vmem:[#allocation8 + $0x10b0] sm:$0xff]  ;;  %v2250_v59 = vld [vmem:[#allocation8 + $0x11d8] sm:$0xff] }
 0x2b9   :  { %v1677_v51 = vmax.f32 %v5183_v60, 0.0  ;;  %2645 = vmatmul.mubr.f32.vlgmr.msra.gmra.mrb[8].mxu0 %v1663_v2  ;;  %3174 = vmatmul.mubr.f32.vlgmr.msra.gmra.mrb[36].mxu1 %v1665_v40  ;;  %v4345_v2 = vpack.c.bf16 %v2181_v1, %v2178_v6  ;;  %v4365_v11 = vpack.c.bf16 %v2211_v29, %v2208_v8  ;;  %v2229_v6 = vld [vmem:[#allocation8 + $0x1130] sm:$0xff]  ;;  %v2268_v8 = vrot.slane %v2255_v7, %v5043_v5 }
 0x2ba   :  { %v1678_v28 = vmax.f32 %v5185_v57, 0.0  ;;  %2650 = vmatprep.mubr.f32.mxu0 %v1676_v0  ;;  %4336 = vmatpush1.bf16.msra.mxu0 %v4335_v4  ;;  %v2177_v0 = vld [vmem:[#allocation8 + $0xf90] sm:$0xff]  ;;  %v4369_v4 = vpack.c.bf16 %v2217_v20, %v2214_v23 }
 0x2bb   :  { %4338 = vmatprep.subr.bf16.mxu0 %v4337_v39  ;;  %v4347_v18 = vpack.c.bf16 %v2180_v9, %v2177_v0  ;;  %v2216_v39 = vld [vmem:[#allocation8 + $0x10c8] sm:$0xff] }
 0x2bc   :  { %3178 = vmatprep.mubr.f32.mxu1 %v1678_v28  ;;  %v4371_v46 = vpack.c.bf16 %v2216_v39, %v2213_v44  ;;  %v2228_v0 = vld [vmem:[#allocation8 + $0x1128] sm:$0xff] }
 0x2bd   :  { %2651 = vmatmul.mubr.f32.gmra.mrb[10].mxu0 %v1675_v35  ;;  %3179 = vmatmul.mubr.f32.gmra.mrb[38].mxu1 %v1677_v51  ;;  %v2193_v35 = vld [vmem:[#allocation8 + $0x1010] sm:$0xff]  ;;  %v2232_v9 = vld [vmem:[#allocation8 + $0x1148] sm:$0xff] }
 0x2be   :  { %4340 = vmatpush1.bf16.msra.mxu0 %v4339_v58  ;;  %2721 = vmatprep.mubr.f32.mxu0 %v1666_v13  ;;  %v4353_v25 = vpack.c.bf16 %v2193_v35, %v2190_v3  ;;  %v4367_v13 = vpack.c.bf16 %v2210_v37, %v2207_v15  ;;  %v4373_v58 = vpack.c.bf16 %v2223_v53, %v2220_v24  ;;  %v2241_v3 = vld [vmem:[#allocation8 + $0x1190] sm:$0xff] }
 0x2bf   :  { %4342 = vmatprep.subr.bf16.mxu0 %v4341_v62  ;;  %v2219_v62 = vld [vmem:[#allocation8 + $0x10e0] sm:$0xff] }
 0x2c0   :  { %v4375_v1 = vpack.c.bf16 %v2222_v52, %v2219_v62 }
 0x2c2   :  { %4344 = vmatpush1.bf16.msra.mxu0 %v4343_v56  ;;  %v4377_v56 = vpack.c.bf16 %v2229_v6, %v2226_v41 }
 0x2c3   :  { %4346 = vmatprep.subr.bf16.mxu0 %v4345_v2  ;;  %v2225_v2 = vld [vmem:[#allocation8 + $0x1110] sm:$0xff] }
 0x2c4   :  { %v4379_v16 = vpack.c.bf16 %v2228_v0, %v2225_v2 }
 0x2c6   :  { %4348 = vmatpush1.bf16.msra.mxu0 %v4347_v18  ;;  %v4381_v18 = vpack.c.bf16 %v2235_v14, %v2232_v9 }
 0x2c7   :  { %4350 = vmatprep.subr.bf16.mxu0 %v4349_v38  ;;  %v2231_v38 = vld [vmem:[#allocation8 + $0x1140] sm:$0xff] }
 0x2c8   :  { %v4383_v35 = vpack.c.bf16 %v2234_v22, %v2231_v38 }
 0x2ca   :  { %4352 = vmatpush1.bf16.msra.mxu0 %v4351_v17  ;;  %v4385_v17 = vpack.c.bf16 %v2241_v3, %v2238_v49  ;;  %v2260_v3 = vrot.slane %v2255_v7, %v4995_v19 }
 0x2cb   :  { %4354 = vmatprep.subr.bf16.mxu0 %v4353_v25  ;;  %v2237_v25 = vld [vmem:[#allocation8 + $0x1170] sm:$0xff] }
 0x2cc   :  { %v4387_v10 = vpack.c.bf16 %v2240_v54, %v2237_v25 }
 0x2ce   :  { %4356 = vmatpush1.bf16.msra.mxu0 %v4355_v26  ;;  %v4389_v26 = vpack.c.bf16 %v2247_v47, %v2244_v63 }
 0x2cf   :  { %4358 = vmatprep.subr.bf16.mxu0 %v4357_v27  ;;  %v2243_v27 = vld [vmem:[#allocation8 + $0x11a0] sm:$0xff] }
 0x2d2   :  { %4360 = vmatpush1.bf16.msra.mxu0 %v4359_v31  ;;  %v3241_v33 = vpop.f32.mrb[16].mxu1  ;;  %v4391_v31 = vpack.c.bf16 %v2246_v30, %v2243_v27 }
 0x2d3   :  { %v3242_v36 = vpop.f32.mrb[17].mxu1  ;;  %4362 = vmatprep.subr.bf16.mxu0 %v4361_v42  ;;  %v4393_v42 = vpack.c.bf16 %v2253_v12, %v2250_v59 }
 0x2d4   :  { %v5201_v50 = vadd.f32 %v3242_v36, %v3241_v33  ;;  %v4395_v33 = vpack.c.bf16 %v2252_v34, %v2249_v32 }
 0x2d6   :  { %4364 = vmatpush1.bf16.msra.mxu0 %v4363_v43  ;;  %v3244_v45 = vpop.f32.mrb[18].mxu1  ;;  %v2801_v36 = vadd.f32 %v5201_v50, %v2268_v8 }
 0x2d7   :  { %v3245_v48 = vpop.f32.mrb[19].mxu1  ;;  %4366 = vmatprep.subr.bf16.mxu0 %v4365_v11 }
 0x2d8   :  { %v3246_v61 = vadd.f32 %v3245_v48, %v3244_v45 }
 0x2da   :  { %4368 = vmatpush1.bf16.msra.mxu0 %v4367_v13  ;;  %v2806_v20 = vadd.f32 %v3246_v61, %v2268_v8 }
 0x2db   :  { %4370 = vmatprep.subr.bf16.mxu0 %v4369_v4 }
 0x2de   :  { %4372 = vmatpush1.bf16.msra.mxu0 %v4371_v46 }
 0x2df   :  { %4374 = vmatprep.subr.bf16.mxu0 %v4373_v58 }
 0x2e2   :  { %4376 = vmatpush1.bf16.msra.mxu0 %v4375_v1 }
 0x2e3   :  { %4378 = vmatprep.subr.bf16.mxu0 %v4377_v56 }
 0x2e6   :  { %4380 = vmatpush1.bf16.msra.mxu0 %v4379_v16 }
 0x2e7   :  { %4382 = vmatprep.subr.bf16.mxu0 %v4381_v18 }
 0x2ea   :  { %4384 = vmatpush1.bf16.msra.mxu0 %v4383_v35  ;;  %v2264_v35 = vrot.slane %v2255_v7, %v5000_v21 }
 0x2eb   :  { %4386 = vmatprep.subr.bf16.mxu0 %v4385_v17 }
 0x2ee   :  { %4388 = vmatpush1.bf16.msra.mxu0 %v4387_v10 }
 0x2ef   :  { %4390 = vmatprep.subr.bf16.mxu0 %v4389_v26 }
 0x2f2   :  { %4392 = vmatpush1.bf16.msra.mxu0 %v4391_v31  ;;  %v3279_v29 = vpop.f32.mrb[20].mxu1 }
 0x2f3   :  { %v3280_v43 = vpop.f32.mrb[21].mxu1  ;;  %4394 = vmatprep.subr.bf16.mxu0 %v4393_v42 }
 0x2f4   :  { %v3281_v11 = vadd.f32 %v3280_v43, %v3279_v29 }
 0x2f6   :  { %v2876_v15 = vadd.f32 %v3281_v11, %v2801_v36  ;;  %4396 = vmatpush1.bf16.msra.mxu0 %v4395_v33  ;;  %v3282_v37 = vpop.f32.mrb[22].mxu1 }
 0x2f7   :  { %v3283_v23 = vpop.f32.mrb[23].mxu1 }
 0x2f8   :  { %v3284_v45 = vadd.f32 %v3283_v23, %v3282_v37 }
 0x2f9   :  { %2722 = vmatmul.mubr.f32.vlgmr.msra.gmra.mrb[8].mxu0 %v1665_v40 }
 0x2fa   :  { %v2881_v13 = vadd.f32 %v3284_v45, %v2806_v20  ;;  %2727 = vmatprep.mubr.f32.mxu0 %v1678_v28 }
 0x2fd   :  { %2728 = vmatmul.mubr.f32.gmra.mrb[10].mxu0 %v1677_v51 }
 0x312   :  { %v3317_v5 = vpop.f32.mrb[24].mxu1 }
 0x313   :  { %v3318_v48 = vpop.f32.mrb[25].mxu1 }
 0x314   :  { %v3319_v50 = vadd.f32 %v3318_v48, %v3317_v5 }
 0x316   :  { %v2951_v4 = vadd.f32 %v3319_v50, %v2876_v15  ;;  %v3320_v44 = vpop.f32.mrb[26].mxu1 }
 0x317   :  { %v3321_v39 = vpop.f32.mrb[27].mxu1 }
 0x318   :  { %v3322_v24 = vadd.f32 %v3321_v39, %v3320_v44 }
 0x31a   :  { %v2956_v53 = vadd.f32 %v3322_v24, %v2881_v13 }
 0x332   :  { %v3355_v61 = vpop.f32.mrb[28].mxu1 }
 0x333   :  { %v3356_v46 = vpop.f32.mrb[29].mxu1 }
 0x334   :  { %v3357_v58 = vadd.f32 %v3356_v46, %v3355_v61 }
 0x336   :  { %v3026_v55 = vadd.f32 %v3357_v58, %v2951_v4  ;;  %v3358_v40 = vpop.f32.mrb[30].mxu1 }
 0x337   :  { %v3359_v62 = vpop.f32.mrb[31].mxu1 }
 0x338   :  { %v3360_v52 = vadd.f32 %v3359_v62, %v3358_v40 }
 0x33a   :  { %v3031_v57 = vadd.f32 %v3360_v52, %v2956_v53 }
 0x352   :  { %v3393_v28 = vpop.f32.mrb[32].mxu1 }
 0x353   :  { %v3394_v41 = vpop.f32.mrb[33].mxu1 }
 0x354   :  { %v3395_v60 = vadd.f32 %v3394_v41, %v3393_v28 }
 0x356   :  { %v3101_v51 = vadd.f32 %v3395_v60, %v3026_v55  ;;  %v3396_v6 = vpop.f32.mrb[34].mxu1 }
 0x357   :  { %v3397_v1 = vpop.f32.mrb[35].mxu1 }
 0x358   :  { %v3398_v56 = vadd.f32 %v3397_v1, %v3396_v6 }
 0x35a   :  { %v3106_v2 = vadd.f32 %v3398_v56, %v3031_v57 }
 0x38c   :  { %v3431_v0 = vpop.f32.mrb[36].mxu1 }
 0x38d   :  { %v3432_v9 = vpop.f32.mrb[37].mxu1 }
 0x38e   :  { %v3433_v14 = vadd.f32 %v3432_v9, %v3431_v0 }
 0x390   :  { %v3176_v16 = vadd.f32 %v3433_v14, %v3101_v51  ;;  %v3434_v18 = vpop.f32.mrb[38].mxu1 }
 0x391   :  { %v3435_v38 = vpop.f32.mrb[39].mxu1 }
 0x392   :  { %3186 = vst [vmem:[#allocation11 + $0x10] sm:$0xff] %v3176_v16  ;;  %v3436_v22 = vadd.f32 %v3435_v38, %v3434_v18 }
 0x394   :  { %v3181_v49 = vadd.f32 %v3436_v22, %v3106_v2 }
 0x396   :  { %3189 = vst [vmem:[#allocation11 + $0x28] sm:$0xff] %v3181_v49 }
 0x3cc   :  { %v2723_v17 = vpop.f32.mrb[8].mxu0 }
 0x3cd   :  { %v4613_v25 = vadd.f32 %v2723_v17, %v2260_v3  ;;  %v2725_v54 = vpop.f32.mrb[9].mxu0 }
 0x3ce   :  { %v4614_v63 = vadd.f32 %v2725_v54, %v2264_v35 }
 0x3cf   :  { %3184 = vst [vmem:[#allocation11] sm:$0xff] %v4613_v25 }
 0x3d0   :  { %3185 = vst [vmem:[#allocation11 + $0x8] sm:$0xff] %v4614_v63  ;;  %v2729_v47 = vpop.f32.mrb[10].mxu0 }
 0x3d1   :  { %v4615_v10 = vadd.f32 %v2729_v47, %v2260_v3  ;;  %v2731_v26 = vpop.f32.mrb[11].mxu0 }
 0x3d2   :  { %v4616_v27 = vadd.f32 %v2731_v26, %v2264_v35 }
 0x3d3   :  { %3187 = vst [vmem:[#allocation11 + $0x18] sm:$0xff] %v4615_v10 }
 0x3d4   :  { %3188 = vst [vmem:[#allocation11 + $0x20] sm:$0xff] %v4616_v27 }
 0x3d5   :  { %4801 = shalt.err (!%p4798_p2)
}
 0x3d6   :  { %s4802_s8 = scalar_lea.hbm %s5233_s5, 768 }
 0x3d7   :  { %p4803_p3 = scmp.ne.s32.totalorder %s5233_s5, %s4802_s8  ;;  %p4806_p4 = scmp.lt.u32.totalorder %s4802_s8, %s5233_s5 }
 0x3d9   :  { %p4808_p5 = pnand %p4806_p4, %p4803_p3 }
 0x3db   :  { %4811 = shalt.err (!%p4808_p5)
}
 0x3dc   :  { %3201 = dma.vmem_to_hbm [thread:$0]  %s3196_s3, 768, %s5233_s5, [#allocation4], %s4825_s18, %s4825_s18, %s4826_s19  }
 0x3dd   :  { %4818 = dma.done.wait [#allocation4], 768  }
 0x3de   :  { %4819 = vsyncadd [#allocation4], 4294966528 }
 0x3df   :  { %3205 = vsyncpa [#allocation3], 1 }
 0x3e0   :  { %3206 = vsyncpa [#allocation6], 1 }
 0x3e1   :  { %3207 = vsyncpa [#allocation9], 1 }
 0x3e2   :  { %3208 = vsyncpa [#allocation4], 1 }

</bundles_post_ra>
